<compile_context>
chip_gen: v7x
topology: tpu7x:2x2x1
jax: 0.10.0
libtpu: 0.0.40
codegen_flags: <defaults>
</compile_context>

<pallas_src>
import jax
import jax.numpy as jnp
import numpy as np
from jax.experimental import pallas as pl
from jax.experimental.pallas import tpu as pltpu

_LPAD = 8  # left zero-pad (sublanes) of the VMEM intermediate -> sublane-aligned store


def _round_up(x, m):
    return ((x + m - 1) // m) * m


def _fused_conv_block_kernel(x_ref, w1_ref, s1_ref, t1_ref,
                             w2_ref, s2_ref, t2_ref, o_ref, mid_ref):
    """Two fused conv3x3 -> BN(eval) -> ReLU stages for one NHWC image.

    x_ref  : (1, H+2, W+2, Cin_p)        input, 1-pixel zero ring, channels padded
    w1_ref : (9, Cin_p, Cmid_p)          stage-1 weights, taps in (kh, kw) order
    w2_ref : (9, Cmid_p, Cout_p)         stage-2 weights
    s*/t*  : (1, C_p)                    folded BN scale / (conv-bias + BN) shift
    o_ref  : (1, H, W, Cout_p)           output (lane-dense channel dim)
    mid_ref: (H+2, W+_LPAD+8, Cmid_p)    VMEM scratch: zero-padded stage-1 output
    """
    H, W = o_ref.shape[1], o_ref.shape[2]
    cin = x_ref.shape[3]
    cmid = mid_ref.shape[2]
    cout = o_ref.shape[3]

    # ---- stage 1: implicit-GEMM conv (9 shifted taps) + BN + ReLU, f32 accumulate ----
    acc1 = jnp.zeros((H * W, cmid), jnp.float32)
    for kh in range(3):
        for kw in range(3):
            patch = x_ref[0, kh:kh + H, kw:kw + W, :].reshape(H * W, cin)
            acc1 = acc1 + jnp.dot(patch, w1_ref[kh * 3 + kw],
                                  preferred_element_type=jnp.float32)
    y1 = jnp.maximum(acc1 * s1_ref[...] + t1_ref[...], 0.0)

    # Stage-1 output stays resident in VMEM inside a zero ring (no HBM round trip).
    mid_ref[...] = jnp.zeros_like(mid_ref)
    mid_ref[1:H + 1, _LPAD:_LPAD + W, :] = y1.reshape(H, W, cmid)

    # ---- stage 2: implicit-GEMM conv with lane-dense K = Cmid_p, + BN + ReLU ----
    acc2 = jnp.zeros((H * W, cout), jnp.float32)
    for kh in range(3):
        for kw in range(3):
            col = _LPAD - 1 + kw
            patch = mid_ref[kh:kh + H, col:col + W, :].reshape(H * W, cmid)
            acc2 = acc2 + jnp.dot(patch, w2_ref[kh * 3 + kw],
                                  preferred_element_type=jnp.float32)
    out = jnp.maximum(acc2 * s2_ref[...] + t2_ref[...], 0.0)
    o_ref[0] = out.reshape(H, W, cout).astype(o_ref.dtype)


def _pack_weight(w_oihw, cin_pad, cout_pad):
    """PyTorch (Cout, Cin, 3, 3) -> (9, Cin_p, Cout_p), taps (kh, kw) row-major."""
    cout, cin = w_oihw.shape[0], w_oihw.shape[1]
    w = jnp.transpose(w_oihw, (2, 3, 1, 0)).reshape(9, cin, cout)
    return jnp.pad(w, ((0, 0), (0, cin_pad - cin),
                       (0, cout_pad - cout))).astype(jnp.float32)


def _fold_bn(bias, gamma, beta, rmean, rvar, eps, c_pad):
    """Fold conv bias + eval-mode BN into per-channel scale/shift, zero-padded."""
    inv_std = gamma / jnp.sqrt(rvar + eps)
    scale = inv_std
    shift = beta + (bias - rmean) * inv_std
    c = scale.shape[0]
    scale = jnp.pad(scale, (0, c_pad - c)).reshape(1, c_pad).astype(jnp.float32)
    shift = jnp.pad(shift, (0, c_pad - c)).reshape(1, c_pad).astype(jnp.float32)
    return scale, shift


def conv_block_forward(x_nchw, params, eps=1e-5):
    """Equivalent of conv_block.forward (eval mode): (conv3x3 -> BN -> ReLU) x 2."""
    p = params
    N, Cin, H, W = x_nchw.shape
    Cmid = p["w1"].shape[0]
    Cout = p["w2"].shape[0]
    cin_p = _round_up(Cin, 8)        # sublane-aligned stage-1 contraction dim
    cmid_p = _round_up(Cmid, 128)    # lane-dense intermediate / stage-2 matmul K
    cout_p = _round_up(Cout, 128)    # lane-dense (unmasked) output stores

    x = jnp.transpose(x_nchw, (0, 2, 3, 1))                      # NCHW -> NHWC
    x = jnp.pad(x, ((0, 0), (1, 1), (1, 1), (0, cin_p - Cin)))   # +1 spatial zero ring

    w1 = _pack_weight(p["w1"], cin_p, cmid_p)
    w2 = _pack_weight(p["w2"], cmid_p, cout_p)
    s1, t1 = _fold_bn(p["b1"], p["g1"], p["be1"], p["rm1"], p["rv1"], eps, cmid_p)
    s2, t2 = _fold_bn(p["b2"], p["g2"], p["be2"], p["rm2"], p["rv2"], eps, cout_p)

    out = pl.pallas_call(
        _fused_conv_block_kernel,
        out_shape=jax.ShapeDtypeStruct((N, H, W, cout_p), x_nchw.dtype),
        grid_spec=pltpu.PrefetchScalarGridSpec(
            num_scalar_prefetch=0,
            grid=(N,),
            in_specs=[
                pl.BlockSpec((1, H + 2, W + 2, cin_p), lambda n: (n, 0, 0, 0)),
                pl.BlockSpec((9, cin_p, cmid_p), lambda n: (0, 0, 0)),
                pl.BlockSpec((1, cmid_p), lambda n: (0, 0)),
                pl.BlockSpec((1, cmid_p), lambda n: (0, 0)),
                pl.BlockSpec((9, cmid_p, cout_p), lambda n: (0, 0, 0)),
                pl.BlockSpec((1, cout_p), lambda n: (0, 0)),
                pl.BlockSpec((1, cout_p), lambda n: (0, 0)),
            ],
            out_specs=pl.BlockSpec((1, H, W, cout_p), lambda n: (n, 0, 0, 0)),
            scratch_shapes=[
                pltpu.VMEM((H + 2, W + _LPAD + 8, cmid_p), jnp.float32)],
        ),
        compiler_params=pltpu.CompilerParams(
            dimension_semantics=("parallel",)),
    )(x, w1, s1, t1, w2, s2, t2)

    out = out[..., :Cout]                        # drop channel lane padding
    return jnp.transpose(out, (0, 3, 1, 2))      # NHWC -> NCHW


def _reference_forward(x_nchw, params, eps=1e-5):
    """Pure-JAX reference (lax conv) for correctness checking."""
    def stage(x, w, b, g, be, rm, rv):
        y = jax.lax.conv_general_dilated(
            x, w, window_strides=(1, 1), padding=((1, 1), (1, 1)),
            dimension_numbers=("NCHW", "OIHW", "NCHW"))
        y = y + b[None, :, None, None]
        y = (y - rm[None, :, None, None]) / jnp.sqrt(rv + eps)[None, :, None, None]
        y = y * g[None, :, None, None] + be[None, :, None, None]
        return jnp.maximum(y, 0.0)

    p = params
    y = stage(x_nchw, p["w1"], p["b1"], p["g1"], p["be1"], p["rm1"], p["rv1"])
    y = stage(y, p["w2"], p["b2"], p["g2"], p["be2"], p["rm2"], p["rv2"])
    return y


def init_params(key, ch_in, ch_out):
    ks = jax.random.split(key, 12)
    f = jnp.float32
    return {
        "w1": 0.1 * jax.random.normal(ks[0], (ch_out, ch_in, 3, 3), f),
        "b1": 0.1 * jax.random.normal(ks[1], (ch_out,), f),
        "g1": 1.0 + 0.1 * jax.random.normal(ks[2], (ch_out,), f),
        "be1": 0.1 * jax.random.normal(ks[3], (ch_out,), f),
        "rm1": 0.1 * jax.random.normal(ks[4], (ch_out,), f),
        "rv1": 0.5 + jnp.abs(jax.random.normal(ks[5], (ch_out,), f)),
        "w2": 0.1 * jax.random.normal(ks[6], (ch_out, ch_out, 3, 3), f),
        "b2": 0.1 * jax.random.normal(ks[7], (ch_out,), f),
        "g2": 1.0 + 0.1 * jax.random.normal(ks[8], (ch_out,), f),
        "be2": 0.1 * jax.random.normal(ks[9], (ch_out,), f),
        "rm2": 0.1 * jax.random.normal(ks[10], (ch_out,), f),
        "rv2": 0.5 + jnp.abs(jax.random.normal(ks[11], (ch_out,), f)),
    }


if __name__ == "__main__":
    key = jax.random.PRNGKey(0)
    k_x, k_p = jax.random.split(key)

    N, CH_IN, CH_OUT, H, W = 2, 4, 8, 16, 16
    x = jax.random.normal(k_x, (N, CH_IN, H, W), jnp.float32)
    params = init_params(k_p, CH_IN, CH_OUT)

    out = jax.jit(conv_block_forward)(x, params)
    out = jax.block_until_ready(out)

    ref = _reference_forward(x, params)
    np.testing.assert_allclose(np.asarray(out), np.asarray(ref),
                               rtol=1e-4, atol=1e-4)
    assert out.shape == (N, CH_OUT, H, W)
    print("KERNEL_OK")
</pallas_src>

<mosaic_0001>
module attributes {stable_mosaic.version = 11 : i64} {
  func.func @_fused_conv_block_kernel(%arg0: i32, %arg1: memref<1x18x18x8xf32, #tpu.memory_space<vmem>>, %arg2: memref<9x8x128xf32, #tpu.memory_space<vmem>>, %arg3: memref<1x128xf32, #tpu.memory_space<vmem>>, %arg4: memref<1x128xf32, #tpu.memory_space<vmem>>, %arg5: memref<9x128x128xf32, #tpu.memory_space<vmem>>, %arg6: memref<1x128xf32, #tpu.memory_space<vmem>>, %arg7: memref<1x128xf32, #tpu.memory_space<vmem>>, %arg8: memref<1x16x16x128xf32, #tpu.memory_space<vmem>>, %arg9: memref<18x32x128xf32, #tpu.memory_space<vmem>>) attributes {dimension_semantics = [#tpu.dimension_semantics<parallel>], iteration_bounds = array<i64: 2>, scalar_prefetch = 0 : i64, scratch_operands = 1 : i64, tpu.core_type = #tpu.core_type<tc>, window_params = [{transform_indices = @transform_0, window_bounds = array<i64: 1, 18, 18, 8>}, {pipeline_mode = #tpu.pipeline_mode<synchronous>, transform_indices = @transform_1, window_bounds = array<i64: 9, 8, 128>}, {pipeline_mode = #tpu.pipeline_mode<synchronous>, transform_indices = @transform_2, window_bounds = array<i64: 1, 128>}, {pipeline_mode = #tpu.pipeline_mode<synchronous>, transform_indices = @transform_3, window_bounds = array<i64: 1, 128>}, {pipeline_mode = #tpu.pipeline_mode<synchronous>, transform_indices = @transform_4, window_bounds = array<i64: 9, 128, 128>}, {pipeline_mode = #tpu.pipeline_mode<synchronous>, transform_indices = @transform_5, window_bounds = array<i64: 1, 128>}, {pipeline_mode = #tpu.pipeline_mode<synchronous>, transform_indices = @transform_6, window_bounds = array<i64: 1, 128>}, {transform_indices = @transform_7, window_bounds = array<i64: 1, 16, 16, 128>}]} {
    %cst = arith.constant 0.000000e+00 : f32
    %0 = vector.broadcast %cst : f32 to vector<256x128xf32>
    %c0 = arith.constant 0 : index
    %c0_0 = arith.constant 0 : index
    %c0_1 = arith.constant 0 : index
    %c0_2 = arith.constant 0 : index
    %1 = vector.load %arg1[%c0, %c0_0, %c0_1, %c0_2] : memref<1x18x18x8xf32, #tpu.memory_space<vmem>>, vector<1x16x16x8xf32>
    %2 = vector.shape_cast %1 : vector<1x16x16x8xf32> to vector<16x16x8xf32>
    %3 = vector.shape_cast %2 : vector<16x16x8xf32> to vector<256x8xf32>
    %c0_3 = arith.constant 0 : index
    %c0_4 = arith.constant 0 : index
    %c0_5 = arith.constant 0 : index
    %4 = vector.load %arg2[%c0_3, %c0_4, %c0_5] : memref<9x8x128xf32, #tpu.memory_space<vmem>>, vector<1x8x128xf32>
    %5 = vector.shape_cast %4 : vector<1x8x128xf32> to vector<8x128xf32>
    %cst_6 = arith.constant dense<0.000000e+00> : vector<256x128xf32>
    %6 = tpu.matmul %3, %5, %cst_6 {dimension_numbers = #tpu.dot_dimension_numbers<[1], [0], [0], [1], [0, 0, 1, 1], [], []>} : vector<256x8xf32>, vector<8x128xf32>, vector<256x128xf32> -> vector<256x128xf32>
    %7 = arith.addf %0, %6 : vector<256x128xf32>
    %c0_7 = arith.constant 0 : index
    %c0_8 = arith.constant 0 : index
    %c1 = arith.constant 1 : index
    %c0_9 = arith.constant 0 : index
    %8 = vector.load %arg1[%c0_7, %c0_8, %c1, %c0_9] : memref<1x18x18x8xf32, #tpu.memory_space<vmem>>, vector<1x16x16x8xf32>
    %9 = vector.shape_cast %8 : vector<1x16x16x8xf32> to vector<16x16x8xf32>
    %10 = vector.shape_cast %9 : vector<16x16x8xf32> to vector<256x8xf32>
    %c1_10 = arith.constant 1 : index
    %c0_11 = arith.constant 0 : index
    %c0_12 = arith.constant 0 : index
    %11 = vector.load %arg2[%c1_10, %c0_11, %c0_12] : memref<9x8x128xf32, #tpu.memory_space<vmem>>, vector<1x8x128xf32>
    %12 = vector.shape_cast %11 : vector<1x8x128xf32> to vector<8x128xf32>
    %cst_13 = arith.constant dense<0.000000e+00> : vector<256x128xf32>
    %13 = tpu.matmul %10, %12, %cst_13 {dimension_numbers = #tpu.dot_dimension_numbers<[1], [0], [0], [1], [0, 0, 1, 1], [], []>} : vector<256x8xf32>, vector<8x128xf32>, vector<256x128xf32> -> vector<256x128xf32>
    %14 = arith.addf %7, %13 : vector<256x128xf32>
    %c0_14 = arith.constant 0 : index
    %c0_15 = arith.constant 0 : index
    %c2 = arith.constant 2 : index
    %c0_16 = arith.constant 0 : index
    %15 = vector.load %arg1[%c0_14, %c0_15, %c2, %c0_16] : memref<1x18x18x8xf32, #tpu.memory_space<vmem>>, vector<1x16x16x8xf32>
    %16 = vector.shape_cast %15 : vector<1x16x16x8xf32> to vector<16x16x8xf32>
    %17 = vector.shape_cast %16 : vector<16x16x8xf32> to vector<256x8xf32>
    %c2_17 = arith.constant 2 : index
    %c0_18 = arith.constant 0 : index
    %c0_19 = arith.constant 0 : index
    %18 = vector.load %arg2[%c2_17, %c0_18, %c0_19] : memref<9x8x128xf32, #tpu.memory_space<vmem>>, vector<1x8x128xf32>
    %19 = vector.shape_cast %18 : vector<1x8x128xf32> to vector<8x128xf32>
    %cst_20 = arith.constant dense<0.000000e+00> : vector<256x128xf32>
    %20 = tpu.matmul %17, %19, %cst_20 {dimension_numbers = #tpu.dot_dimension_numbers<[1], [0], [0], [1], [0, 0, 1, 1], [], []>} : vector<256x8xf32>, vector<8x128xf32>, vector<256x128xf32> -> vector<256x128xf32>
    %21 = arith.addf %14, %20 : vector<256x128xf32>
    %c0_21 = arith.constant 0 : index
    %c1_22 = arith.constant 1 : index
    %c0_23 = arith.constant 0 : index
    %c0_24 = arith.constant 0 : index
    %22 = vector.load %arg1[%c0_21, %c1_22, %c0_23, %c0_24] : memref<1x18x18x8xf32, #tpu.memory_space<vmem>>, vector<1x16x16x8xf32>
    %23 = vector.shape_cast %22 : vector<1x16x16x8xf32> to vector<16x16x8xf32>
    %24 = vector.shape_cast %23 : vector<16x16x8xf32> to vector<256x8xf32>
    %c3 = arith.constant 3 : index
    %c0_25 = arith.constant 0 : index
    %c0_26 = arith.constant 0 : index
    %25 = vector.load %arg2[%c3, %c0_25, %c0_26] : memref<9x8x128xf32, #tpu.memory_space<vmem>>, vector<1x8x128xf32>
    %26 = vector.shape_cast %25 : vector<1x8x128xf32> to vector<8x128xf32>
    %cst_27 = arith.constant dense<0.000000e+00> : vector<256x128xf32>
    %27 = tpu.matmul %24, %26, %cst_27 {dimension_numbers = #tpu.dot_dimension_numbers<[1], [0], [0], [1], [0, 0, 1, 1], [], []>} : vector<256x8xf32>, vector<8x128xf32>, vector<256x128xf32> -> vector<256x128xf32>
    %28 = arith.addf %21, %27 : vector<256x128xf32>
    %c0_28 = arith.constant 0 : index
    %c1_29 = arith.constant 1 : index
    %c1_30 = arith.constant 1 : index
    %c0_31 = arith.constant 0 : index
    %29 = vector.load %arg1[%c0_28, %c1_29, %c1_30, %c0_31] : memref<1x18x18x8xf32, #tpu.memory_space<vmem>>, vector<1x16x16x8xf32>
    %30 = vector.shape_cast %29 : vector<1x16x16x8xf32> to vector<16x16x8xf32>
    %31 = vector.shape_cast %30 : vector<16x16x8xf32> to vector<256x8xf32>
    %c4 = arith.constant 4 : index
    %c0_32 = arith.constant 0 : index
    %c0_33 = arith.constant 0 : index
    %32 = vector.load %arg2[%c4, %c0_32, %c0_33] : memref<9x8x128xf32, #tpu.memory_space<vmem>>, vector<1x8x128xf32>
    %33 = vector.shape_cast %32 : vector<1x8x128xf32> to vector<8x128xf32>
    %cst_34 = arith.constant dense<0.000000e+00> : vector<256x128xf32>
    %34 = tpu.matmul %31, %33, %cst_34 {dimension_numbers = #tpu.dot_dimension_numbers<[1], [0], [0], [1], [0, 0, 1, 1], [], []>} : vector<256x8xf32>, vector<8x128xf32>, vector<256x128xf32> -> vector<256x128xf32>
    %35 = arith.addf %28, %34 : vector<256x128xf32>
    %c0_35 = arith.constant 0 : index
    %c1_36 = arith.constant 1 : index
    %c2_37 = arith.constant 2 : index
    %c0_38 = arith.constant 0 : index
    %36 = vector.load %arg1[%c0_35, %c1_36, %c2_37, %c0_38] : memref<1x18x18x8xf32, #tpu.memory_space<vmem>>, vector<1x16x16x8xf32>
    %37 = vector.shape_cast %36 : vector<1x16x16x8xf32> to vector<16x16x8xf32>
    %38 = vector.shape_cast %37 : vector<16x16x8xf32> to vector<256x8xf32>
    %c5 = arith.constant 5 : index
    %c0_39 = arith.constant 0 : index
    %c0_40 = arith.constant 0 : index
    %39 = vector.load %arg2[%c5, %c0_39, %c0_40] : memref<9x8x128xf32, #tpu.memory_space<vmem>>, vector<1x8x128xf32>
    %40 = vector.shape_cast %39 : vector<1x8x128xf32> to vector<8x128xf32>
    %cst_41 = arith.constant dense<0.000000e+00> : vector<256x128xf32>
    %41 = tpu.matmul %38, %40, %cst_41 {dimension_numbers = #tpu.dot_dimension_numbers<[1], [0], [0], [1], [0, 0, 1, 1], [], []>} : vector<256x8xf32>, vector<8x128xf32>, vector<256x128xf32> -> vector<256x128xf32>
    %42 = arith.addf %35, %41 : vector<256x128xf32>
    %c0_42 = arith.constant 0 : index
    %c2_43 = arith.constant 2 : index
    %c0_44 = arith.constant 0 : index
    %c0_45 = arith.constant 0 : index
    %43 = vector.load %arg1[%c0_42, %c2_43, %c0_44, %c0_45] : memref<1x18x18x8xf32, #tpu.memory_space<vmem>>, vector<1x16x16x8xf32>
    %44 = vector.shape_cast %43 : vector<1x16x16x8xf32> to vector<16x16x8xf32>
    %45 = vector.shape_cast %44 : vector<16x16x8xf32> to vector<256x8xf32>
    %c6 = arith.constant 6 : index
    %c0_46 = arith.constant 0 : index
    %c0_47 = arith.constant 0 : index
    %46 = vector.load %arg2[%c6, %c0_46, %c0_47] : memref<9x8x128xf32, #tpu.memory_space<vmem>>, vector<1x8x128xf32>
    %47 = vector.shape_cast %46 : vector<1x8x128xf32> to vector<8x128xf32>
    %cst_48 = arith.constant dense<0.000000e+00> : vector<256x128xf32>
    %48 = tpu.matmul %45, %47, %cst_48 {dimension_numbers = #tpu.dot_dimension_numbers<[1], [0], [0], [1], [0, 0, 1, 1], [], []>} : vector<256x8xf32>, vector<8x128xf32>, vector<256x128xf32> -> vector<256x128xf32>
    %49 = arith.addf %42, %48 : vector<256x128xf32>
    %c0_49 = arith.constant 0 : index
    %c2_50 = arith.constant 2 : index
    %c1_51 = arith.constant 1 : index
    %c0_52 = arith.constant 0 : index
    %50 = vector.load %arg1[%c0_49, %c2_50, %c1_51, %c0_52] : memref<1x18x18x8xf32, #tpu.memory_space<vmem>>, vector<1x16x16x8xf32>
    %51 = vector.shape_cast %50 : vector<1x16x16x8xf32> to vector<16x16x8xf32>
    %52 = vector.shape_cast %51 : vector<16x16x8xf32> to vector<256x8xf32>
    %c7 = arith.constant 7 : index
    %c0_53 = arith.constant 0 : index
    %c0_54 = arith.constant 0 : index
    %53 = vector.load %arg2[%c7, %c0_53, %c0_54] : memref<9x8x128xf32, #tpu.memory_space<vmem>>, vector<1x8x128xf32>
    %54 = vector.shape_cast %53 : vector<1x8x128xf32> to vector<8x128xf32>
    %cst_55 = arith.constant dense<0.000000e+00> : vector<256x128xf32>
    %55 = tpu.matmul %52, %54, %cst_55 {dimension_numbers = #tpu.dot_dimension_numbers<[1], [0], [0], [1], [0, 0, 1, 1], [], []>} : vector<256x8xf32>, vector<8x128xf32>, vector<256x128xf32> -> vector<256x128xf32>
    %56 = arith.addf %49, %55 : vector<256x128xf32>
    %c0_56 = arith.constant 0 : index
    %c2_57 = arith.constant 2 : index
    %c2_58 = arith.constant 2 : index
    %c0_59 = arith.constant 0 : index
    %57 = vector.load %arg1[%c0_56, %c2_57, %c2_58, %c0_59] : memref<1x18x18x8xf32, #tpu.memory_space<vmem>>, vector<1x16x16x8xf32>
    %58 = vector.shape_cast %57 : vector<1x16x16x8xf32> to vector<16x16x8xf32>
    %59 = vector.shape_cast %58 : vector<16x16x8xf32> to vector<256x8xf32>
    %c8 = arith.constant 8 : index
    %c0_60 = arith.constant 0 : index
    %c0_61 = arith.constant 0 : index
    %60 = vector.load %arg2[%c8, %c0_60, %c0_61] : memref<9x8x128xf32, #tpu.memory_space<vmem>>, vector<1x8x128xf32>
    %61 = vector.shape_cast %60 : vector<1x8x128xf32> to vector<8x128xf32>
    %cst_62 = arith.constant dense<0.000000e+00> : vector<256x128xf32>
    %62 = tpu.matmul %59, %61, %cst_62 {dimension_numbers = #tpu.dot_dimension_numbers<[1], [0], [0], [1], [0, 0, 1, 1], [], []>} : vector<256x8xf32>, vector<8x128xf32>, vector<256x128xf32> -> vector<256x128xf32>
    %63 = arith.addf %56, %62 : vector<256x128xf32>
    %c0_63 = arith.constant 0 : index
    %c0_64 = arith.constant 0 : index
    %64 = vector.load %arg3[%c0_63, %c0_64] : memref<1x128xf32, #tpu.memory_space<vmem>>, vector<1x128xf32>
    %65 = vector.broadcast %64 : vector<1x128xf32> to vector<256x128xf32>
    %66 = arith.mulf %63, %65 : vector<256x128xf32>
    %c0_65 = arith.constant 0 : index
    %c0_66 = arith.constant 0 : index
    %67 = vector.load %arg4[%c0_65, %c0_66] : memref<1x128xf32, #tpu.memory_space<vmem>>, vector<1x128xf32>
    %68 = vector.broadcast %67 : vector<1x128xf32> to vector<256x128xf32>
    %69 = arith.addf %66, %68 : vector<256x128xf32>
    %cst_67 = arith.constant 0.000000e+00 : f32
    %70 = vector.broadcast %cst_67 : f32 to vector<256x128xf32>
    %71 = arith.maximumf %69, %70 : vector<256x128xf32>
    %cst_68 = arith.constant 0.000000e+00 : f32
    %72 = vector.broadcast %cst_68 : f32 to vector<18x32x128xf32>
    %c0_69 = arith.constant 0 : index
    %c0_70 = arith.constant 0 : index
    %c0_71 = arith.constant 0 : index
    %73 = vector.load %arg9[%c0_69, %c0_70, %c0_71] : memref<18x32x128xf32, #tpu.memory_space<vmem>>, vector<18x32x128xf32>
    tpu.vector_store %arg9[%c0_69, %c0_70, %c0_71], %72 {strides = array<i32>} : memref<18x32x128xf32, #tpu.memory_space<vmem>>, vector<18x32x128xf32>,
    %74 = vector.shape_cast %71 : vector<256x128xf32> to vector<16x16x128xf32>
    %c1_72 = arith.constant 1 : index
    %c8_73 = arith.constant 8 : index
    %c0_74 = arith.constant 0 : index
    %75 = vector.load %arg9[%c1_72, %c8_73, %c0_74] : memref<18x32x128xf32, #tpu.memory_space<vmem>>, vector<16x16x128xf32>
    tpu.vector_store %arg9[%c1_72, %c8_73, %c0_74], %74 {strides = array<i32>} : memref<18x32x128xf32, #tpu.memory_space<vmem>>, vector<16x16x128xf32>,
    %cst_75 = arith.constant 0.000000e+00 : f32
    %76 = vector.broadcast %cst_75 : f32 to vector<256x128xf32>
    %c0_76 = arith.constant 0 : index
    %c7_77 = arith.constant 7 : index
    %c0_78 = arith.constant 0 : index
    %77 = vector.load %arg9[%c0_76, %c7_77, %c0_78] : memref<18x32x128xf32, #tpu.memory_space<vmem>>, vector<16x16x128xf32>
    %78 = vector.shape_cast %77 : vector<16x16x128xf32> to vector<256x128xf32>
    %c0_79 = arith.constant 0 : index
    %c0_80 = arith.constant 0 : index
    %c0_81 = arith.constant 0 : index
    %79 = vector.load %arg5[%c0_79, %c0_80, %c0_81] : memref<9x128x128xf32, #tpu.memory_space<vmem>>, vector<1x128x128xf32>
    %80 = vector.shape_cast %79 : vector<1x128x128xf32> to vector<128x128xf32>
    %cst_82 = arith.constant dense<0.000000e+00> : vector<256x128xf32>
    %81 = tpu.matmul %78, %80, %cst_82 {dimension_numbers = #tpu.dot_dimension_numbers<[1], [0], [0], [1], [0, 0, 1, 1], [], []>} : vector<256x128xf32>, vector<128x128xf32>, vector<256x128xf32> -> vector<256x128xf32>
    %82 = arith.addf %76, %81 : vector<256x128xf32>
    %c0_83 = arith.constant 0 : index
    %c8_84 = arith.constant 8 : index
    %c0_85 = arith.constant 0 : index
    %83 = vector.load %arg9[%c0_83, %c8_84, %c0_85] : memref<18x32x128xf32, #tpu.memory_space<vmem>>, vector<16x16x128xf32>
    %84 = vector.shape_cast %83 : vector<16x16x128xf32> to vector<256x128xf32>
    %c1_86 = arith.constant 1 : index
    %c0_87 = arith.constant 0 : index
    %c0_88 = arith.constant 0 : index
    %85 = vector.load %arg5[%c1_86, %c0_87, %c0_88] : memref<9x128x128xf32, #tpu.memory_space<vmem>>, vector<1x128x128xf32>
    %86 = vector.shape_cast %85 : vector<1x128x128xf32> to vector<128x128xf32>
    %cst_89 = arith.constant dense<0.000000e+00> : vector<256x128xf32>
    %87 = tpu.matmul %84, %86, %cst_89 {dimension_numbers = #tpu.dot_dimension_numbers<[1], [0], [0], [1], [0, 0, 1, 1], [], []>} : vector<256x128xf32>, vector<128x128xf32>, vector<256x128xf32> -> vector<256x128xf32>
    %88 = arith.addf %82, %87 : vector<256x128xf32>
    %c0_90 = arith.constant 0 : index
    %c9 = arith.constant 9 : index
    %c0_91 = arith.constant 0 : index
    %89 = vector.load %arg9[%c0_90, %c9, %c0_91] : memref<18x32x128xf32, #tpu.memory_space<vmem>>, vector<16x16x128xf32>
    %90 = vector.shape_cast %89 : vector<16x16x128xf32> to vector<256x128xf32>
    %c2_92 = arith.constant 2 : index
    %c0_93 = arith.constant 0 : index
    %c0_94 = arith.constant 0 : index
    %91 = vector.load %arg5[%c2_92, %c0_93, %c0_94] : memref<9x128x128xf32, #tpu.memory_space<vmem>>, vector<1x128x128xf32>
    %92 = vector.shape_cast %91 : vector<1x128x128xf32> to vector<128x128xf32>
    %cst_95 = arith.constant dense<0.000000e+00> : vector<256x128xf32>
    %93 = tpu.matmul %90, %92, %cst_95 {dimension_numbers = #tpu.dot_dimension_numbers<[1], [0], [0], [1], [0, 0, 1, 1], [], []>} : vector<256x128xf32>, vector<128x128xf32>, vector<256x128xf32> -> vector<256x128xf32>
    %94 = arith.addf %88, %93 : vector<256x128xf32>
    %c1_96 = arith.constant 1 : index
    %c7_97 = arith.constant 7 : index
    %c0_98 = arith.constant 0 : index
    %95 = vector.load %arg9[%c1_96, %c7_97, %c0_98] : memref<18x32x128xf32, #tpu.memory_space<vmem>>, vector<16x16x128xf32>
    %96 = vector.shape_cast %95 : vector<16x16x128xf32> to vector<256x128xf32>
    %c3_99 = arith.constant 3 : index
    %c0_100 = arith.constant 0 : index
    %c0_101 = arith.constant 0 : index
    %97 = vector.load %arg5[%c3_99, %c0_100, %c0_101] : memref<9x128x128xf32, #tpu.memory_space<vmem>>, vector<1x128x128xf32>
    %98 = vector.shape_cast %97 : vector<1x128x128xf32> to vector<128x128xf32>
    %cst_102 = arith.constant dense<0.000000e+00> : vector<256x128xf32>
    %99 = tpu.matmul %96, %98, %cst_102 {dimension_numbers = #tpu.dot_dimension_numbers<[1], [0], [0], [1], [0, 0, 1, 1], [], []>} : vector<256x128xf32>, vector<128x128xf32>, vector<256x128xf32> -> vector<256x128xf32>
    %100 = arith.addf %94, %99 : vector<256x128xf32>
    %c1_103 = arith.constant 1 : index
    %c8_104 = arith.constant 8 : index
    %c0_105 = arith.constant 0 : index
    %101 = vector.load %arg9[%c1_103, %c8_104, %c0_105] : memref<18x32x128xf32, #tpu.memory_space<vmem>>, vector<16x16x128xf32>
    %102 = vector.shape_cast %101 : vector<16x16x128xf32> to vector<256x128xf32>
    %c4_106 = arith.constant 4 : index
    %c0_107 = arith.constant 0 : index
    %c0_108 = arith.constant 0 : index
    %103 = vector.load %arg5[%c4_106, %c0_107, %c0_108] : memref<9x128x128xf32, #tpu.memory_space<vmem>>, vector<1x128x128xf32>
    %104 = vector.shape_cast %103 : vector<1x128x128xf32> to vector<128x128xf32>
    %cst_109 = arith.constant dense<0.000000e+00> : vector<256x128xf32>
    %105 = tpu.matmul %102, %104, %cst_109 {dimension_numbers = #tpu.dot_dimension_numbers<[1], [0], [0], [1], [0, 0, 1, 1], [], []>} : vector<256x128xf32>, vector<128x128xf32>, vector<256x128xf32> -> vector<256x128xf32>
    %106 = arith.addf %100, %105 : vector<256x128xf32>
    %c1_110 = arith.constant 1 : index
    %c9_111 = arith.constant 9 : index
    %c0_112 = arith.constant 0 : index
    %107 = vector.load %arg9[%c1_110, %c9_111, %c0_112] : memref<18x32x128xf32, #tpu.memory_space<vmem>>, vector<16x16x128xf32>
    %108 = vector.shape_cast %107 : vector<16x16x128xf32> to vector<256x128xf32>
    %c5_113 = arith.constant 5 : index
    %c0_114 = arith.constant 0 : index
    %c0_115 = arith.constant 0 : index
    %109 = vector.load %arg5[%c5_113, %c0_114, %c0_115] : memref<9x128x128xf32, #tpu.memory_space<vmem>>, vector<1x128x128xf32>
    %110 = vector.shape_cast %109 : vector<1x128x128xf32> to vector<128x128xf32>
    %cst_116 = arith.constant dense<0.000000e+00> : vector<256x128xf32>
    %111 = tpu.matmul %108, %110, %cst_116 {dimension_numbers = #tpu.dot_dimension_numbers<[1], [0], [0], [1], [0, 0, 1, 1], [], []>} : vector<256x128xf32>, vector<128x128xf32>, vector<256x128xf32> -> vector<256x128xf32>
    %112 = arith.addf %106, %111 : vector<256x128xf32>
    %c2_117 = arith.constant 2 : index
    %c7_118 = arith.constant 7 : index
    %c0_119 = arith.constant 0 : index
    %113 = vector.load %arg9[%c2_117, %c7_118, %c0_119] : memref<18x32x128xf32, #tpu.memory_space<vmem>>, vector<16x16x128xf32>
    %114 = vector.shape_cast %113 : vector<16x16x128xf32> to vector<256x128xf32>
    %c6_120 = arith.constant 6 : index
    %c0_121 = arith.constant 0 : index
    %c0_122 = arith.constant 0 : index
    %115 = vector.load %arg5[%c6_120, %c0_121, %c0_122] : memref<9x128x128xf32, #tpu.memory_space<vmem>>, vector<1x128x128xf32>
    %116 = vector.shape_cast %115 : vector<1x128x128xf32> to vector<128x128xf32>
    %cst_123 = arith.constant dense<0.000000e+00> : vector<256x128xf32>
    %117 = tpu.matmul %114, %116, %cst_123 {dimension_numbers = #tpu.dot_dimension_numbers<[1], [0], [0], [1], [0, 0, 1, 1], [], []>} : vector<256x128xf32>, vector<128x128xf32>, vector<256x128xf32> -> vector<256x128xf32>
    %118 = arith.addf %112, %117 : vector<256x128xf32>
    %c2_124 = arith.constant 2 : index
    %c8_125 = arith.constant 8 : index
    %c0_126 = arith.constant 0 : index
    %119 = vector.load %arg9[%c2_124, %c8_125, %c0_126] : memref<18x32x128xf32, #tpu.memory_space<vmem>>, vector<16x16x128xf32>
    %120 = vector.shape_cast %119 : vector<16x16x128xf32> to vector<256x128xf32>
    %c7_127 = arith.constant 7 : index
    %c0_128 = arith.constant 0 : index
    %c0_129 = arith.constant 0 : index
    %121 = vector.load %arg5[%c7_127, %c0_128, %c0_129] : memref<9x128x128xf32, #tpu.memory_space<vmem>>, vector<1x128x128xf32>
    %122 = vector.shape_cast %121 : vector<1x128x128xf32> to vector<128x128xf32>
    %cst_130 = arith.constant dense<0.000000e+00> : vector<256x128xf32>
    %123 = tpu.matmul %120, %122, %cst_130 {dimension_numbers = #tpu.dot_dimension_numbers<[1], [0], [0], [1], [0, 0, 1, 1], [], []>} : vector<256x128xf32>, vector<128x128xf32>, vector<256x128xf32> -> vector<256x128xf32>
    %124 = arith.addf %118, %123 : vector<256x128xf32>
    %c2_131 = arith.constant 2 : index
    %c9_132 = arith.constant 9 : index
    %c0_133 = arith.constant 0 : index
    %125 = vector.load %arg9[%c2_131, %c9_132, %c0_133] : memref<18x32x128xf32, #tpu.memory_space<vmem>>, vector<16x16x128xf32>
    %126 = vector.shape_cast %125 : vector<16x16x128xf32> to vector<256x128xf32>
    %c8_134 = arith.constant 8 : index
    %c0_135 = arith.constant 0 : index
    %c0_136 = arith.constant 0 : index
    %127 = vector.load %arg5[%c8_134, %c0_135, %c0_136] : memref<9x128x128xf32, #tpu.memory_space<vmem>>, vector<1x128x128xf32>
    %128 = vector.shape_cast %127 : vector<1x128x128xf32> to vector<128x128xf32>
    %cst_137 = arith.constant dense<0.000000e+00> : vector<256x128xf32>
    %129 = tpu.matmul %126, %128, %cst_137 {dimension_numbers = #tpu.dot_dimension_numbers<[1], [0], [0], [1], [0, 0, 1, 1], [], []>} : vector<256x128xf32>, vector<128x128xf32>, vector<256x128xf32> -> vector<256x128xf32>
    %130 = arith.addf %124, %129 : vector<256x128xf32>
    %c0_138 = arith.constant 0 : index
    %c0_139 = arith.constant 0 : index
    %131 = vector.load %arg6[%c0_138, %c0_139] : memref<1x128xf32, #tpu.memory_space<vmem>>, vector<1x128xf32>
    %132 = vector.broadcast %131 : vector<1x128xf32> to vector<256x128xf32>
    %133 = arith.mulf %130, %132 : vector<256x128xf32>
    %c0_140 = arith.constant 0 : index
    %c0_141 = arith.constant 0 : index
    %134 = vector.load %arg7[%c0_140, %c0_141] : memref<1x128xf32, #tpu.memory_space<vmem>>, vector<1x128xf32>
    %135 = vector.broadcast %134 : vector<1x128xf32> to vector<256x128xf32>
    %136 = arith.addf %133, %135 : vector<256x128xf32>
    %cst_142 = arith.constant 0.000000e+00 : f32
    %137 = vector.broadcast %cst_142 : f32 to vector<256x128xf32>
    %138 = arith.maximumf %136, %137 : vector<256x128xf32>
    %139 = vector.shape_cast %138 : vector<256x128xf32> to vector<16x16x128xf32>
    %c0_143 = arith.constant 0 : index
    %c0_144 = arith.constant 0 : index
    %c0_145 = arith.constant 0 : index
    %c0_146 = arith.constant 0 : index
    %140 = vector.load %arg8[%c0_143, %c0_144, %c0_145, %c0_146] : memref<1x16x16x128xf32, #tpu.memory_space<vmem>>, vector<1x16x16x128xf32>
    %141 = vector.shape_cast %140 : vector<1x16x16x128xf32> to vector<16x16x128xf32>
    %142 = vector.shape_cast %139 : vector<16x16x128xf32> to vector<1x16x16x128xf32>
    tpu.vector_store %arg8[%c0_143, %c0_144, %c0_145, %c0_146], %142 {strides = array<i32>} : memref<1x16x16x128xf32, #tpu.memory_space<vmem>>, vector<1x16x16x128xf32>,
    return
  }
  func.func @transform_0(%arg0: i32) -> (i32, i32, i32, i32) {
    %c0_i32 = arith.constant 0 : i32
    %c0_i32_0 = arith.constant 0 : i32
    %c0_i32_1 = arith.constant 0 : i32
    %c0_i32_2 = arith.constant 0 : i32
    return %arg0, %c0_i32, %c0_i32_0, %c0_i32_1 : i32, i32, i32, i32
  }
  func.func @transform_1(%arg0: i32) -> (i32, i32, i32) {
    %c0_i32 = arith.constant 0 : i32
    %c0_i32_0 = arith.constant 0 : i32
    %c0_i32_1 = arith.constant 0 : i32
    %c0_i32_2 = arith.constant 0 : i32
    return %c0_i32, %c0_i32_0, %c0_i32_1 : i32, i32, i32
  }
  func.func @transform_2(%arg0: i32) -> (i32, i32) {
    %c0_i32 = arith.constant 0 : i32
    %c0_i32_0 = arith.constant 0 : i32
    %c0_i32_1 = arith.constant 0 : i32
    return %c0_i32, %c0_i32_0 : i32, i32
  }
  func.func @transform_3(%arg0: i32) -> (i32, i32) {
    %c0_i32 = arith.constant 0 : i32
    %c0_i32_0 = arith.constant 0 : i32
    %c0_i32_1 = arith.constant 0 : i32
    return %c0_i32, %c0_i32_0 : i32, i32
  }
  func.func @transform_4(%arg0: i32) -> (i32, i32, i32) {
    %c0_i32 = arith.constant 0 : i32
    %c0_i32_0 = arith.constant 0 : i32
    %c0_i32_1 = arith.constant 0 : i32
    %c0_i32_2 = arith.constant 0 : i32
    return %c0_i32, %c0_i32_0, %c0_i32_1 : i32, i32, i32
  }
  func.func @transform_5(%arg0: i32) -> (i32, i32) {
    %c0_i32 = arith.constant 0 : i32
    %c0_i32_0 = arith.constant 0 : i32
    %c0_i32_1 = arith.constant 0 : i32
    return %c0_i32, %c0_i32_0 : i32, i32
  }
  func.func @transform_6(%arg0: i32) -> (i32, i32) {
    %c0_i32 = arith.constant 0 : i32
    %c0_i32_0 = arith.constant 0 : i32
    %c0_i32_1 = arith.constant 0 : i32
    return %c0_i32, %c0_i32_0 : i32, i32
  }
  func.func @transform_7(%arg0: i32) -> (i32, i32, i32, i32) {
    %c0_i32 = arith.constant 0 : i32
    %c0_i32_0 = arith.constant 0 : i32
    %c0_i32_1 = arith.constant 0 : i32
    %c0_i32_2 = arith.constant 0 : i32
    return %arg0, %c0_i32, %c0_i32_0, %c0_i32_1 : i32, i32, i32, i32
  }
}

</mosaic_0001>

<bundles_post_ra>
// kernel: conv_block_forward.1
= control target key start
LH: loop header
LB: loop body
LE: loop exit
PB: predicated region body
PF: predicated region fallthrough
CT: control target
= control target key end

     0   :  { %s10208_s24 = smov 0   ;;  %s12163_s0 = inlined_call_operand.vmem [shape: f32[2,18,18,8], index: 0, kind: input, shape index: {}]   ;;  %s12164_s1 = inlined_call_operand.vmem [shape: f32[9,8,128], index: 1, kind: input, shape index: {}]   ;;  %s12165_s2 = inlined_call_operand.vmem [shape: f32[1,128], index: 2, kind: input, shape index: {}]   ;;  %s12166_s3 = inlined_call_operand.vmem [shape: f32[1,128], index: 3, kind: input, shape index: {}]   ;;  %s12167_s4 = inlined_call_operand.vmem [shape: f32[9,128,128], index: 4, kind: input, shape index: {}]   ;;  %s12168_s5 = inlined_call_operand.vmem [shape: f32[1,128], index: 5, kind: input, shape index: {}]   ;;  %s12169_s6 = inlined_call_operand.vmem [shape: f32[1,128], index: 6, kind: input, shape index: {}]   ;;  %s12170_s7 = inlined_call_operand.vmem [shape: f32[2,16,16,128], index: 7, kind: output, shape index: {}]  }
   0x1 LB: > { %s6802_s25 = sadd.s32 4294967295, %s10165_s24   ;;  %p6806_p0 = scmp.ge.s32.totalorder %s10165_s24, 1  ;;  %s10165_s24 = sphi %s10208_s24, %s17_s24  }
   0x2   : > { %p237_p1 = scmp.lt.s32.totalorder %s10165_s24, 3 }
   0x4   : > { %p238_p2 = pnand %p6806_p0, %p237_p1 }
   0x6   : > { %241 = sbr.rel (%p238_p2) target bundleno = 1541 (0x605), region = 48 }
   0xd   : > { %v6810_v0 = vld [vmem:[%s12164_s1 + $0x8] sm:$0xff]  ;;  %p269_p3 = scmp.lt.s32.totalorder %s6802_s25, 1  ;;  %v311_v1 = vld [vmem:[%s12164_s1] sm:$0xff]  ;;  %vm346_vm0 = vcmask 64512   ;;  %v10239_v5 = vld [vmem:[%s12164_s1 + $0x10] sm:$0xff] }
   0xe   : > { %8162 = vmatprep.subr.mxu0 %v6810_v0  ;;  %v10399_v38 = vld [vmem:[%s12164_s1 + $0x18] sm:$0xff] }
   0xf   : > { %8163 = vmatpush3.msra.mxu0 %v6810_v0  ;;  %s12382_s25 = smov (!%p269_p3, %s6802_s25), 1 }
  0x10   : > { %8212 = vmatprep.subr.mxu0 %v311_v1  ;;  %s10148_s30 = smul.u32 432, %s12382_s25 }
  0x12   : > { %s10228_s10 = scalar_lea.vmem %s12163_s0, %s10148_s30  ;;  %s7432_s30 = sshll.u32 %s12382_s25, 8 }
  0x13   : > { %v312_v2 = vld [vmem:[%s10228_s10 + $0x1] sm:$0xff]  ;;  %v313_v3 = vld [vmem:[%s10228_s10 + $0x9] sm:$0xff]  ;;  %v10233_v4 = vld [vmem:[%s10228_s10 + $0x19] sm:$0xff]  ;;  %s12062_s11 = scalar_lea.vmem %s12170_s7, %s7432_s30 }
  0x14   : > { %8164 = vmatprep.mubr.msk.f32.mxu0 %vm346_vm0, %v312_v2  ;;  %v10245_v6 = vld [vmem:[%s10228_s10 + $0x21] sm:$0xff]  ;;  %v10248_v7 = vld [vmem:[%s10228_s10 + $0x31] sm:$0xff]  ;;  %v10256_v8 = vld [vmem:[%s10228_s10 + $0x39] sm:$0xff] }
  0x15   : > { %8165 = vmatmul.mubr.msk.f32.vlgmr.msra.gmra.mrb[0].mxu0 %vm346_vm0, %v313_v3  ;;  %v10259_v9 = vld [vmem:[%s10228_s10 + $0x49] sm:$0xff]  ;;  %v10266_v10 = vld [vmem:[%s10228_s10 + $0x51] sm:$0xff]  ;;  %v10269_v11 = vld [vmem:[%s10228_s10 + $0x61] sm:$0xff] }
  0x16   : > { %8213 = vmatpush3.msra.mxu0 %v311_v1  ;;  %8167 = vmatprep.mubr.msk.f32.mxu0 %vm346_vm0, %v10233_v4  ;;  %v10276_v12 = vld [vmem:[%s10228_s10 + $0x69] sm:$0xff]  ;;  %v10279_v13 = vld [vmem:[%s10228_s10 + $0x79] sm:$0xff]  ;;  %v10286_v14 = vld [vmem:[%s10228_s10 + $0x81] sm:$0xff] }
  0x17   : > { %8262 = vmatprep.subr.mxu0 %v10239_v5  ;;  %v10289_v15 = vld [vmem:[%s10228_s10 + $0x91] sm:$0xff]  ;;  %v10296_v16 = vld [vmem:[%s10228_s10 + $0x99] sm:$0xff]  ;;  %v10299_v17 = vld [vmem:[%s10228_s10 + $0xa9] sm:$0xff] }
  0x18   : > { %v10306_v18 = vld [vmem:[%s10228_s10 + $0xb1] sm:$0xff]  ;;  %v10309_v19 = vld [vmem:[%s10228_s10 + $0xc1] sm:$0xff]  ;;  %v10316_v20 = vld [vmem:[%s10228_s10 + $0xc9] sm:$0xff] }
  0x19   : > { %8168 = vmatmul.mubr.msk.f32.gmra.mrb[2].mxu0 %vm346_vm0, %v10245_v6  ;;  %v10319_v21 = vld [vmem:[%s10228_s10 + $0xd9] sm:$0xff]  ;;  %v10326_v22 = vld [vmem:[%s10228_s10 + $0xe1] sm:$0xff]  ;;  %v10329_v23 = vld [vmem:[%s10228_s10 + $0xf1] sm:$0xff] }
  0x1a   : > { %8170 = vmatprep.mubr.msk.f32.mxu0 %vm346_vm0, %v10248_v7  ;;  %v10336_v24 = vld [vmem:[%s10228_s10 + $0xf9] sm:$0xff]  ;;  %v10339_v25 = vld [vmem:[%s10228_s10 + $0x109] sm:$0xff]  ;;  %v10346_v26 = vld [vmem:[%s10228_s10 + $0x111] sm:$0xff] }
  0x1b   : > { %v10349_v27 = vld [vmem:[%s10228_s10 + $0x121] sm:$0xff]  ;;  %v10356_v28 = vld [vmem:[%s10228_s10 + $0x129] sm:$0xff]  ;;  %v10359_v29 = vld [vmem:[%s10228_s10 + $0x139] sm:$0xff] }
  0x1c   : > { %12251 = vst [vmem:[#allocation3_spill] sm:$0xff] %v10349_v27  ;;  %12252 = vst [vmem:[#allocation4_spill] sm:$0xff] %v10356_v28  ;;  %v10366_v30 = vld [vmem:[%s10228_s10 + $0x141] sm:$0xff]  ;;  %v10369_v31 = vld [vmem:[%s10228_s10 + $0x151] sm:$0xff] }
  0x1d   : > { %8171 = vmatmul.mubr.msk.f32.gmra.mrb[4].mxu0 %vm346_vm0, %v10256_v8  ;;  %12253 = vst [vmem:[#allocation5_spill] sm:$0xff] %v10359_v29  ;;  %12254 = vst [vmem:[#allocation6_spill] sm:$0xff] %v10366_v30  ;;  %v10376_v32 = vld [vmem:[%s10228_s10 + $0x159] sm:$0xff]  ;;  %v10379_v33 = vld [vmem:[%s10228_s10 + $0x169] sm:$0xff] }
  0x1e   : > { %8173 = vmatprep.mubr.msk.f32.mxu0 %vm346_vm0, %v10259_v9  ;;  %12255 = vst [vmem:[#allocation7_spill] sm:$0xff] %v10369_v31  ;;  %12256 = vst [vmem:[#allocation8_spill] sm:$0xff] %v10376_v32  ;;  %v10386_v34 = vld [vmem:[%s10228_s10 + $0x171] sm:$0xff]  ;;  %v279_v35 = vld [vmem:[%s10228_s10] sm:$0xff] }
  0x1f   : > { %12257 = vst [vmem:[#allocation9_spill] sm:$0xff] %v10379_v33  ;;  %12258 = vst [vmem:[#allocation10_spill] sm:$0xff] %v10386_v34  ;;  %v280_v36 = vld [vmem:[%s10228_s10 + $0x8] sm:$0xff]  ;;  %v10394_v37 = vld [vmem:[%s10228_s10 + $0x18] sm:$0xff] }
  0x20   : > { %v10406_v39 = vld [vmem:[%s10228_s10 + $0x20] sm:$0xff]  ;;  %v10409_v40 = vld [vmem:[%s10228_s10 + $0x30] sm:$0xff]  ;;  %v10417_v41 = vld [vmem:[%s10228_s10 + $0x38] sm:$0xff] }
  0x21   : > { %8174 = vmatmul.mubr.msk.f32.gmra.mrb[6].mxu0 %vm346_vm0, %v10266_v10  ;;  %v10420_v42 = vld [vmem:[%s10228_s10 + $0x48] sm:$0xff]  ;;  %v10427_v43 = vld [vmem:[%s10228_s10 + $0x50] sm:$0xff]  ;;  %v10430_v44 = vld [vmem:[%s10228_s10 + $0x60] sm:$0xff] }
  0x22   : > { %8176 = vmatprep.mubr.msk.f32.mxu0 %vm346_vm0, %v10269_v11  ;;  %v10437_v45 = vld [vmem:[%s10228_s10 + $0x68] sm:$0xff]  ;;  %v10440_v46 = vld [vmem:[%s10228_s10 + $0x78] sm:$0xff]  ;;  %v10447_v47 = vld [vmem:[%s10228_s10 + $0x80] sm:$0xff] }
  0x23   : > { %v10450_v48 = vld [vmem:[%s10228_s10 + $0x90] sm:$0xff]  ;;  %v10457_v49 = vld [vmem:[%s10228_s10 + $0x98] sm:$0xff]  ;;  %v10460_v50 = vld [vmem:[%s10228_s10 + $0xa8] sm:$0xff] }
  0x24   : > { %v10467_v51 = vld [vmem:[%s10228_s10 + $0xb0] sm:$0xff]  ;;  %v10470_v52 = vld [vmem:[%s10228_s10 + $0xc0] sm:$0xff]  ;;  %v10477_v53 = vld [vmem:[%s10228_s10 + $0xc8] sm:$0xff] }
  0x25   : > { %8177 = vmatmul.mubr.msk.f32.gmra.mrb[8].mxu0 %vm346_vm0, %v10276_v12  ;;  %v10480_v54 = vld [vmem:[%s10228_s10 + $0xd8] sm:$0xff]  ;;  %v10487_v55 = vld [vmem:[%s10228_s10 + $0xe0] sm:$0xff]  ;;  %v10490_v56 = vld [vmem:[%s10228_s10 + $0xf0] sm:$0xff] }
  0x26   : > { %8179 = vmatprep.mubr.msk.f32.mxu0 %vm346_vm0, %v10279_v13  ;;  %v10497_v57 = vld [vmem:[%s10228_s10 + $0xf8] sm:$0xff]  ;;  %v10500_v58 = vld [vmem:[%s10228_s10 + $0x108] sm:$0xff]  ;;  %v10507_v59 = vld [vmem:[%s10228_s10 + $0x110] sm:$0xff] }
  0x27   : > { %v10510_v60 = vld [vmem:[%s10228_s10 + $0x120] sm:$0xff]  ;;  %v10517_v61 = vld [vmem:[%s10228_s10 + $0x128] sm:$0xff]  ;;  %v10520_v62 = vld [vmem:[%s10228_s10 + $0x138] sm:$0xff] }
  0x28   : > { %v10527_v63 = vld [vmem:[%s10228_s10 + $0x140] sm:$0xff]  ;;  %v10530_v0 = vld [vmem:[%s10228_s10 + $0x150] sm:$0xff]  ;;  %v10537_v1 = vld [vmem:[%s10228_s10 + $0x158] sm:$0xff] }
  0x29   : > { %8180 = vmatmul.mubr.msk.f32.gmra.mrb[10].mxu0 %vm346_vm0, %v10286_v14  ;;  %v10540_v2 = vld [vmem:[%s10228_s10 + $0x168] sm:$0xff]  ;;  %v10547_v3 = vld [vmem:[%s10228_s10 + $0x170] sm:$0xff] }
  0x2a   : > { %8182 = vmatprep.mubr.msk.f32.mxu0 %vm346_vm0, %v10289_v15 }
  0x2d   : > { %8183 = vmatmul.mubr.msk.f32.gmra.mrb[12].mxu0 %vm346_vm0, %v10296_v16 }
  0x2e   : > { %8185 = vmatprep.mubr.msk.f32.mxu0 %vm346_vm0, %v10299_v17 }
  0x31   : > { %8186 = vmatmul.mubr.msk.f32.gmra.mrb[14].mxu0 %vm346_vm0, %v10306_v18 }
  0x32   : > { %8188 = vmatprep.mubr.msk.f32.mxu0 %vm346_vm0, %v10309_v19 }
  0x35   : > { %8189 = vmatmul.mubr.msk.f32.gmra.mrb[16].mxu0 %vm346_vm0, %v10316_v20 }
  0x36   : > { %8191 = vmatprep.mubr.msk.f32.mxu0 %vm346_vm0, %v10319_v21 }
  0x39   : > { %8192 = vmatmul.mubr.msk.f32.gmra.mrb[18].mxu0 %vm346_vm0, %v10326_v22 }
  0x3a   : > { %8194 = vmatprep.mubr.msk.f32.mxu0 %vm346_vm0, %v10329_v23 }
  0x3d   : > { %8195 = vmatmul.mubr.msk.f32.gmra.mrb[20].mxu0 %vm346_vm0, %v10336_v24 }
  0x3e   : > { %8197 = vmatprep.mubr.msk.f32.mxu0 %vm346_vm0, %v10339_v25 }
  0x41   : > { %8198 = vmatmul.mubr.msk.f32.gmra.mrb[22].mxu0 %vm346_vm0, %v10346_v26 }
  0x42   : > { %8200 = vmatprep.mubr.msk.f32.mxu0 %vm346_vm0, %v10349_v27 }
  0x45   : > { %8201 = vmatmul.mubr.msk.f32.gmra.mrb[24].mxu0 %vm346_vm0, %v10356_v28 }
  0x46   : > { %8203 = vmatprep.mubr.msk.f32.mxu0 %vm346_vm0, %v10359_v29 }
  0x49   : > { %8204 = vmatmul.mubr.msk.f32.gmra.mrb[26].mxu0 %vm346_vm0, %v10366_v30 }
  0x4a   : > { %8206 = vmatprep.mubr.msk.f32.mxu0 %vm346_vm0, %v10369_v31 }
  0x4d   : > { %8207 = vmatmul.mubr.msk.f32.gmra.mrb[28].mxu0 %vm346_vm0, %v10376_v32  ;;  %v10591_v32 = vld [vmem:[%s10228_s10 + $0x62] sm:$0xff] }
  0x4e   : > { %8209 = vmatprep.mubr.msk.f32.mxu0 %vm346_vm0, %v10379_v33  ;;  %v10570_v33 = vld [vmem:[%s10228_s10 + $0x32] sm:$0xff]  ;;  %12265 = vst [vmem:[#allocation17_spill] sm:$0xff] %v10591_v32 }
  0x4f   : > { %12261 = vst [vmem:[#allocation13_spill] sm:$0xff] %v10570_v33 }
  0x51   : > { %8210 = vmatmul.mubr.msk.f32.gmra.mrb[30].mxu0 %vm346_vm0, %v10386_v34  ;;  %v10560_v34 = vld [vmem:[%s12164_s1 + $0x20] sm:$0xff] }
  0x52   : > { %8214 = vmatprep.mubr.msk.f32.mxu0 %vm346_vm0, %v279_v35  ;;  %v990_v35 = vld [vmem:[%s10228_s10 + $0xa] sm:$0xff] }
  0x55   : > { %8215 = vmatmul.mubr.msk.f32.vlgmr.msra.gmra.mrb[0].mxu0 %vm346_vm0, %v280_v36  ;;  %v10555_v36 = vld [vmem:[%s10228_s10 + $0x1a] sm:$0xff] }
  0x56   : > { %8263 = vmatpush3.msra.mxu0 %v10239_v5  ;;  %8217 = vmatprep.mubr.msk.f32.mxu0 %vm346_vm0, %v10394_v37  ;;  %v989_v5 = vld [vmem:[%s10228_s10 + $0x2] sm:$0xff]  ;;  %12259 = vst [vmem:[#allocation11_spill] sm:$0xff] %v10555_v36 }
  0x57   : > { %8312 = vmatprep.subr.mxu0 %v10399_v38 }
  0x59   : > { %8218 = vmatmul.mubr.msk.f32.gmra.mrb[2].mxu0 %vm346_vm0, %v10406_v39 }
  0x5a   : > { %8220 = vmatprep.mubr.msk.f32.mxu0 %vm346_vm0, %v10409_v40 }
  0x5d   : > { %8221 = vmatmul.mubr.msk.f32.gmra.mrb[4].mxu0 %vm346_vm0, %v10417_v41 }
  0x5e   : > { %8223 = vmatprep.mubr.msk.f32.mxu0 %vm346_vm0, %v10420_v42 }
  0x61   : > { %8224 = vmatmul.mubr.msk.f32.gmra.mrb[6].mxu0 %vm346_vm0, %v10427_v43 }
  0x62   : > { %8226 = vmatprep.mubr.msk.f32.mxu0 %vm346_vm0, %v10430_v44 }
  0x65   : > { %8227 = vmatmul.mubr.msk.f32.gmra.mrb[8].mxu0 %vm346_vm0, %v10437_v45 }
  0x66   : > { %8229 = vmatprep.mubr.msk.f32.mxu0 %vm346_vm0, %v10440_v46 }
  0x69   : > { %8230 = vmatmul.mubr.msk.f32.gmra.mrb[10].mxu0 %vm346_vm0, %v10447_v47 }
  0x6a   : > { %8232 = vmatprep.mubr.msk.f32.mxu0 %vm346_vm0, %v10450_v48 }
  0x6d   : > { %8233 = vmatmul.mubr.msk.f32.gmra.mrb[12].mxu0 %vm346_vm0, %v10457_v49 }
  0x6e   : > { %8235 = vmatprep.mubr.msk.f32.mxu0 %vm346_vm0, %v10460_v50 }
  0x71   : > { %8236 = vmatmul.mubr.msk.f32.gmra.mrb[14].mxu0 %vm346_vm0, %v10467_v51 }
  0x72   : > { %8238 = vmatprep.mubr.msk.f32.mxu0 %vm346_vm0, %v10470_v52 }
  0x75   : > { %8239 = vmatmul.mubr.msk.f32.gmra.mrb[16].mxu0 %vm346_vm0, %v10477_v53 }
  0x76   : > { %8241 = vmatprep.mubr.msk.f32.mxu0 %vm346_vm0, %v10480_v54 }
  0x79   : > { %8242 = vmatmul.mubr.msk.f32.gmra.mrb[18].mxu0 %vm346_vm0, %v10487_v55 }
  0x7a   : > { %8244 = vmatprep.mubr.msk.f32.mxu0 %vm346_vm0, %v10490_v56 }
  0x7d   : > { %8245 = vmatmul.mubr.msk.f32.gmra.mrb[20].mxu0 %vm346_vm0, %v10497_v57 }
  0x7e   : > { %8247 = vmatprep.mubr.msk.f32.mxu0 %vm346_vm0, %v10500_v58 }
  0x81   : > { %8248 = vmatmul.mubr.msk.f32.gmra.mrb[22].mxu0 %vm346_vm0, %v10507_v59 }
  0x82   : > { %8250 = vmatprep.mubr.msk.f32.mxu0 %vm346_vm0, %v10510_v60 }
  0x85   : > { %8251 = vmatmul.mubr.msk.f32.gmra.mrb[24].mxu0 %vm346_vm0, %v10517_v61 }
  0x86   : > { %8253 = vmatprep.mubr.msk.f32.mxu0 %vm346_vm0, %v10520_v62 }
  0x89   : > { %8254 = vmatmul.mubr.msk.f32.gmra.mrb[26].mxu0 %vm346_vm0, %v10527_v63 }
  0x8a   : > { %8256 = vmatprep.mubr.msk.f32.mxu0 %vm346_vm0, %v10530_v0 }
  0x8d   : > { %8257 = vmatmul.mubr.msk.f32.gmra.mrb[28].mxu0 %vm346_vm0, %v10537_v1 }
  0x8e   : > { %8259 = vmatprep.mubr.msk.f32.mxu0 %vm346_vm0, %v10540_v2 }
  0x91   : > { %8260 = vmatmul.mubr.msk.f32.gmra.mrb[30].mxu0 %vm346_vm0, %v10547_v3 }
  0x92   : > { %8264 = vmatprep.mubr.msk.f32.mxu0 %vm346_vm0, %v989_v5  ;;  %v10567_v5 = vld [vmem:[%s10228_s10 + $0x22] sm:$0xff] }
  0x93   : > { %12260 = vst [vmem:[#allocation12_spill] sm:$0xff] %v10567_v5 }
  0x95   : > { %8265 = vmatmul.mubr.msk.f32.vlgmr.msra.gmra.mrb[0].mxu0 %vm346_vm0, %v990_v35  ;;  %v10578_v35 = vld [vmem:[%s10228_s10 + $0x3a] sm:$0xff] }
  0x96   : > { %8313 = vmatpush3.msra.mxu0 %v10399_v38  ;;  %8267 = vmatprep.mubr.msk.f32.mxu0 %vm346_vm0, %v10555_v36  ;;  %12262 = vst [vmem:[#allocation14_spill] sm:$0xff] %v10578_v35  ;;  %v10581_v38 = vld [vmem:[%s10228_s10 + $0x4a] sm:$0xff]  ;;  %v10588_v36 = vld [vmem:[%s10228_s10 + $0x52] sm:$0xff] }
  0x97   : > { %8362 = vmatprep.subr.mxu0 %v10560_v34  ;;  %12263 = vst [vmem:[#allocation15_spill] sm:$0xff] %v10581_v38  ;;  %12264 = vst [vmem:[#allocation16_spill] sm:$0xff] %v10588_v36 }
  0x99   : > { %8268 = vmatmul.mubr.msk.f32.gmra.mrb[2].mxu0 %vm346_vm0, %v10567_v5  ;;  %v10601_v5 = vld [vmem:[%s10228_s10 + $0x7a] sm:$0xff] }
  0x9a   : > { %8270 = vmatprep.mubr.msk.f32.mxu0 %vm346_vm0, %v10570_v33  ;;  %v10598_v33 = vld [vmem:[%s10228_s10 + $0x6a] sm:$0xff]  ;;  %12267 = vst [vmem:[#allocation19_spill] sm:$0xff] %v10601_v5 }
  0x9b   : > { %12266 = vst [vmem:[#allocation18_spill] sm:$0xff] %v10598_v33 }
  0x9d   : > { %8271 = vmatmul.mubr.msk.f32.gmra.mrb[4].mxu0 %vm346_vm0, %v10578_v35  ;;  %v10611_v35 = vld [vmem:[%s10228_s10 + $0x92] sm:$0xff] }
  0x9e   : > { %8273 = vmatprep.mubr.msk.f32.mxu0 %vm346_vm0, %v10581_v38  ;;  %v10608_v38 = vld [vmem:[%s10228_s10 + $0x82] sm:$0xff]  ;;  %12269 = vst [vmem:[#allocation21_spill] sm:$0xff] %v10611_v35 }
  0x9f   : > { %12268 = vst [vmem:[#allocation20_spill] sm:$0xff] %v10608_v38 }
  0xa1   : > { %8274 = vmatmul.mubr.msk.f32.gmra.mrb[6].mxu0 %vm346_vm0, %v10588_v36  ;;  %v10621_v36 = vld [vmem:[%s10228_s10 + $0xaa] sm:$0xff] }
  0xa2   : > { %8276 = vmatprep.mubr.msk.f32.mxu0 %vm346_vm0, %v10591_v32  ;;  %v10618_v32 = vld [vmem:[%s10228_s10 + $0x9a] sm:$0xff]  ;;  %12271 = vst [vmem:[#allocation23_spill] sm:$0xff] %v10621_v36 }
  0xa3   : > { %12270 = vst [vmem:[#allocation22_spill] sm:$0xff] %v10618_v32 }
  0xa5   : > { %8277 = vmatmul.mubr.msk.f32.gmra.mrb[8].mxu0 %vm346_vm0, %v10598_v33  ;;  %v10631_v33 = vld [vmem:[%s10228_s10 + $0xc2] sm:$0xff] }
  0xa6   : > { %8279 = vmatprep.mubr.msk.f32.mxu0 %vm346_vm0, %v10601_v5  ;;  %v10628_v5 = vld [vmem:[%s10228_s10 + $0xb2] sm:$0xff]  ;;  %12273 = vst [vmem:[#allocation25_spill] sm:$0xff] %v10631_v33 }
  0xa7   : > { %12272 = vst [vmem:[#allocation24_spill] sm:$0xff] %v10628_v5 }
  0xa9   : > { %8280 = vmatmul.mubr.msk.f32.gmra.mrb[10].mxu0 %vm346_vm0, %v10608_v38  ;;  %v10641_v38 = vld [vmem:[%s10228_s10 + $0xda] sm:$0xff] }
  0xaa   : > { %8282 = vmatprep.mubr.msk.f32.mxu0 %vm346_vm0, %v10611_v35  ;;  %v10638_v35 = vld [vmem:[%s10228_s10 + $0xca] sm:$0xff]  ;;  %12275 = vst [vmem:[#allocation27_spill] sm:$0xff] %v10641_v38 }
  0xab   : > { %12274 = vst [vmem:[#allocation26_spill] sm:$0xff] %v10638_v35 }
  0xad   : > { %8283 = vmatmul.mubr.msk.f32.gmra.mrb[12].mxu0 %vm346_vm0, %v10618_v32  ;;  %v10651_v32 = vld [vmem:[%s10228_s10 + $0xf2] sm:$0xff] }
  0xae   : > { %8285 = vmatprep.mubr.msk.f32.mxu0 %vm346_vm0, %v10621_v36  ;;  %v10648_v36 = vld [vmem:[%s10228_s10 + $0xe2] sm:$0xff]  ;;  %12277 = vst [vmem:[#allocation29_spill] sm:$0xff] %v10651_v32 }
  0xaf   : > { %12276 = vst [vmem:[#allocation28_spill] sm:$0xff] %v10648_v36 }
  0xb1   : > { %8286 = vmatmul.mubr.msk.f32.gmra.mrb[14].mxu0 %vm346_vm0, %v10628_v5  ;;  %v10661_v5 = vld [vmem:[%s10228_s10 + $0x10a] sm:$0xff] }
  0xb2   : > { %8288 = vmatprep.mubr.msk.f32.mxu0 %vm346_vm0, %v10631_v33  ;;  %v10658_v33 = vld [vmem:[%s10228_s10 + $0xfa] sm:$0xff]  ;;  %12279 = vst [vmem:[#allocation31_spill] sm:$0xff] %v10661_v5 }
  0xb3   : > { %12278 = vst [vmem:[#allocation30_spill] sm:$0xff] %v10658_v33 }
  0xb5   : > { %8289 = vmatmul.mubr.msk.f32.gmra.mrb[16].mxu0 %vm346_vm0, %v10638_v35  ;;  %v10671_v35 = vld [vmem:[%s10228_s10 + $0x122] sm:$0xff] }
  0xb6   : > { %8291 = vmatprep.mubr.msk.f32.mxu0 %vm346_vm0, %v10641_v38  ;;  %v10668_v38 = vld [vmem:[%s10228_s10 + $0x112] sm:$0xff]  ;;  %12281 = vst [vmem:[#allocation33_spill] sm:$0xff] %v10671_v35 }
  0xb7   : > { %12280 = vst [vmem:[#allocation32_spill] sm:$0xff] %v10668_v38 }
  0xb9   : > { %8292 = vmatmul.mubr.msk.f32.gmra.mrb[18].mxu0 %vm346_vm0, %v10648_v36  ;;  %v10681_v36 = vld [vmem:[%s10228_s10 + $0x13a] sm:$0xff] }
  0xba   : > { %8294 = vmatprep.mubr.msk.f32.mxu0 %vm346_vm0, %v10651_v32  ;;  %v10678_v32 = vld [vmem:[%s10228_s10 + $0x12a] sm:$0xff]  ;;  %12282 = vst [vmem:[#allocation34_spill] sm:$0xff] %v10681_v36 }
  0xbd   : > { %8295 = vmatmul.mubr.msk.f32.gmra.mrb[20].mxu0 %vm346_vm0, %v10658_v33  ;;  %v10691_v33 = vld [vmem:[%s10228_s10 + $0x152] sm:$0xff] }
  0xbe   : > { %8297 = vmatprep.mubr.msk.f32.mxu0 %vm346_vm0, %v10661_v5  ;;  %v10688_v5 = vld [vmem:[%s10228_s10 + $0x142] sm:$0xff]  ;;  %12283 = vst [vmem:[#allocation35_spill] sm:$0xff] %v10691_v33 }
  0xc1   : > { %8298 = vmatmul.mubr.msk.f32.gmra.mrb[22].mxu0 %vm346_vm0, %v10668_v38  ;;  %v10701_v38 = vld [vmem:[%s10228_s10 + $0x16a] sm:$0xff] }
  0xc2   : > { %8300 = vmatprep.mubr.msk.f32.mxu0 %vm346_vm0, %v10671_v35  ;;  %v10698_v35 = vld [vmem:[%s10228_s10 + $0x15a] sm:$0xff]  ;;  %12284 = vst [vmem:[#allocation36_spill] sm:$0xff] %v10701_v38 }
  0xc5   : > { %8301 = vmatmul.mubr.msk.f32.gmra.mrb[24].mxu0 %vm346_vm0, %v10678_v32 }
  0xc6   : > { %8303 = vmatprep.mubr.msk.f32.mxu0 %vm346_vm0, %v10681_v36  ;;  %v10708_v36 = vld [vmem:[%s10228_s10 + $0x172] sm:$0xff] }
  0xc9   : > { %8304 = vmatmul.mubr.msk.f32.gmra.mrb[26].mxu0 %vm346_vm0, %v10688_v5 }
  0xca   : > { %8306 = vmatprep.mubr.msk.f32.mxu0 %vm346_vm0, %v10691_v33  ;;  %v7070_v33 = vld [vmem:[%s12164_s1 + $0x28] sm:$0xff] }
  0xcd   : > { %8307 = vmatmul.mubr.msk.f32.gmra.mrb[28].mxu0 %vm346_vm0, %v10698_v35 }
  0xce   : > { %8309 = vmatprep.mubr.msk.f32.mxu0 %vm346_vm0, %v10701_v38 }
  0xd1   : > { %8310 = vmatmul.mubr.msk.f32.gmra.mrb[30].mxu0 %vm346_vm0, %v10708_v36 }
  0xd2   : > { %8314 = vmatprep.mubr.msk.f32.mxu0 %vm346_vm0, %v10394_v37  ;;  %v10782_v37 = vld [vmem:[%s10228_s10 + $0x188] sm:$0xff] }
  0xd5   : > { %8315 = vmatmul.mubr.msk.f32.vlgmr.msra.gmra.mrb[0].mxu0 %vm346_vm0, %v10406_v39  ;;  %v7135_v39 = vld [vmem:[%s12164_s1 + $0x30] sm:$0xff] }
  0xd6   : > { %8363 = vmatpush3.msra.mxu0 %v10560_v34  ;;  %8317 = vmatprep.mubr.msk.f32.mxu0 %vm346_vm0, %v10409_v40  ;;  %v10775_v34 = vld [vmem:[%s10228_s10 + $0x180] sm:$0xff] }
  0xd7   : > { %8412 = vmatprep.subr.mxu0 %v7070_v33 }
  0xd9   : > { %8318 = vmatmul.mubr.msk.f32.gmra.mrb[2].mxu0 %vm346_vm0, %v10417_v41 }
  0xda   : > { %8320 = vmatprep.mubr.msk.f32.mxu0 %vm346_vm0, %v10420_v42 }
  0xdd   : > { %8321 = vmatmul.mubr.msk.f32.gmra.mrb[4].mxu0 %vm346_vm0, %v10427_v43 }
  0xde   : > { %8323 = vmatprep.mubr.msk.f32.mxu0 %vm346_vm0, %v10430_v44 }
  0xe1   : > { %8324 = vmatmul.mubr.msk.f32.gmra.mrb[6].mxu0 %vm346_vm0, %v10437_v45 }
  0xe2   : > { %8326 = vmatprep.mubr.msk.f32.mxu0 %vm346_vm0, %v10440_v46 }
  0xe5   : > { %8327 = vmatmul.mubr.msk.f32.gmra.mrb[8].mxu0 %vm346_vm0, %v10447_v47 }
  0xe6   : > { %8329 = vmatprep.mubr.msk.f32.mxu0 %vm346_vm0, %v10450_v48 }
  0xe9   : > { %8330 = vmatmul.mubr.msk.f32.gmra.mrb[10].mxu0 %vm346_vm0, %v10457_v49 }
  0xea   : > { %8332 = vmatprep.mubr.msk.f32.mxu0 %vm346_vm0, %v10460_v50 }
  0xed   : > { %8333 = vmatmul.mubr.msk.f32.gmra.mrb[12].mxu0 %vm346_vm0, %v10467_v51 }
  0xee   : > { %8335 = vmatprep.mubr.msk.f32.mxu0 %vm346_vm0, %v10470_v52 }
  0xf1   : > { %8336 = vmatmul.mubr.msk.f32.gmra.mrb[14].mxu0 %vm346_vm0, %v10477_v53 }
  0xf2   : > { %8338 = vmatprep.mubr.msk.f32.mxu0 %vm346_vm0, %v10480_v54 }
  0xf5   : > { %8339 = vmatmul.mubr.msk.f32.gmra.mrb[16].mxu0 %vm346_vm0, %v10487_v55 }
  0xf6   : > { %8341 = vmatprep.mubr.msk.f32.mxu0 %vm346_vm0, %v10490_v56 }
  0xf9   : > { %8342 = vmatmul.mubr.msk.f32.gmra.mrb[18].mxu0 %vm346_vm0, %v10497_v57 }
  0xfa   : > { %8344 = vmatprep.mubr.msk.f32.mxu0 %vm346_vm0, %v10500_v58 }
  0xfd   : > { %8345 = vmatmul.mubr.msk.f32.gmra.mrb[20].mxu0 %vm346_vm0, %v10507_v59 }
  0xfe   : > { %8347 = vmatprep.mubr.msk.f32.mxu0 %vm346_vm0, %v10510_v60 }
 0x101   : > { %8348 = vmatmul.mubr.msk.f32.gmra.mrb[22].mxu0 %vm346_vm0, %v10517_v61 }
 0x102   : > { %8350 = vmatprep.mubr.msk.f32.mxu0 %vm346_vm0, %v10520_v62 }
 0x105   : > { %8351 = vmatmul.mubr.msk.f32.gmra.mrb[24].mxu0 %vm346_vm0, %v10527_v63 }
 0x106   : > { %8353 = vmatprep.mubr.msk.f32.mxu0 %vm346_vm0, %v10530_v0 }
 0x109   : > { %8354 = vmatmul.mubr.msk.f32.gmra.mrb[26].mxu0 %vm346_vm0, %v10537_v1 }
 0x10a   : > { %8356 = vmatprep.mubr.msk.f32.mxu0 %vm346_vm0, %v10540_v2 }
 0x10d   : > { %8357 = vmatmul.mubr.msk.f32.gmra.mrb[28].mxu0 %vm346_vm0, %v10547_v3 }
 0x10e   : > { %8359 = vmatprep.mubr.msk.f32.mxu0 %vm346_vm0, %v10775_v34 }
 0x111   : > { %8360 = vmatmul.mubr.msk.f32.gmra.mrb[30].mxu0 %vm346_vm0, %v10782_v37 }
 0x112   : > { %8364 = vmatprep.mubr.msk.f32.mxu0 %vm346_vm0, %v10233_v4  ;;  %v12285_v4 = vld [vmem:[#allocation8_spill] sm:$0xff] }
 0x115   : > { %8365 = vmatmul.mubr.msk.f32.vlgmr.msra.gmra.mrb[0].mxu0 %vm346_vm0, %v10245_v6  ;;  %v12286_v6 = vld [vmem:[#allocation9_spill] sm:$0xff] }
 0x116   : > { %8413 = vmatpush3.msra.mxu0 %v7070_v33  ;;  %8367 = vmatprep.mubr.msk.f32.mxu0 %vm346_vm0, %v10248_v7  ;;  %v10848_v33 = vld [vmem:[%s10228_s10 + $0x181] sm:$0xff] }
 0x117   : > { %8462 = vmatprep.subr.mxu0 %v7135_v39  ;;  %12287 = vst [vmem:[#allocation37_spill] sm:$0xff] %v10848_v33 }
 0x119   : > { %8368 = vmatmul.mubr.msk.f32.gmra.mrb[2].mxu0 %vm346_vm0, %v10256_v8 }
 0x11a   : > { %8370 = vmatprep.mubr.msk.f32.mxu0 %vm346_vm0, %v10259_v9 }
 0x11d   : > { %8371 = vmatmul.mubr.msk.f32.gmra.mrb[4].mxu0 %vm346_vm0, %v10266_v10 }
 0x11e   : > { %8373 = vmatprep.mubr.msk.f32.mxu0 %vm346_vm0, %v10269_v11 }
 0x121   : > { %8374 = vmatmul.mubr.msk.f32.gmra.mrb[6].mxu0 %vm346_vm0, %v10276_v12 }
 0x122   : > { %8376 = vmatprep.mubr.msk.f32.mxu0 %vm346_vm0, %v10279_v13 }
 0x125   : > { %8377 = vmatmul.mubr.msk.f32.gmra.mrb[8].mxu0 %vm346_vm0, %v10286_v14 }
 0x126   : > { %8379 = vmatprep.mubr.msk.f32.mxu0 %vm346_vm0, %v10289_v15 }
 0x129   : > { %8380 = vmatmul.mubr.msk.f32.gmra.mrb[10].mxu0 %vm346_vm0, %v10296_v16 }
 0x12a   : > { %8382 = vmatprep.mubr.msk.f32.mxu0 %vm346_vm0, %v10299_v17 }
 0x12d   : > { %8383 = vmatmul.mubr.msk.f32.gmra.mrb[12].mxu0 %vm346_vm0, %v10306_v18 }
 0x12e   : > { %8385 = vmatprep.mubr.msk.f32.mxu0 %vm346_vm0, %v10309_v19 }
 0x131   : > { %8386 = vmatmul.mubr.msk.f32.gmra.mrb[14].mxu0 %vm346_vm0, %v10316_v20 }
 0x132   : > { %8388 = vmatprep.mubr.msk.f32.mxu0 %vm346_vm0, %v10319_v21 }
 0x135   : > { %8389 = vmatmul.mubr.msk.f32.gmra.mrb[16].mxu0 %vm346_vm0, %v10326_v22 }
 0x136   : > { %8391 = vmatprep.mubr.msk.f32.mxu0 %vm346_vm0, %v10329_v23 }
 0x139   : > { %8392 = vmatmul.mubr.msk.f32.gmra.mrb[18].mxu0 %vm346_vm0, %v10336_v24 }
 0x13a   : > { %8394 = vmatprep.mubr.msk.f32.mxu0 %vm346_vm0, %v10339_v25 }
 0x13d   : > { %8395 = vmatmul.mubr.msk.f32.gmra.mrb[20].mxu0 %vm346_vm0, %v10346_v26 }
 0x13e   : > { %8397 = vmatprep.mubr.msk.f32.mxu0 %vm346_vm0, %v10349_v27  ;;  %v12288_v27 = vld [vmem:[#allocation10_spill] sm:$0xff] }
 0x141   : > { %8398 = vmatmul.mubr.msk.f32.gmra.mrb[22].mxu0 %vm346_vm0, %v10356_v28  ;;  %v12297_v28 = vld [vmem:[#allocation18_spill] sm:$0xff] }
 0x142   : > { %8400 = vmatprep.mubr.msk.f32.mxu0 %vm346_vm0, %v10359_v29  ;;  %v10855_v29 = vld [vmem:[%s10228_s10 + $0x189] sm:$0xff] }
 0x143   : > { %12289 = vst [vmem:[#allocation38_spill] sm:$0xff] %v10855_v29 }
 0x145   : > { %8401 = vmatmul.mubr.msk.f32.gmra.mrb[24].mxu0 %vm346_vm0, %v10366_v30  ;;  %v12294_v30 = vld [vmem:[#allocation15_spill] sm:$0xff] }
 0x146   : > { %8403 = vmatprep.mubr.msk.f32.mxu0 %vm346_vm0, %v10369_v31  ;;  %v12290_v31 = vld [vmem:[#allocation11_spill] sm:$0xff] }
 0x149   : > { %8404 = vmatmul.mubr.msk.f32.gmra.mrb[26].mxu0 %vm346_vm0, %v12285_v4  ;;  %v12291_v4 = vld [vmem:[#allocation12_spill] sm:$0xff] }
 0x14a   : > { %8406 = vmatprep.mubr.msk.f32.mxu0 %vm346_vm0, %v12286_v6  ;;  %v7200_v6 = vld [vmem:[%s12164_s1 + $0x38] sm:$0xff] }
 0x14d   : > { %8407 = vmatmul.mubr.msk.f32.gmra.mrb[28].mxu0 %vm346_vm0, %v12288_v27  ;;  %v12292_v27 = vld [vmem:[#allocation13_spill] sm:$0xff] }
 0x14e   : > { %8409 = vmatprep.mubr.msk.f32.mxu0 %vm346_vm0, %v10848_v33  ;;  %v12293_v33 = vld [vmem:[#allocation14_spill] sm:$0xff] }
 0x151   : > { %8410 = vmatmul.mubr.msk.f32.gmra.mrb[30].mxu0 %vm346_vm0, %v10855_v29  ;;  %v12295_v29 = vld [vmem:[#allocation16_spill] sm:$0xff] }
 0x152   : > { %8414 = vmatprep.mubr.msk.f32.mxu0 %vm346_vm0, %v12290_v31  ;;  %v12296_v31 = vld [vmem:[#allocation17_spill] sm:$0xff] }
 0x155   : > { %8415 = vmatmul.mubr.msk.f32.vlgmr.msra.gmra.mrb[0].mxu0 %vm346_vm0, %v12291_v4  ;;  %v12299_v4 = vld [vmem:[#allocation20_spill] sm:$0xff] }
 0x156   : > { %8463 = vmatpush3.msra.mxu0 %v7135_v39  ;;  %8417 = vmatprep.mubr.msk.f32.mxu0 %vm346_vm0, %v12292_v27  ;;  %v12298_v39 = vld [vmem:[#allocation19_spill] sm:$0xff]  ;;  %v12300_v27 = vld [vmem:[#allocation21_spill] sm:$0xff] }
 0x157   : > { %8512 = vmatprep.subr.mxu0 %v7200_v6 }
 0x159   : > { %8418 = vmatmul.mubr.msk.f32.gmra.mrb[2].mxu0 %vm346_vm0, %v12293_v33  ;;  %v12301_v33 = vld [vmem:[#allocation22_spill] sm:$0xff] }
 0x15a   : > { %8420 = vmatprep.mubr.msk.f32.mxu0 %vm346_vm0, %v12294_v30  ;;  %v12302_v30 = vld [vmem:[#allocation23_spill] sm:$0xff] }
 0x15d   : > { %8421 = vmatmul.mubr.msk.f32.gmra.mrb[4].mxu0 %vm346_vm0, %v12295_v29  ;;  %v12303_v29 = vld [vmem:[#allocation24_spill] sm:$0xff] }
 0x15e   : > { %8423 = vmatprep.mubr.msk.f32.mxu0 %vm346_vm0, %v12296_v31  ;;  %v12304_v31 = vld [vmem:[#allocation25_spill] sm:$0xff] }
 0x161   : > { %8424 = vmatmul.mubr.msk.f32.gmra.mrb[6].mxu0 %vm346_vm0, %v12297_v28 }
 0x162   : > { %8426 = vmatprep.mubr.msk.f32.mxu0 %vm346_vm0, %v12298_v39  ;;  %v12305_v39 = vld [vmem:[#allocation26_spill] sm:$0xff] }
 0x165   : > { %8427 = vmatmul.mubr.msk.f32.gmra.mrb[8].mxu0 %vm346_vm0, %v12299_v4  ;;  %v12306_v4 = vld [vmem:[#allocation27_spill] sm:$0xff] }
 0x166   : > { %8429 = vmatprep.mubr.msk.f32.mxu0 %vm346_vm0, %v12300_v27  ;;  %v12307_v27 = vld [vmem:[#allocation28_spill] sm:$0xff] }
 0x169   : > { %8430 = vmatmul.mubr.msk.f32.gmra.mrb[10].mxu0 %vm346_vm0, %v12301_v33  ;;  %v12308_v33 = vld [vmem:[#allocation29_spill] sm:$0xff] }
 0x16a   : > { %8432 = vmatprep.mubr.msk.f32.mxu0 %vm346_vm0, %v12302_v30  ;;  %v12309_v30 = vld [vmem:[#allocation30_spill] sm:$0xff] }
 0x16d   : > { %8433 = vmatmul.mubr.msk.f32.gmra.mrb[12].mxu0 %vm346_vm0, %v12303_v29  ;;  %v12310_v29 = vld [vmem:[#allocation31_spill] sm:$0xff] }
 0x16e   : > { %8435 = vmatprep.mubr.msk.f32.mxu0 %vm346_vm0, %v12304_v31  ;;  %v12311_v31 = vld [vmem:[#allocation32_spill] sm:$0xff] }
 0x171   : > { %8436 = vmatmul.mubr.msk.f32.gmra.mrb[14].mxu0 %vm346_vm0, %v12305_v39  ;;  %v12312_v39 = vld [vmem:[#allocation33_spill] sm:$0xff] }
 0x172   : > { %8438 = vmatprep.mubr.msk.f32.mxu0 %vm346_vm0, %v12306_v4  ;;  %v12313_v4 = vld [vmem:[#allocation34_spill] sm:$0xff] }
 0x175   : > { %8439 = vmatmul.mubr.msk.f32.gmra.mrb[16].mxu0 %vm346_vm0, %v12307_v27 }
 0x176   : > { %8441 = vmatprep.mubr.msk.f32.mxu0 %vm346_vm0, %v12308_v33  ;;  %v12314_v33 = vld [vmem:[#allocation35_spill] sm:$0xff] }
 0x179   : > { %8442 = vmatmul.mubr.msk.f32.gmra.mrb[18].mxu0 %vm346_vm0, %v12309_v30 }
 0x17a   : > { %8444 = vmatprep.mubr.msk.f32.mxu0 %vm346_vm0, %v12310_v29 }
 0x17d   : > { %8445 = vmatmul.mubr.msk.f32.gmra.mrb[20].mxu0 %vm346_vm0, %v12311_v31  ;;  %v10921_v31 = vld [vmem:[%s10228_s10 + $0x182] sm:$0xff] }
 0x17e   : > { %8447 = vmatprep.mubr.msk.f32.mxu0 %vm346_vm0, %v12312_v39 }
 0x181   : > { %8448 = vmatmul.mubr.msk.f32.gmra.mrb[22].mxu0 %vm346_vm0, %v10678_v32 }
 0x182   : > { %8450 = vmatprep.mubr.msk.f32.mxu0 %vm346_vm0, %v12313_v4  ;;  %v10928_v4 = vld [vmem:[%s10228_s10 + $0x18a] sm:$0xff] }
 0x185   : > { %8451 = vmatmul.mubr.msk.f32.gmra.mrb[24].mxu0 %vm346_vm0, %v10688_v5 }
 0x186   : > { %8453 = vmatprep.mubr.msk.f32.mxu0 %vm346_vm0, %v12314_v33 }
 0x189   : > { %8454 = vmatmul.mubr.msk.f32.gmra.mrb[26].mxu0 %vm346_vm0, %v10698_v35 }
 0x18a   : > { %8456 = vmatprep.mubr.msk.f32.mxu0 %vm346_vm0, %v10701_v38  ;;  %v7265_v38 = vld [vmem:[%s12164_s1 + $0x40] sm:$0xff] }
 0x18d   : > { %8457 = vmatmul.mubr.msk.f32.gmra.mrb[28].mxu0 %vm346_vm0, %v10708_v36 }
 0x18e   : > { %8459 = vmatprep.mubr.msk.f32.mxu0 %vm346_vm0, %v10921_v31 }
 0x191   : > { %8460 = vmatmul.mubr.msk.f32.gmra.mrb[30].mxu0 %vm346_vm0, %v10928_v4 }
 0x192   : > { %8464 = vmatprep.mubr.msk.f32.mxu0 %vm346_vm0, %v10409_v40  ;;  %v7133_v40 = vld [vmem:[%s10228_s10 + $0x198] sm:$0xff] }
 0x195   : > { %8465 = vmatmul.mubr.msk.f32.vlgmr.msra.gmra.mrb[0].mxu0 %vm346_vm0, %v10417_v41  ;;  %v7134_v41 = vld [vmem:[%s10228_s10 + $0x1a0] sm:$0xff] }
 0x196   : > { %8513 = vmatpush3.msra.mxu0 %v7200_v6  ;;  %8467 = vmatprep.mubr.msk.f32.mxu0 %vm346_vm0, %v10420_v42  ;;  %v7300_v42 = vld [vmem:[%s12167_s4 + $0x80] sm:$0xff] }
 0x197   : > { %8562 = vmatprep.subr.mxu0 %v7265_v38  ;;  %v3947_v6 = vld [vmem:[%s12167_s4] sm:$0xff] }
 0x199   : > { %8468 = vmatmul.mubr.msk.f32.gmra.mrb[2].mxu0 %vm346_vm0, %v10427_v43  ;;  %v7301_v43 = vld [vmem:[%s12167_s4 + $0x88] sm:$0xff] }
 0x19a   : > { %8470 = vmatprep.mubr.msk.f32.mxu0 %vm346_vm0, %v10430_v44  ;;  %v9332_v44 = vpack.c.bf16 %v7301_v43, %v7300_v42 }
 0x19c   : > { %9620 = vmatprep.subr.bf16.mxu1 %v9332_v44 }
 0x19d   : > { %8471 = vmatmul.mubr.msk.f32.gmra.mrb[4].mxu0 %vm346_vm0, %v10437_v45  ;;  %v7302_v45 = vld [vmem:[%s12167_s4 + $0x90] sm:$0xff]  ;;  %9628 = vmatpush3.bf16.msra.mxu1 %v9332_v44 }
 0x19e   : > { %8473 = vmatprep.mubr.msk.f32.mxu0 %vm346_vm0, %v10440_v46  ;;  %v7303_v46 = vld [vmem:[%s12167_s4 + $0x98] sm:$0xff] }
 0x1a1   : > { %8474 = vmatmul.mubr.msk.f32.gmra.mrb[6].mxu0 %vm346_vm0, %v10447_v47  ;;  %v9336_v47 = vpack.c.bf16 %v7303_v46, %v7302_v45 }
 0x1a2   : > { %8476 = vmatprep.mubr.msk.f32.mxu0 %vm346_vm0, %v10450_v48  ;;  %v7304_v48 = vld [vmem:[%s12167_s4 + $0xa0] sm:$0xff] }
 0x1a3   : > { %9621 = vmatprep.subr.bf16.mxu1 %v9336_v47 }
 0x1a4   : > { %9629 = vmatpush3.bf16.msra.mxu1 %v9336_v47 }
 0x1a5   : > { %8477 = vmatmul.mubr.msk.f32.gmra.mrb[8].mxu0 %vm346_vm0, %v10457_v49 }
 0x1a6   : > { %8479 = vmatprep.mubr.msk.f32.mxu0 %vm346_vm0, %v10460_v50  ;;  %v7307_v50 = vld [vmem:[%s12167_s4 + $0xb8] sm:$0xff] }
 0x1a9   : > { %8480 = vmatmul.mubr.msk.f32.gmra.mrb[10].mxu0 %vm346_vm0, %v10467_v51  ;;  %v7309_v51 = vld [vmem:[%s12167_s4 + $0xc8] sm:$0xff] }
 0x1aa   : > { %8482 = vmatprep.mubr.msk.f32.mxu0 %vm346_vm0, %v10470_v52 }
 0x1ad   : > { %8483 = vmatmul.mubr.msk.f32.gmra.mrb[12].mxu0 %vm346_vm0, %v10477_v53  ;;  %v12329_v53 = vld [vmem:[#allocation17_spill] sm:$0xff] }
 0x1ae   : > { %8485 = vmatprep.mubr.msk.f32.mxu0 %vm346_vm0, %v10480_v54  ;;  %v12330_v54 = vld [vmem:[#allocation19_spill] sm:$0xff] }
 0x1b1   : > { %8486 = vmatmul.mubr.msk.f32.gmra.mrb[14].mxu0 %vm346_vm0, %v10487_v55  ;;  %v12331_v55 = vld [vmem:[#allocation20_spill] sm:$0xff] }
 0x1b2   : > { %8488 = vmatprep.mubr.msk.f32.mxu0 %vm346_vm0, %v10490_v56  ;;  %v12332_v56 = vld [vmem:[#allocation21_spill] sm:$0xff] }
 0x1b5   : > { %8489 = vmatmul.mubr.msk.f32.gmra.mrb[16].mxu0 %vm346_vm0, %v10497_v57  ;;  %v12333_v57 = vld [vmem:[#allocation22_spill] sm:$0xff] }
 0x1b6   : > { %8491 = vmatprep.mubr.msk.f32.mxu0 %vm346_vm0, %v10500_v58  ;;  %v12334_v58 = vld [vmem:[#allocation23_spill] sm:$0xff] }
 0x1b9   : > { %8492 = vmatmul.mubr.msk.f32.gmra.mrb[18].mxu0 %vm346_vm0, %v10507_v59  ;;  %v12336_v59 = vld [vmem:[#allocation25_spill] sm:$0xff] }
 0x1ba   : > { %8494 = vmatprep.mubr.msk.f32.mxu0 %vm346_vm0, %v10510_v60  ;;  %v12337_v60 = vld [vmem:[#allocation26_spill] sm:$0xff] }
 0x1bd   : > { %8495 = vmatmul.mubr.msk.f32.gmra.mrb[20].mxu0 %vm346_vm0, %v10517_v61  ;;  %v12338_v61 = vld [vmem:[#allocation27_spill] sm:$0xff] }
 0x1be   : > { %8497 = vmatprep.mubr.msk.f32.mxu0 %vm346_vm0, %v10520_v62  ;;  %v12339_v62 = vld [vmem:[#allocation29_spill] sm:$0xff] }
 0x1c1   : > { %8498 = vmatmul.mubr.msk.f32.gmra.mrb[22].mxu0 %vm346_vm0, %v10527_v63  ;;  %v12340_v63 = vld [vmem:[#allocation32_spill] sm:$0xff] }
 0x1c2   : > { %8500 = vmatprep.mubr.msk.f32.mxu0 %vm346_vm0, %v10530_v0  ;;  %v7310_v0 = vld [vmem:[%s12167_s4 + $0xd0] sm:$0xff] }
 0x1c5   : > { %8501 = vmatmul.mubr.msk.f32.gmra.mrb[24].mxu0 %vm346_vm0, %v10537_v1  ;;  %v7311_v1 = vld [vmem:[%s12167_s4 + $0xd8] sm:$0xff] }
 0x1c6   : > { %8503 = vmatprep.mubr.msk.f32.mxu0 %vm346_vm0, %v10540_v2  ;;  %v9352_v2 = vpack.c.bf16 %v7311_v1, %v7310_v0 }
 0x1c9   : > { %8504 = vmatmul.mubr.msk.f32.gmra.mrb[26].mxu0 %vm346_vm0, %v10547_v3  ;;  %v7312_v3 = vld [vmem:[%s12167_s4 + $0xe0] sm:$0xff] }
 0x1ca   : > { %8506 = vmatprep.mubr.msk.f32.mxu0 %vm346_vm0, %v10775_v34 }
 0x1cd   : > { %8507 = vmatmul.mubr.msk.f32.gmra.mrb[28].mxu0 %vm346_vm0, %v10782_v37  ;;  %v10167_v37 = vmov 0.0  }
 0x1ce   : > { %8509 = vmatprep.mubr.msk.f32.mxu0 %vm346_vm0, %v7133_v40  ;;  %3810 = vst [vmem:[#allocation2] sm:$0xff] %v10167_v37  ;;  %3811 = vst [vmem:[#allocation2 + $0x8] sm:$0xff] %v10167_v37  ;;  %v11189_v40 = vld [vmem:[%s12166_s3] ss:$0 sm:$0xff] }
 0x1cf   : > { %3812 = vst [vmem:[#allocation2 + $0x10] sm:$0xff] %v10167_v37  ;;  %3813 = vst [vmem:[#allocation2 + $0x18] sm:$0xff] %v10167_v37 }
 0x1d0   : > { %3814 = vst [vmem:[#allocation2 + $0x20] sm:$0xff] %v10167_v37  ;;  %3817 = vst [vmem:[#allocation2 + $0x38] sm:$0xff] %v10167_v37 }
 0x1d1   : > { %8510 = vmatmul.mubr.msk.f32.gmra.mrb[30].mxu0 %vm346_vm0, %v7134_v41  ;;  %3818 = vst [vmem:[#allocation2 + $0x40] sm:$0xff] %v10167_v37  ;;  %3821 = vst [vmem:[#allocation2 + $0x58] sm:$0xff] %v10167_v37 }
 0x1d2   : > { %8514 = vmatprep.mubr.msk.f32.mxu0 %vm346_vm0, %v10248_v7  ;;  %v7305_v7 = vld [vmem:[%s12167_s4 + $0xa8] sm:$0xff]  ;;  %3822 = vst [vmem:[#allocation2 + $0x60] sm:$0xff] %v10167_v37  ;;  %3825 = vst [vmem:[#allocation2 + $0x78] sm:$0xff] %v10167_v37 }
 0x1d3   : > { %v9340_v49 = vpack.c.bf16 %v7305_v7, %v7304_v48  ;;  %3826 = vst [vmem:[#allocation2 + $0x80] sm:$0xff] %v10167_v37  ;;  %3829 = vst [vmem:[#allocation2 + $0x98] sm:$0xff] %v10167_v37 }
 0x1d4   : > { %3830 = vst [vmem:[#allocation2 + $0xa0] sm:$0xff] %v10167_v37  ;;  %3833 = vst [vmem:[#allocation2 + $0xb8] sm:$0xff] %v10167_v37 }
 0x1d5   : > { %8515 = vmatmul.mubr.msk.f32.vlgmr.msra.gmra.mrb[0].mxu0 %vm346_vm0, %v10256_v8  ;;  %v7306_v8 = vld [vmem:[%s12167_s4 + $0xb0] sm:$0xff]  ;;  %9622 = vmatprep.subr.bf16.mxu1 %v9340_v49  ;;  %3834 = vst [vmem:[#allocation2 + $0xc0] sm:$0xff] %v10167_v37  ;;  %3837 = vst [vmem:[#allocation2 + $0xd8] sm:$0xff] %v10167_v37 }
 0x1d6   : > { %8563 = vmatpush3.msra.mxu0 %v7265_v38  ;;  %8517 = vmatprep.mubr.msk.f32.mxu0 %vm346_vm0, %v10259_v9  ;;  %v9344_v9 = vpack.c.bf16 %v7307_v50, %v7306_v8  ;;  %v7315_v38 = vld [vmem:[%s12167_s4 + $0xf8] sm:$0xff]  ;;  %3838 = vst [vmem:[#allocation2 + $0xe0] sm:$0xff] %v10167_v37  ;;  %3841 = vst [vmem:[#allocation2 + $0xf8] sm:$0xff] %v10167_v37 }
 0x1d7   : > { %9333 = vmatprep.subr.bf16.mxu0 %v9332_v44  ;;  %9630 = vmatpush3.bf16.msra.mxu1 %v9340_v49  ;;  %3842 = vst [vmem:[#allocation2 + $0x100] sm:$0xff] %v10167_v37  ;;  %3845 = vst [vmem:[#allocation2 + $0x118] sm:$0xff] %v10167_v37 }
 0x1d8   : > { %9623 = vmatprep.subr.bf16.mxu1 %v9344_v9  ;;  %3846 = vst [vmem:[#allocation2 + $0x120] sm:$0xff] %v10167_v37  ;;  %3849 = vst [vmem:[#allocation2 + $0x138] sm:$0xff] %v10167_v37 }
 0x1d9   : > { %8518 = vmatmul.mubr.msk.f32.gmra.mrb[2].mxu0 %vm346_vm0, %v10266_v10  ;;  %v7308_v10 = vld [vmem:[%s12167_s4 + $0xc0] sm:$0xff]  ;;  %3850 = vst [vmem:[#allocation2 + $0x140] sm:$0xff] %v10167_v37  ;;  %3853 = vst [vmem:[#allocation2 + $0x158] sm:$0xff] %v10167_v37 }
 0x1da   : > { %8520 = vmatprep.mubr.msk.f32.mxu0 %vm346_vm0, %v10269_v11  ;;  %v9348_v52 = vpack.c.bf16 %v7309_v51, %v7308_v10  ;;  %v12315_v11 = vld [vmem:[#allocation3_spill] sm:$0xff]  ;;  %3854 = vst [vmem:[#allocation2 + $0x160] sm:$0xff] %v10167_v37  ;;  %3857 = vst [vmem:[#allocation2 + $0x178] sm:$0xff] %v10167_v37 }
 0x1db   : > { %9631 = vmatpush3.bf16.msra.mxu1 %v9344_v9  ;;  %3858 = vst [vmem:[#allocation2 + $0x180] sm:$0xff] %v10167_v37  ;;  %3861 = vst [vmem:[#allocation2 + $0x198] sm:$0xff] %v10167_v37 }
 0x1dc   : > { %9624 = vmatprep.subr.bf16.mxu1 %v9348_v52  ;;  %3862 = vst [vmem:[#allocation2 + $0x1a0] sm:$0xff] %v10167_v37  ;;  %3865 = vst [vmem:[#allocation2 + $0x1b8] sm:$0xff] %v10167_v37 }
 0x1dd   : > { %8521 = vmatmul.mubr.msk.f32.gmra.mrb[4].mxu0 %vm346_vm0, %v10276_v12  ;;  %v12316_v12 = vld [vmem:[#allocation4_spill] sm:$0xff]  ;;  %3866 = vst [vmem:[#allocation2 + $0x1c0] sm:$0xff] %v10167_v37  ;;  %3869 = vst [vmem:[#allocation2 + $0x1d8] sm:$0xff] %v10167_v37 }
 0x1de   : > { %8523 = vmatprep.mubr.msk.f32.mxu0 %vm346_vm0, %v10279_v13  ;;  %v12317_v13 = vld [vmem:[#allocation5_spill] sm:$0xff]  ;;  %3870 = vst [vmem:[#allocation2 + $0x1e0] sm:$0xff] %v10167_v37  ;;  %3873 = vst [vmem:[#allocation2 + $0x1f8] sm:$0xff] %v10167_v37 }
 0x1df   : > { %9632 = vmatpush3.bf16.msra.mxu1 %v9348_v52  ;;  %3874 = vst [vmem:[#allocation2 + $0x200] sm:$0xff] %v10167_v37  ;;  %3877 = vst [vmem:[#allocation2 + $0x218] sm:$0xff] %v10167_v37 }
 0x1e0   : > { %9625 = vmatprep.subr.bf16.mxu1 %v9352_v2  ;;  %3878 = vst [vmem:[#allocation2 + $0x220] sm:$0xff] %v10167_v37  ;;  %3879 = vst [vmem:[#allocation2 + $0x228] sm:$0xff] %v10167_v37 }
 0x1e1   : > { %8524 = vmatmul.mubr.msk.f32.gmra.mrb[6].mxu0 %vm346_vm0, %v10286_v14  ;;  %v12318_v14 = vld [vmem:[#allocation6_spill] sm:$0xff]  ;;  %3880 = vst [vmem:[#allocation2 + $0x230] sm:$0xff] %v10167_v37  ;;  %3881 = vst [vmem:[#allocation2 + $0x238] sm:$0xff] %v10167_v37 }
 0x1e2   : > { %8526 = vmatprep.mubr.msk.f32.mxu0 %vm346_vm0, %v10289_v15  ;;  %v12319_v15 = vld [vmem:[#allocation7_spill] sm:$0xff] }
 0x1e3   : > { %9633 = vmatpush3.bf16.msra.mxu1 %v9352_v2 }
 0x1e5   : > { %8527 = vmatmul.mubr.msk.f32.gmra.mrb[8].mxu0 %vm346_vm0, %v10296_v16  ;;  %v12320_v16 = vld [vmem:[#allocation8_spill] sm:$0xff] }
 0x1e6   : > { %8529 = vmatprep.mubr.msk.f32.mxu0 %vm346_vm0, %v10299_v17  ;;  %v12321_v17 = vld [vmem:[#allocation9_spill] sm:$0xff] }
 0x1e9   : > { %8530 = vmatmul.mubr.msk.f32.gmra.mrb[10].mxu0 %vm346_vm0, %v10306_v18  ;;  %v12322_v18 = vld [vmem:[#allocation10_spill] sm:$0xff] }
 0x1ea   : > { %8532 = vmatprep.mubr.msk.f32.mxu0 %vm346_vm0, %v10309_v19  ;;  %v12323_v19 = vld [vmem:[#allocation37_spill] sm:$0xff] }
 0x1ed   : > { %8533 = vmatmul.mubr.msk.f32.gmra.mrb[12].mxu0 %vm346_vm0, %v10316_v20  ;;  %v7198_v20 = vld [vmem:[%s10228_s10 + $0x199] sm:$0xff] }
 0x1ee   : > { %8535 = vmatprep.mubr.msk.f32.mxu0 %vm346_vm0, %v10319_v21  ;;  %v12324_v21 = vld [vmem:[#allocation38_spill] sm:$0xff] }
 0x1f1   : > { %8536 = vmatmul.mubr.msk.f32.gmra.mrb[14].mxu0 %vm346_vm0, %v10326_v22  ;;  %v7199_v22 = vld [vmem:[%s10228_s10 + $0x1a1] sm:$0xff] }
 0x1f2   : > { %8538 = vmatprep.mubr.msk.f32.mxu0 %vm346_vm0, %v10329_v23  ;;  %v12325_v23 = vld [vmem:[#allocation13_spill] sm:$0xff] }
 0x1f5   : > { %8539 = vmatmul.mubr.msk.f32.gmra.mrb[16].mxu0 %vm346_vm0, %v10336_v24  ;;  %v12326_v24 = vld [vmem:[#allocation14_spill] sm:$0xff] }
 0x1f6   : > { %8541 = vmatprep.mubr.msk.f32.mxu0 %vm346_vm0, %v10339_v25  ;;  %v12327_v25 = vld [vmem:[#allocation15_spill] sm:$0xff] }
 0x1f9   : > { %8542 = vmatmul.mubr.msk.f32.gmra.mrb[18].mxu0 %vm346_vm0, %v10346_v26  ;;  %v12328_v26 = vld [vmem:[#allocation16_spill] sm:$0xff] }
 0x1fa   : > { %8544 = vmatprep.mubr.msk.f32.mxu0 %vm346_vm0, %v12315_v11 }
 0x1fd   : > { %8545 = vmatmul.mubr.msk.f32.gmra.mrb[20].mxu0 %vm346_vm0, %v12316_v12 }
 0x1fe   : > { %8547 = vmatprep.mubr.msk.f32.mxu0 %vm346_vm0, %v12317_v13 }
 0x201   : > { %8548 = vmatmul.mubr.msk.f32.gmra.mrb[22].mxu0 %vm346_vm0, %v12318_v14 }
 0x202   : > { %8550 = vmatprep.mubr.msk.f32.mxu0 %vm346_vm0, %v12319_v15 }
 0x205   : > { %8551 = vmatmul.mubr.msk.f32.gmra.mrb[24].mxu0 %vm346_vm0, %v12320_v16 }
 0x206   : > { %8553 = vmatprep.mubr.msk.f32.mxu0 %vm346_vm0, %v12321_v17  ;;  %v3949_v17 = vld [vmem:[%s12167_s4 + $0x10] sm:$0xff] }
 0x209   : > { %8554 = vmatmul.mubr.msk.f32.gmra.mrb[26].mxu0 %vm346_vm0, %v12322_v18  ;;  %v3950_v18 = vld [vmem:[%s12167_s4 + $0x18] sm:$0xff] }
 0x20a   : > { %8556 = vmatprep.mubr.msk.f32.mxu0 %vm346_vm0, %v12323_v19 }
 0x20d   : > { %8557 = vmatmul.mubr.msk.f32.gmra.mrb[28].mxu0 %vm346_vm0, %v12324_v21 }
 0x20e   : > { %8559 = vmatprep.mubr.msk.f32.mxu0 %vm346_vm0, %v7198_v20 }
 0x211   : > { %8560 = vmatmul.mubr.msk.f32.gmra.mrb[30].mxu0 %vm346_vm0, %v7199_v22 }
 0x212   : > { %8564 = vmatprep.mubr.msk.f32.mxu0 %vm346_vm0, %v12325_v23 }
 0x215   : > { %8565 = vmatmul.mubr.msk.f32.vlgmr.msra.gmra.mrb[0].mxu0 %vm346_vm0, %v12326_v24 }
 0x216   : > { %8567 = vmatprep.mubr.msk.f32.mxu0 %vm346_vm0, %v12327_v25  ;;  %9335 = vmatpush3.bf16.msra.mxu0 %v9332_v44  ;;  %v9368_v25 = vpack.c.bf16 %v3950_v18, %v3949_v17 }
 0x217   : > { %9337 = vmatprep.subr.bf16.mxu0 %v9336_v47 }
 0x219   : > { %8568 = vmatmul.mubr.msk.f32.gmra.mrb[2].mxu0 %vm346_vm0, %v12328_v26 }
 0x21a   : > { %8570 = vmatprep.mubr.msk.f32.mxu0 %vm346_vm0, %v12329_v53  ;;  %9339 = vmatpush3.bf16.msra.mxu0 %v9336_v47 }
 0x21b   : > { %9341 = vmatprep.subr.bf16.mxu0 %v9340_v49 }
 0x21d   : > { %8571 = vmatmul.mubr.msk.f32.gmra.mrb[4].mxu0 %vm346_vm0, %v12297_v28  ;;  %v12335_v28 = vld [vmem:[#allocation24_spill] sm:$0xff] }
 0x21e   : > { %8573 = vmatprep.mubr.msk.f32.mxu0 %vm346_vm0, %v12330_v54  ;;  %9343 = vmatpush3.bf16.msra.mxu0 %v9340_v49  ;;  %v3951_v54 = vld [vmem:[%s12167_s4 + $0x20] sm:$0xff] }
 0x21f   : > { %9345 = vmatprep.subr.bf16.mxu0 %v9344_v9 }
 0x221   : > { %8574 = vmatmul.mubr.msk.f32.gmra.mrb[6].mxu0 %vm346_vm0, %v12331_v55  ;;  %v3952_v55 = vld [vmem:[%s12167_s4 + $0x28] sm:$0xff] }
 0x222   : > { %8576 = vmatprep.mubr.msk.f32.mxu0 %vm346_vm0, %v12332_v56  ;;  %9347 = vmatpush3.bf16.msra.mxu0 %v9344_v9 }
 0x223   : > { %9349 = vmatprep.subr.bf16.mxu0 %v9348_v52 }
 0x225   : > { %8577 = vmatmul.mubr.msk.f32.gmra.mrb[8].mxu0 %vm346_vm0, %v12333_v57 }
 0x226   : > { %8579 = vmatprep.mubr.msk.f32.mxu0 %vm346_vm0, %v12334_v58  ;;  %9351 = vmatpush3.bf16.msra.mxu0 %v9348_v52 }
 0x227   : > { %9353 = vmatprep.subr.bf16.mxu0 %v9352_v2 }
 0x229   : > { %8580 = vmatmul.mubr.msk.f32.gmra.mrb[10].mxu0 %vm346_vm0, %v12335_v28 }
 0x22a   : > { %8582 = vmatprep.mubr.msk.f32.mxu0 %vm346_vm0, %v12336_v59  ;;  %9355 = vmatpush3.bf16.msra.mxu0 %v9352_v2 }
 0x22d   : > { %8583 = vmatmul.mubr.msk.f32.gmra.mrb[12].mxu0 %vm346_vm0, %v12337_v60 }
 0x22e   : > { %8585 = vmatprep.mubr.msk.f32.mxu0 %vm346_vm0, %v12338_v61  ;;  %v9372_v61 = vpack.c.bf16 %v3952_v55, %v3951_v54 }
 0x231   : > { %8586 = vmatmul.mubr.msk.f32.gmra.mrb[14].mxu0 %vm346_vm0, %v12307_v27  ;;  %v12341_v27 = vld [vmem:[#allocation34_spill] sm:$0xff] }
 0x232   : > { %8588 = vmatprep.mubr.msk.f32.mxu0 %vm346_vm0, %v12339_v62 }
 0x235   : > { %8589 = vmatmul.mubr.msk.f32.gmra.mrb[16].mxu0 %vm346_vm0, %v12309_v30  ;;  %v7263_v30 = vld [vmem:[%s10228_s10 + $0x19a] sm:$0xff] }
 0x236   : > { %8591 = vmatprep.mubr.msk.f32.mxu0 %vm346_vm0, %v12310_v29  ;;  %v12342_v29 = vld [vmem:[#allocation36_spill] sm:$0xff] }
 0x239   : > { %8592 = vmatmul.mubr.msk.f32.gmra.mrb[18].mxu0 %vm346_vm0, %v12340_v63 }
 0x23a   : > { %8594 = vmatprep.mubr.msk.f32.mxu0 %vm346_vm0, %v12312_v39  ;;  %v11184_v39 = vld [vmem:[%s12165_s2] ss:$0 sm:$0xff] }
 0x23d   : > { %8595 = vmatmul.mubr.msk.f32.gmra.mrb[20].mxu0 %vm346_vm0, %v10678_v32  ;;  %v7264_v32 = vld [vmem:[%s10228_s10 + $0x1a2] sm:$0xff] }
 0x23e   : > { %8597 = vmatprep.mubr.msk.f32.mxu0 %vm346_vm0, %v12341_v27  ;;  %v3953_v27 = vld [vmem:[%s12167_s4 + $0x30] sm:$0xff] }
 0x241   : > { %8598 = vmatmul.mubr.msk.f32.gmra.mrb[22].mxu0 %vm346_vm0, %v10688_v5 }
 0x242   : > { %8600 = vmatprep.mubr.msk.f32.mxu0 %vm346_vm0, %v12314_v33  ;;  %v3948_v33 = vld [vmem:[%s12167_s4 + $0x8] sm:$0xff] }
 0x245   : > { %8601 = vmatmul.mubr.msk.f32.gmra.mrb[24].mxu0 %vm346_vm0, %v10698_v35  ;;  %v7314_v35 = vld [vmem:[%s12167_s4 + $0xf0] sm:$0xff] }
 0x246   : > { %8603 = vmatprep.mubr.msk.f32.mxu0 %vm346_vm0, %v12342_v29  ;;  %v9360_v34 = vpack.c.bf16 %v7315_v38, %v7314_v35  ;;  %v3954_v29 = vld [vmem:[%s12167_s4 + $0x38] sm:$0xff]  ;;  %v3955_v38 = vld [vmem:[%s12167_s4 + $0x40] sm:$0xff] }
 0x249   : > { %8604 = vmatmul.mubr.msk.f32.gmra.mrb[26].mxu0 %vm346_vm0, %v10708_v36  ;;  %v7313_v36 = vld [vmem:[%s12167_s4 + $0xe8] sm:$0xff] }
 0x24a   : > { %8606 = vmatprep.mubr.msk.f32.mxu0 %vm346_vm0, %v10921_v31  ;;  %v9356_v5 = vpack.c.bf16 %v7313_v36, %v7312_v3  ;;  %v9364_v31 = vpack.c.bf16 %v3948_v33, %v3947_v6  ;;  %v9376_v36 = vpack.c.bf16 %v3954_v29, %v3953_v27 }
 0x24c   : > { %9357 = vmatprep.subr.bf16.mxu0 %v9356_v5  ;;  %9626 = vmatprep.subr.bf16.mxu1 %v9356_v5 }
 0x24d   : > { %8607 = vmatmul.mubr.msk.f32.gmra.mrb[28].mxu0 %vm346_vm0, %v10928_v4  ;;  %9634 = vmatpush3.bf16.msra.mxu1 %v9356_v5 }
 0x24e   : > { %8609 = vmatprep.mubr.msk.f32.mxu0 %vm346_vm0, %v7263_v30  ;;  %9359 = vmatpush3.bf16.msra.mxu0 %v9356_v5 }
 0x24f   : > { %9361 = vmatprep.subr.bf16.mxu0 %v9360_v34  ;;  %9627 = vmatprep.subr.bf16.mxu1 %v9360_v34 }
 0x251   : > { %8610 = vmatmul.mubr.msk.f32.gmra.mrb[30].mxu0 %vm346_vm0, %v7264_v32  ;;  %9635 = vmatpush3.bf16.msra.mxu1 %v9360_v34 }
 0x252   : > { %9363 = vmatpush3.bf16.msra.mxu0 %v9360_v34  ;;  %8644 = vmatprep.mubr.f32.mxu0 %v10167_v37  ;;  %v3956_v34 = vld [vmem:[%s12167_s4 + $0x48] sm:$0xff] }
 0x253   : > { %9365 = vmatprep.subr.bf16.mxu1 %v9364_v31 }
 0x255   : > { %8645 = vmatmul.mubr.f32.vlgmr.msra.gmra.mrb[32].mxu0 %v10167_v37 }
 0x2e8   : > { %v8566_v4 = vpop.f32.mrb[0].mxu0 }
 0x2e9   : > { %v3708_v41 = vmul.f32 %v8566_v4, %v11184_v39  ;;  %v3509_v42 = vpop.f32.mrb[1].mxu0 }
 0x2ea   : > { %v3707_v43 = vmul.f32 %v11184_v39, %v3509_v42  ;;  %v9380_v42 = vpack.c.bf16 %v3956_v34, %v3955_v38 }
 0x2eb   : > { %v3747_v44 = vadd.f32 %v11189_v40, %v3708_v41 }
 0x2ec   : > { %v3746_v45 = vadd.f32 %v11189_v40, %v3707_v43  ;;  %v8569_v46 = vpop.f32.mrb[2].mxu0 }
 0x2ed   : > { %v3779_v47 = vmax.f32 %v3747_v44, 0.0  ;;  %v3710_v48 = vmul.f32 %v8569_v46, %v11184_v39  ;;  %v3519_v7 = vpop.f32.mrb[3].mxu0  ;;  %v3958_v46 = vld [vmem:[%s12167_s4 + $0x58] sm:$0xff] }
 0x2ee   : > { %v3778_v49 = vmax.f32 %v3746_v45, 0.0  ;;  %v3709_v8 = vmul.f32 %v11184_v39, %v3519_v7  ;;  %v3957_v45 = vld [vmem:[%s12167_s4 + $0x50] sm:$0xff] }
 0x2ef   : > { %3884 = vst [vmem:[#allocation2 + $0x30] sm:$0xff] %v3779_v47  ;;  %v3749_v50 = vadd.f32 %v11189_v40, %v3710_v48 }
 0x2f0   : > { %3883 = vst [vmem:[#allocation2 + $0x28] sm:$0xff] %v3778_v49  ;;  %v3748_v9 = vadd.f32 %v11189_v40, %v3709_v8  ;;  %v8572_v10 = vpop.f32.mrb[4].mxu0  ;;  %8647 = vmatprep.mubr.f32.mxu0 %v3778_v49 }
 0x2f1   : > { %v3781_v51 = vmax.f32 %v3749_v50, 0.0  ;;  %v3712_v52 = vmul.f32 %v8572_v10, %v11184_v39  ;;  %v3529_v11 = vpop.f32.mrb[5].mxu0  ;;  %8648 = vmatmul.mubr.f32.gmra.mrb[34].mxu0 %v3779_v47 }
 0x2f2   : > { %v3780_v12 = vmax.f32 %v3748_v9, 0.0  ;;  %v3711_v13 = vmul.f32 %v11184_v39, %v3529_v11  ;;  %v9384_v9 = vpack.c.bf16 %v3958_v46, %v3957_v45  ;;  %v3960_v11 = vld [vmem:[%s12167_s4 + $0x68] sm:$0xff] }
 0x2f3   : > { %3886 = vst [vmem:[#allocation2 + $0x50] sm:$0xff] %v3781_v51  ;;  %v3751_v14 = vadd.f32 %v11189_v40, %v3712_v52  ;;  %v3959_v52 = vld [vmem:[%s12167_s4 + $0x60] sm:$0xff] }
 0x2f4   : > { %3885 = vst [vmem:[#allocation2 + $0x48] sm:$0xff] %v3780_v12  ;;  %v3750_v15 = vadd.f32 %v11189_v40, %v3711_v13  ;;  %v8575_v16 = vpop.f32.mrb[6].mxu0  ;;  %8650 = vmatprep.mubr.f32.mxu0 %v3780_v12  ;;  %v9388_v18 = vpack.c.bf16 %v3960_v11, %v3959_v52 }
 0x2f5   : > { %v3783_v19 = vmax.f32 %v3751_v14, 0.0  ;;  %v3714_v20 = vmul.f32 %v8575_v16, %v11184_v39  ;;  %v3539_v21 = vpop.f32.mrb[7].mxu0  ;;  %8651 = vmatmul.mubr.f32.gmra.mrb[36].mxu0 %v3781_v51 }
 0x2f6   : > { %v3782_v22 = vmax.f32 %v3750_v15, 0.0  ;;  %v3713_v23 = vmul.f32 %v11184_v39, %v3539_v21  ;;  %v3961_v21 = vld [vmem:[%s12167_s4 + $0x70] sm:$0xff] }
 0x2f7   : > { %3888 = vst [vmem:[#allocation2 + $0x70] sm:$0xff] %v3783_v19  ;;  %v3753_v24 = vadd.f32 %v11189_v40, %v3714_v20 }
 0x2f8   : > { %3887 = vst [vmem:[#allocation2 + $0x68] sm:$0xff] %v3782_v22  ;;  %v3752_v26 = vadd.f32 %v11189_v40, %v3713_v23  ;;  %v8578_v53 = vpop.f32.mrb[8].mxu0  ;;  %8653 = vmatprep.mubr.f32.mxu1 %v3782_v22  ;;  %v3962_v22 = vld [vmem:[%s12167_s4 + $0x78] sm:$0xff] }
 0x2f9   : > { %v3785_v56 = vmax.f32 %v3753_v24, 0.0  ;;  %v3716_v57 = vmul.f32 %v8578_v53, %v11184_v39  ;;  %v3549_v58 = vpop.f32.mrb[9].mxu0  ;;  %8654 = vmatmul.mubr.f32.vlgmr.msra.gmra.mrb[0].mxu1 %v3783_v19  ;;  %v9392_v55 = vpack.c.bf16 %v3962_v22, %v3961_v21  ;;  %v7318_v21 = vld [vmem:[%s12167_s4 + $0x110] sm:$0xff] }
 0x2fa   : > { %v3784_v28 = vmax.f32 %v3752_v26, 0.0  ;;  %v3715_v59 = vmul.f32 %v11184_v39, %v3549_v58  ;;  %9367 = vmatpush3.bf16.msra.mxu1 %v9364_v31  ;;  %v7316_v58 = vld [vmem:[%s12167_s4 + $0x100] sm:$0xff] }
 0x2fb   : > { %3890 = vst [vmem:[#allocation2 + $0x90] sm:$0xff] %v3785_v56  ;;  %v3755_v60 = vadd.f32 %v11189_v40, %v3716_v57  ;;  %9369 = vmatprep.subr.bf16.mxu1 %v9368_v25 }
 0x2fc   : > { %3889 = vst [vmem:[#allocation2 + $0x88] sm:$0xff] %v3784_v28  ;;  %v3754_v62 = vadd.f32 %v11189_v40, %v3715_v59  ;;  %v8581_v63 = vpop.f32.mrb[10].mxu0  ;;  %8656 = vmatprep.mubr.f32.mxu1 %v3784_v28  ;;  %v7317_v28 = vld [vmem:[%s12167_s4 + $0x108] sm:$0xff] }
 0x2fd   : > { %v3787_v30 = vmax.f32 %v3755_v60, 0.0  ;;  %v3718_v32 = vmul.f32 %v8581_v63, %v11184_v39  ;;  %v3559_v0 = vpop.f32.mrb[11].mxu0  ;;  %8657 = vmatmul.mubr.f32.gmra.mrb[2].mxu1 %v3785_v56  ;;  %v11284_v29 = vpack.c.bf16 %v7317_v28, %v7316_v58  ;;  %v11385_v58 = vld [vmem:[#allocation2 + $0x47] sm:$0xff] }
 0x2fe   : > { %v3786_v1 = vmax.f32 %v3754_v62, 0.0  ;;  %v3717_v2 = vmul.f32 %v11184_v39, %v3559_v0  ;;  %9371 = vmatpush3.bf16.msra.mxu1 %v9368_v25 }
 0x2ff   : > { %3892 = vst [vmem:[#allocation2 + $0xb0] sm:$0xff] %v3787_v30  ;;  %v3757_v3 = vadd.f32 %v11189_v40, %v3718_v32  ;;  %9373 = vmatprep.subr.bf16.mxu1 %v9372_v61 }
 0x300   : > { %3891 = vst [vmem:[#allocation2 + $0xa8] sm:$0xff] %v3786_v1  ;;  %v3756_v5 = vadd.f32 %v11189_v40, %v3717_v2  ;;  %v8584_v35 = vpop.f32.mrb[12].mxu0  ;;  %8659 = vmatprep.mubr.f32.mxu1 %v3786_v1 }
 0x301   : > { %v3789_v37 = vmax.f32 %v3757_v3, 0.0  ;;  %v3720_v6 = vmul.f32 %v8584_v35, %v11184_v39  ;;  %v3569_v33 = vpop.f32.mrb[13].mxu0  ;;  %8660 = vmatmul.mubr.f32.gmra.mrb[4].mxu1 %v3787_v30 }
 0x302   : > { %v3788_v31 = vmax.f32 %v3756_v5, 0.0  ;;  %v3719_v4 = vmul.f32 %v11184_v39, %v3569_v33  ;;  %9375 = vmatpush3.bf16.msra.mxu1 %v9372_v61 }
 0x303   : > { %3894 = vst [vmem:[#allocation2 + $0xd0] sm:$0xff] %v3789_v37  ;;  %v3759_v41 = vadd.f32 %v11189_v40, %v3720_v6  ;;  %9377 = vmatprep.subr.bf16.mxu1 %v9376_v36 }
 0x304   : > { %3893 = vst [vmem:[#allocation2 + $0xc8] sm:$0xff] %v3788_v31  ;;  %v3758_v43 = vadd.f32 %v11189_v40, %v3719_v4  ;;  %v8587_v44 = vpop.f32.mrb[14].mxu0  ;;  %8662 = vmatprep.mubr.f32.mxu1 %v3788_v31 }
 0x305   : > { %v3791_v47 = vmax.f32 %v3759_v41, 0.0  ;;  %v3722_v48 = vmul.f32 %v8587_v44, %v11184_v39  ;;  %v3579_v7 = vpop.f32.mrb[15].mxu0  ;;  %8663 = vmatmul.mubr.f32.gmra.mrb[6].mxu1 %v3789_v37 }
 0x306   : > { %v3790_v49 = vmax.f32 %v3758_v43, 0.0  ;;  %v3721_v8 = vmul.f32 %v11184_v39, %v3579_v7  ;;  %9379 = vmatpush3.bf16.msra.mxu1 %v9376_v36 }
 0x307   : > { %3896 = vst [vmem:[#allocation2 + $0xf0] sm:$0xff] %v3791_v47  ;;  %v3761_v50 = vadd.f32 %v11189_v40, %v3722_v48  ;;  %9381 = vmatprep.subr.bf16.mxu1 %v9380_v42 }
 0x308   : > { %3895 = vst [vmem:[#allocation2 + $0xe8] sm:$0xff] %v3790_v49  ;;  %v3760_v10 = vadd.f32 %v11189_v40, %v3721_v8  ;;  %v8590_v51 = vpop.f32.mrb[16].mxu0  ;;  %8665 = vmatprep.mubr.f32.mxu1 %v3790_v49 }
 0x309   : > { %v3793_v12 = vmax.f32 %v3761_v50, 0.0  ;;  %v3724_v13 = vmul.f32 %v8590_v51, %v11184_v39  ;;  %v3589_v14 = vpop.f32.mrb[17].mxu0  ;;  %8666 = vmatmul.mubr.f32.gmra.mrb[8].mxu1 %v3791_v47 }
 0x30a   : > { %v3792_v15 = vmax.f32 %v3760_v10, 0.0  ;;  %v3723_v16 = vmul.f32 %v11184_v39, %v3589_v14  ;;  %9383 = vmatpush3.bf16.msra.mxu1 %v9380_v42 }
 0x30b   : > { %3898 = vst [vmem:[#allocation2 + $0x110] sm:$0xff] %v3793_v12  ;;  %v3763_v17 = vadd.f32 %v11189_v40, %v3724_v13  ;;  %9385 = vmatprep.subr.bf16.mxu1 %v9384_v9 }
 0x30c   : > { %3897 = vst [vmem:[#allocation2 + $0x108] sm:$0xff] %v3792_v15  ;;  %v3762_v19 = vadd.f32 %v11189_v40, %v3723_v16  ;;  %v8593_v20 = vpop.f32.mrb[18].mxu0  ;;  %8668 = vmatprep.mubr.f32.mxu1 %v3792_v15 }
 0x30d   : > { %v3795_v23 = vmax.f32 %v3763_v17, 0.0  ;;  %v3726_v24 = vmul.f32 %v8593_v20, %v11184_v39  ;;  %v3599_v25 = vpop.f32.mrb[19].mxu0  ;;  %8669 = vmatmul.mubr.f32.gmra.mrb[10].mxu1 %v3793_v12 }
 0x30e   : > { %v3794_v26 = vmax.f32 %v3762_v19, 0.0  ;;  %v3725_v53 = vmul.f32 %v11184_v39, %v3599_v25  ;;  %9387 = vmatpush3.bf16.msra.mxu1 %v9384_v9  ;;  %v3915_v19 = vld [vmem:[#allocation2 + $0x7] sm:$0xff] }
 0x30f   : > { %3900 = vst [vmem:[#allocation2 + $0x130] sm:$0xff] %v3795_v23  ;;  %v3765_v54 = vadd.f32 %v11189_v40, %v3726_v24  ;;  %9389 = vmatprep.subr.bf16.mxu1 %v9388_v18  ;;  %v3916_v24 = vld [vmem:[#allocation2 + $0xf] sm:$0xff]  ;;  %v7320_v25 = vld [vmem:[%s12167_s4 + $0x120] sm:$0xff] }
 0x310   : > { %3899 = vst [vmem:[#allocation2 + $0x128] sm:$0xff] %v3794_v26  ;;  %v3764_v56 = vadd.f32 %v11189_v40, %v3725_v53  ;;  %v8596_v57 = vpop.f32.mrb[20].mxu0  ;;  %8671 = vmatprep.mubr.f32.mxu1 %v3794_v26  ;;  %v7321_v26 = vld [vmem:[%s12167_s4 + $0x128] sm:$0xff] }
 0x311   : > { %v3797_v59 = vmax.f32 %v3765_v54, 0.0  ;;  %v3728_v60 = vmul.f32 %v8596_v57, %v11184_v39  ;;  %v3609_v61 = vpop.f32.mrb[21].mxu0  ;;  %8672 = vmatmul.mubr.f32.gmra.mrb[12].mxu1 %v3795_v23  ;;  %v11372_v53 = vld [vmem:[#allocation2 + $0x27] sm:$0xff]  ;;  %v9404_v54 = vpack.c.bf16 %v7321_v26, %v7320_v25  ;;  %v7323_v57 = vld [vmem:[%s12167_s4 + $0x138] sm:$0xff] }
 0x312   : > { %v11280_v62 = vmax.f32 %v3764_v56, 0.0  ;;  %v3727_v63 = vmul.f32 %v11184_v39, %v3609_v61  ;;  %9391 = vmatpush3.bf16.msra.mxu1 %v9388_v18  ;;  %v7322_v56 = vld [vmem:[%s12167_s4 + $0x130] sm:$0xff]  ;;  %v7325_v61 = vld [vmem:[%s12167_s4 + $0x148] sm:$0xff] }
 0x313   : > { %3902 = vst [vmem:[#allocation2 + $0x150] sm:$0xff] %v3797_v59  ;;  %v3767_v27 = vadd.f32 %v11189_v40, %v3728_v60  ;;  %9393 = vmatprep.subr.bf16.mxu1 %v9392_v55  ;;  %v9408_v28 = vpack.c.bf16 %v7323_v57, %v7322_v56  ;;  %v7324_v60 = vld [vmem:[%s12167_s4 + $0x140] sm:$0xff]  ;;  %v4462_v56 = vld [vmem:[#allocation2 + $0x9] sm:$0xff] }
 0x314   : > { %3901 = vst [vmem:[#allocation2 + $0x148] sm:$0xff] %v11280_v62  ;;  %v3766_v30 = vadd.f32 %v11189_v40, %v3727_v63  ;;  %v8599_v32 = vpop.f32.mrb[22].mxu0  ;;  %8674 = vmatprep.mubr.f32.mxu1 %v11280_v62  ;;  %v11397_v63 = vld [vmem:[#allocation2 + $0x67] sm:$0xff] }
 0x315   : > { %v11289_v0 = vmax.f32 %v3767_v27, 0.0  ;;  %v3730_v1 = vmul.f32 %v8599_v32, %v11184_v39  ;;  %v3619_v2 = vpop.f32.mrb[23].mxu0  ;;  %8675 = vmatmul.mubr.f32.gmra.mrb[14].mxu1 %v3797_v59  ;;  %v11388_v59 = vld [vmem:[#allocation2 + $0x4f] sm:$0xff]  ;;  %v9412_v27 = vpack.c.bf16 %v7325_v61, %v7324_v60  ;;  %v7327_v32 = vld [vmem:[%s12167_s4 + $0x158] sm:$0xff] }
 0x316   : > { %v11292_v3 = vmax.f32 %v3766_v30, 0.0  ;;  %v3729_v36 = vmul.f32 %v11184_v39, %v3619_v2  ;;  %9395 = vmatpush3.bf16.msra.mxu1 %v9392_v55  ;;  %v11376_v55 = vld [vmem:[#allocation2 + $0x2f] sm:$0xff]  ;;  %v7335_v60 = vld [vmem:[%s12167_s4 + $0x198] sm:$0xff] }
 0x317   : > { %3904 = vst [vmem:[#allocation2 + $0x170] sm:$0xff] %v11289_v0  ;;  %v3769_v5 = vadd.f32 %v11189_v40, %v3730_v1  ;;  %9397 = vmatprep.subr.bf16.mxu1 %v11284_v29  ;;  %v7326_v30 = vld [vmem:[%s12167_s4 + $0x150] sm:$0xff]  ;;  %v11409_v1 = vld [vmem:[#allocation2 + $0x87] sm:$0xff] }
 0x318   : > { %3903 = vst [vmem:[#allocation2 + $0x168] sm:$0xff] %v11292_v3  ;;  %v3768_v35 = vadd.f32 %v11189_v40, %v3729_v36  ;;  %v8602_v38 = vpop.f32.mrb[24].mxu0  ;;  %8677 = vmatprep.mubr.f32.mxu1 %v11292_v3  ;;  %v9416_v2 = vpack.c.bf16 %v7327_v32, %v7326_v30  ;;  %v11412_v36 = vld [vmem:[#allocation2 + $0x8f] sm:$0xff]  ;;  %v7336_v30 = vld [vmem:[%s12167_s4 + $0x1a0] sm:$0xff] }
 0x319   : > { %v11301_v34 = vmax.f32 %v3769_v5, 0.0  ;;  %v3732_v37 = vmul.f32 %v8602_v38, %v11184_v39  ;;  %v3629_v6 = vpop.f32.mrb[25].mxu0  ;;  %8678 = vmatmul.mubr.f32.gmra.mrb[16].mxu1 %v11289_v0  ;;  %v7328_v5 = vld [vmem:[%s12167_s4 + $0x160] sm:$0xff]  ;;  %v4463_v61 = vld [vmem:[#allocation2 + $0x11] sm:$0xff]  ;;  %v7337_v32 = vld [vmem:[%s12167_s4 + $0x1a8] sm:$0xff] }
 0x31a   : > { %v11305_v33 = vmax.f32 %v3768_v35, 0.0  ;;  %v3731_v31 = vmul.f32 %v11184_v39, %v3629_v6  ;;  %v7329_v35 = vld [vmem:[%s12167_s4 + $0x168] sm:$0xff] }
 0x31b   : > { %3906 = vst [vmem:[#allocation2 + $0x190] sm:$0xff] %v11301_v34  ;;  %v3771_v4 = vadd.f32 %v11189_v40, %v3732_v37  ;;  %v11421_v38 = vld [vmem:[#allocation2 + $0xa7] sm:$0xff]  ;;  %v9420_v37 = vpack.c.bf16 %v7329_v35, %v7328_v5  ;;  %v11424_v6 = vld [vmem:[#allocation2 + $0xaf] sm:$0xff]  ;;  %v9436_v5 = vpack.c.bf16 %v7337_v32, %v7336_v30 }
 0x31c   : > { %3905 = vst [vmem:[#allocation2 + $0x188] sm:$0xff] %v11305_v33  ;;  %v3770_v41 = vadd.f32 %v11189_v40, %v3731_v31  ;;  %v8605_v42 = vpop.f32.mrb[26].mxu0  ;;  %8680 = vmatprep.mubr.f32.mxu1 %v11305_v33  ;;  %v7330_v31 = vld [vmem:[%s12167_s4 + $0x170] sm:$0xff] }
 0x31d   : > { %v11313_v43 = vmax.f32 %v3771_v4, 0.0  ;;  %v3734_v44 = vmul.f32 %v8605_v42, %v11184_v39  ;;  %v3639_v45 = vpop.f32.mrb[27].mxu0  ;;  %8681 = vmatmul.mubr.f32.gmra.mrb[18].mxu1 %v11301_v34  ;;  %v7331_v4 = vld [vmem:[%s12167_s4 + $0x178] sm:$0xff]  ;;  %v11551_v30 = vld [vmem:[#allocation2 + $0x89] sm:$0xff] }
 0x31e   : > { %v11317_v46 = vmax.f32 %v3770_v41, 0.0  ;;  %v3733_v47 = vmul.f32 %v11184_v39, %v3639_v45  ;;  %v11433_v41 = vld [vmem:[#allocation2 + $0xc7] sm:$0xff]  ;;  %v9424_v45 = vpack.c.bf16 %v7331_v4, %v7330_v31  ;;  %v11518_v35 = vld [vmem:[#allocation2 + $0x31] sm:$0xff] }
 0x31f   : > { %3908 = vst [vmem:[#allocation2 + $0x1b0] sm:$0xff] %v11313_v43  ;;  %v3773_v48 = vadd.f32 %v11189_v40, %v3734_v44  ;;  %v7339_v31 = vld [vmem:[%s12167_s4 + $0x1b8] sm:$0xff]  ;;  %v11527_v4 = vld [vmem:[#allocation2 + $0x49] sm:$0xff] }
 0x320   : > { %3907 = vst [vmem:[#allocation2 + $0x1a8] sm:$0xff] %v11317_v46  ;;  %v3772_v7 = vadd.f32 %v11189_v40, %v3733_v47  ;;  %v8608_v49 = vpop.f32.mrb[28].mxu0  ;;  %8683 = vmatprep.mubr.f32.mxu1 %v11317_v46  ;;  %v11440_v47 = vld [vmem:[#allocation2 + $0xcf] sm:$0xff] }
 0x321   : > { %v11325_v8 = vmax.f32 %v3773_v48, 0.0  ;;  %v3736_v50 = vmul.f32 %v8608_v49, %v11184_v39  ;;  %v3649_v9 = vpop.f32.mrb[29].mxu0  ;;  %8684 = vmatmul.mubr.f32.gmra.mrb[20].mxu1 %v11313_v43  ;;  %v7332_v48 = vld [vmem:[%s12167_s4 + $0x180] sm:$0xff] }
 0x322   : > { %v11329_v10 = vmax.f32 %v3772_v7, 0.0  ;;  %v3735_v51 = vmul.f32 %v11184_v39, %v3649_v9  ;;  %v7333_v7 = vld [vmem:[%s12167_s4 + $0x188] sm:$0xff] }
 0x323   : > { %3910 = vst [vmem:[#allocation2 + $0x1d0] sm:$0xff] %v11325_v8  ;;  %v3775_v52 = vadd.f32 %v11189_v40, %v3736_v50  ;;  %v11449_v49 = vld [vmem:[#allocation2 + $0xe7] sm:$0xff]  ;;  %v9428_v50 = vpack.c.bf16 %v7333_v7, %v7332_v48  ;;  %v11452_v9 = vld [vmem:[#allocation2 + $0xef] sm:$0xff] }
 0x324   : > { %3909 = vst [vmem:[#allocation2 + $0x1c8] sm:$0xff] %v11329_v10  ;;  %v3774_v11 = vadd.f32 %v11189_v40, %v3735_v51  ;;  %v8611_v12 = vpop.f32.mrb[30].mxu0  ;;  %8686 = vmatprep.mubr.f32.mxu1 %v11329_v10  ;;  %v11455_v51 = vld [vmem:[#allocation2 + $0x107] sm:$0xff]  ;;  %v11530_v48 = vld [vmem:[#allocation2 + $0x51] sm:$0xff] }
 0x325   : > { %v11337_v13 = vmax.f32 %v3775_v52, 0.0  ;;  %v3738_v14 = vmul.f32 %v8611_v12, %v11184_v39  ;;  %v3659_v15 = vpop.f32.mrb[31].mxu0  ;;  %8687 = vmatmul.mubr.f32.gmra.mrb[22].mxu1 %v11325_v8  ;;  %v11458_v52 = vld [vmem:[#allocation2 + $0x10f] sm:$0xff]  ;;  %v7340_v7 = vld [vmem:[%s12167_s4 + $0x1c0] sm:$0xff] }
 0x326   : > { %v11341_v16 = vmax.f32 %v3774_v11, 0.0  ;;  %v3737_v17 = vmul.f32 %v11184_v39, %v3659_v15  ;;  %v7319_v39 = vld [vmem:[%s12167_s4 + $0x118] sm:$0xff]  ;;  %v11461_v11 = vld [vmem:[#allocation2 + $0x127] sm:$0xff]  ;;  %v11464_v12 = vld [vmem:[#allocation2 + $0x12f] sm:$0xff] }
 0x327   : > { %3912 = vst [vmem:[#allocation2 + $0x1f0] sm:$0xff] %v11337_v13  ;;  %v11346_v18 = vadd.f32 %v11189_v40, %v3738_v14  ;;  %v11467_v14 = vld [vmem:[#allocation2 + $0x147] sm:$0xff]  ;;  %v11470_v15 = vld [vmem:[#allocation2 + $0x14f] sm:$0xff] }
 0x328   : > { %3911 = vst [vmem:[#allocation2 + $0x1e8] sm:$0xff] %v11341_v16  ;;  %v11350_v20 = vadd.f32 %v11189_v40, %v3737_v17  ;;  %8689 = vmatprep.mubr.f32.mxu1 %v11341_v16  ;;  %v9400_v40 = vpack.c.bf16 %v7319_v39, %v7318_v21  ;;  %v11435_v42 = vpop.f32.mrb[32].mxu0  ;;  %v11473_v17 = vld [vmem:[#allocation2 + $0x167] sm:$0xff]  ;;  %v11482_v39 = vld [vmem:[#allocation2 + $0x18f] sm:$0xff] }
 0x329   : > { %v12233_v22 = vmax.f32 %v11346_v18, 0.0  ;;  %8690 = vmatmul.mubr.f32.gmra.mrb[24].mxu1 %v11337_v13  ;;  %12343 = vst [vmem:[#allocation11_spill] sm:$0xff] %v11435_v42  ;;  %v11438_v44 = vpop.f32.mrb[33].mxu0  ;;  %v11479_v21 = vld [vmem:[#allocation2 + $0x187] sm:$0xff]  ;;  %v11596_v42 = vld [vmem:[#allocation2 + $0x111] sm:$0xff] }
 0x32a   : > { %v12234_v23 = vmax.f32 %v11350_v20, 0.0  ;;  %8724 = vmatprep.mubr.f32.mxu1 %v3915_v19  ;;  %12344 = vst [vmem:[#allocation12_spill] sm:$0xff] %v11438_v44  ;;  %v11476_v19 = vld [vmem:[#allocation2 + $0x16f] sm:$0xff]  ;;  %12347 = vst [vmem:[#allocation30_spill] sm:$0xff] %v11596_v42 }
 0x32b   : > { %3914 = vst [vmem:[#allocation2 + $0x210] sm:$0xff] %v12233_v22  ;;  %v11491_v25 = vld [vmem:[#allocation2 + $0x1c7] sm:$0xff]  ;;  %v11494_v26 = vld [vmem:[#allocation2 + $0x1cf] sm:$0xff] }
 0x32c   : > { %3913 = vst [vmem:[#allocation2 + $0x208] sm:$0xff] %v12234_v23  ;;  %v11575_v22 = vld [vmem:[#allocation2 + $0xc9] sm:$0xff] }
 0x32d   : > { %8725 = vmatmul.mubr.f32.vlgmr.msra.gmra.mrb[26].mxu1 %v3916_v24  ;;  %v11485_v24 = vld [vmem:[#allocation2 + $0x1a7] sm:$0xff] }
 0x32e   : > { %9399 = vmatpush3.bf16.msra.mxu1 %v11284_v29  ;;  %8727 = vmatprep.mubr.f32.mxu1 %v11372_v53  ;;  %v11400_v29 = vld [vmem:[#allocation2 + $0x6f] sm:$0xff] }
 0x32f   : > { %9401 = vmatprep.subr.bf16.mxu1 %v9400_v40  ;;  %v11500_v57 = vld [vmem:[#allocation2 + $0x1ef] sm:$0xff] }
 0x330   : > { %v7349_v23 = vld [vmem:[%s12167_s4 + $0x208] sm:$0xff] }
 0x331   : > { %8728 = vmatmul.mubr.f32.gmra.mrb[28].mxu1 %v11376_v55  ;;  %v11587_v44 = vld [vmem:[#allocation2 + $0xe9] sm:$0xff] }
 0x332   : > { %8730 = vmatprep.mubr.f32.mxu1 %v11385_v58  ;;  %9403 = vmatpush3.bf16.msra.mxu1 %v9400_v40  ;;  %v11488_v40 = vld [vmem:[#allocation2 + $0x1af] sm:$0xff] }
 0x333   : > { %9405 = vmatprep.subr.bf16.mxu1 %v9404_v54 }
 0x335   : > { %8731 = vmatmul.mubr.f32.gmra.mrb[30].mxu1 %v11388_v59 }
 0x336   : > { %8733 = vmatprep.mubr.f32.mxu1 %v11397_v63  ;;  %9407 = vmatpush3.bf16.msra.mxu1 %v9404_v54  ;;  %v11497_v54 = vld [vmem:[#allocation2 + $0x1e7] sm:$0xff] }
 0x337   : > { %9409 = vmatprep.subr.bf16.mxu1 %v9408_v28 }
 0x339   : > { %8734 = vmatmul.mubr.f32.gmra.mrb[0].mxu1 %v11400_v29 }
 0x33a   : > { %8736 = vmatprep.mubr.f32.mxu1 %v11409_v1  ;;  %9411 = vmatpush3.bf16.msra.mxu1 %v9408_v28  ;;  %v7334_v28 = vld [vmem:[%s12167_s4 + $0x190] sm:$0xff] }
 0x33b   : > { %9413 = vmatprep.subr.bf16.mxu1 %v9412_v27 }
 0x33d   : > { %8737 = vmatmul.mubr.f32.gmra.mrb[2].mxu1 %v11412_v36 }
 0x33e   : > { %8739 = vmatprep.mubr.f32.mxu1 %v11421_v38  ;;  %9415 = vmatpush3.bf16.msra.mxu1 %v9412_v27  ;;  %v9432_v27 = vpack.c.bf16 %v7335_v60, %v7334_v28  ;;  %v11542_v60 = vld [vmem:[#allocation2 + $0x71] sm:$0xff] }
 0x33f   : > { %9417 = vmatprep.subr.bf16.mxu1 %v9416_v2 }
 0x341   : > { %8740 = vmatmul.mubr.f32.gmra.mrb[4].mxu1 %v11424_v6 }
 0x342   : > { %8742 = vmatprep.mubr.f32.mxu1 %v11433_v41  ;;  %9419 = vmatpush3.bf16.msra.mxu1 %v9416_v2  ;;  %v11515_v2 = vld [vmem:[#allocation2 + $0x29] sm:$0xff] }
 0x343   : > { %9421 = vmatprep.subr.bf16.mxu1 %v9420_v37 }
 0x345   : > { %8743 = vmatmul.mubr.f32.gmra.mrb[6].mxu1 %v11440_v47 }
 0x346   : > { %8745 = vmatprep.mubr.f32.mxu1 %v11449_v49  ;;  %9423 = vmatpush3.bf16.msra.mxu1 %v9420_v37  ;;  %v7338_v37 = vld [vmem:[%s12167_s4 + $0x1b0] sm:$0xff] }
 0x347   : > { %9425 = vmatprep.subr.bf16.mxu1 %v9424_v45 }
 0x349   : > { %8746 = vmatmul.mubr.f32.gmra.mrb[8].mxu1 %v11452_v9 }
 0x34a   : > { %8748 = vmatprep.mubr.f32.mxu1 %v11455_v51  ;;  %9427 = vmatpush3.bf16.msra.mxu1 %v9424_v45  ;;  %v9440_v45 = vpack.c.bf16 %v7339_v31, %v7338_v37  ;;  %v7344_v37 = vld [vmem:[%s12167_s4 + $0x1e0] sm:$0xff]  ;;  %v7345_v31 = vld [vmem:[%s12167_s4 + $0x1e8] sm:$0xff] }
 0x34b   : > { %9429 = vmatprep.subr.bf16.mxu1 %v9428_v50 }
 0x34d   : > { %8749 = vmatmul.mubr.f32.gmra.mrb[10].mxu1 %v11458_v52 }
 0x34e   : > { %8751 = vmatprep.mubr.f32.mxu1 %v11461_v11 }
 0x351   : > { %8752 = vmatmul.mubr.f32.gmra.mrb[12].mxu1 %v11464_v12 }
 0x352   : > { %8754 = vmatprep.mubr.f32.mxu1 %v11467_v14 }
 0x355   : > { %8755 = vmatmul.mubr.f32.gmra.mrb[14].mxu1 %v11470_v15 }
 0x356   : > { %8757 = vmatprep.mubr.f32.mxu1 %v11473_v17 }
 0x359   : > { %8758 = vmatmul.mubr.f32.gmra.mrb[16].mxu1 %v11476_v19 }
 0x35a   : > { %8760 = vmatprep.mubr.f32.mxu1 %v11479_v21 }
 0x35d   : > { %8761 = vmatmul.mubr.f32.gmra.mrb[18].mxu1 %v11482_v39 }
 0x35e   : > { %8763 = vmatprep.mubr.f32.mxu1 %v11485_v24 }
 0x361   : > { %8764 = vmatmul.mubr.f32.gmra.mrb[20].mxu1 %v11488_v40 }
 0x362   : > { %8766 = vmatprep.mubr.f32.mxu1 %v11491_v25 }
 0x365   : > { %8767 = vmatmul.mubr.f32.gmra.mrb[22].mxu1 %v11494_v26 }
 0x366   : > { %8769 = vmatprep.mubr.f32.mxu1 %v11497_v54 }
 0x369   : > { %8770 = vmatmul.mubr.f32.gmra.mrb[24].mxu1 %v11500_v57 }
 0x36a   : > { %8804 = vmatprep.mubr.f32.mxu1 %v4462_v56  ;;  %v11539_v56 = vld [vmem:[#allocation2 + $0x69] sm:$0xff] }
 0x36d   : > { %8805 = vmatmul.mubr.f32.vlgmr.msra.gmra.mrb[26].mxu1 %v4463_v61  ;;  %v7342_v61 = vld [vmem:[%s12167_s4 + $0x1d0] sm:$0xff] }
 0x36e   : > { %9431 = vmatpush3.bf16.msra.mxu1 %v9428_v50  ;;  %8807 = vmatprep.mubr.f32.mxu1 %v11515_v2  ;;  %v7341_v50 = vld [vmem:[%s12167_s4 + $0x1c8] sm:$0xff] }
 0x36f   : > { %9433 = vmatprep.subr.bf16.mxu1 %v9432_v27  ;;  %v9444_v28 = vpack.c.bf16 %v7341_v50, %v7340_v7  ;;  %v11563_v7 = vld [vmem:[#allocation2 + $0xa9] sm:$0xff]  ;;  %v11566_v50 = vld [vmem:[#allocation2 + $0xb1] sm:$0xff] }
 0x371   : > { %8808 = vmatmul.mubr.f32.gmra.mrb[28].mxu1 %v11518_v35 }
 0x372   : > { %8810 = vmatprep.mubr.f32.mxu1 %v11527_v4  ;;  %9435 = vmatpush3.bf16.msra.mxu1 %v9432_v27  ;;  %v7343_v27 = vld [vmem:[%s12167_s4 + $0x1d8] sm:$0xff] }
 0x373   : > { %9437 = vmatprep.subr.bf16.mxu1 %v9436_v5  ;;  %v9448_v32 = vpack.c.bf16 %v7343_v27, %v7342_v61  ;;  %v7346_v61 = vld [vmem:[%s12167_s4 + $0x1f0] sm:$0xff]  ;;  %v7347_v27 = vld [vmem:[%s12167_s4 + $0x1f8] sm:$0xff] }
 0x375   : > { %8811 = vmatmul.mubr.f32.gmra.mrb[30].mxu1 %v11530_v48 }
 0x376   : > { %8813 = vmatprep.mubr.f32.mxu1 %v11539_v56  ;;  %9439 = vmatpush3.bf16.msra.mxu1 %v9436_v5  ;;  %v11554_v5 = vld [vmem:[#allocation2 + $0x91] sm:$0xff] }
 0x377   : > { %9441 = vmatprep.subr.bf16.mxu1 %v9440_v45 }
 0x379   : > { %8814 = vmatmul.mubr.f32.gmra.mrb[0].mxu1 %v11542_v60 }
 0x37a   : > { %8816 = vmatprep.mubr.f32.mxu1 %v11551_v30  ;;  %9443 = vmatpush3.bf16.msra.mxu1 %v9440_v45  ;;  %v9452_v45 = vpack.c.bf16 %v7345_v31, %v7344_v37  ;;  %v11578_v37 = vld [vmem:[#allocation2 + $0xd1] sm:$0xff]  ;;  %v7348_v31 = vld [vmem:[%s12167_s4 + $0x200] sm:$0xff] }
 0x37b   : > { %9445 = vmatprep.subr.bf16.mxu1 %v9444_v28  ;;  %12345 = vst [vmem:[#allocation18_spill] sm:$0xff] %v11578_v37 }
 0x37d   : > { %8817 = vmatmul.mubr.f32.gmra.mrb[2].mxu1 %v11554_v5 }
 0x37e   : > { %8819 = vmatprep.mubr.f32.mxu1 %v11563_v7  ;;  %9447 = vmatpush3.bf16.msra.mxu1 %v9444_v28  ;;  %v9456_v28 = vpack.c.bf16 %v7347_v27, %v7346_v61  ;;  %v11590_v61 = vld [vmem:[#allocation2 + $0xf1] sm:$0xff]  ;;  %v11593_v27 = vld [vmem:[#allocation2 + $0x109] sm:$0xff] }
 0x37f   : > { %9449 = vmatprep.subr.bf16.mxu1 %v9448_v32  ;;  %12346 = vst [vmem:[#allocation28_spill] sm:$0xff] %v11593_v27 }
 0x381   : > { %8820 = vmatmul.mubr.f32.gmra.mrb[4].mxu1 %v11566_v50 }
 0x382   : > { %8822 = vmatprep.mubr.f32.mxu1 %v11575_v22  ;;  %9451 = vmatpush3.bf16.msra.mxu1 %v9448_v32  ;;  %v9460_v32 = vpack.c.bf16 %v7349_v23, %v7348_v31  ;;  %v11605_v23 = vld [vmem:[#allocation2 + $0x149] sm:$0xff]  ;;  %v11608_v31 = vld [vmem:[#allocation2 + $0x151] sm:$0xff] }
 0x383   : > { %9453 = vmatprep.subr.bf16.mxu1 %v9452_v45  ;;  %12350 = vst [vmem:[#allocation35_spill] sm:$0xff] %v11605_v23  ;;  %12351 = vst [vmem:[#allocation3_spill] sm:$0xff] %v11608_v31 }
 0x385   : > { %8823 = vmatmul.mubr.f32.gmra.mrb[6].mxu1 %v11578_v37  ;;  %v11599_v37 = vld [vmem:[#allocation2 + $0x129] sm:$0xff] }
 0x386   : > { %8825 = vmatprep.mubr.f32.mxu1 %v11587_v44  ;;  %9455 = vmatpush3.bf16.msra.mxu1 %v9452_v45  ;;  %12348 = vst [vmem:[#allocation31_spill] sm:$0xff] %v11599_v37  ;;  %v11602_v45 = vld [vmem:[#allocation2 + $0x131] sm:$0xff] }
 0x387   : > { %9457 = vmatprep.subr.bf16.mxu1 %v9456_v28  ;;  %12349 = vst [vmem:[#allocation33_spill] sm:$0xff] %v11602_v45 }
 0x389   : > { %8826 = vmatmul.mubr.f32.gmra.mrb[8].mxu1 %v11590_v61 }
 0x38a   : > { %8828 = vmatprep.mubr.f32.mxu1 %v11593_v27  ;;  %9459 = vmatpush3.bf16.msra.mxu1 %v9456_v28  ;;  %v11611_v28 = vld [vmem:[#allocation2 + $0x169] sm:$0xff] }
 0x38b   : > { %9461 = vmatprep.subr.bf16.mxu1 %v9460_v32  ;;  %12352 = vst [vmem:[#allocation4_spill] sm:$0xff] %v11611_v28 }
 0x38d   : > { %8829 = vmatmul.mubr.f32.gmra.mrb[10].mxu1 %v11596_v42  ;;  %v11614_v42 = vld [vmem:[#allocation2 + $0x171] sm:$0xff] }
 0x38e   : > { %8831 = vmatprep.mubr.f32.mxu1 %v11599_v37  ;;  %12353 = vst [vmem:[#allocation5_spill] sm:$0xff] %v11614_v42  ;;  %v11617_v37 = vld [vmem:[#allocation2 + $0x189] sm:$0xff] }
 0x38f   : > { %12354 = vst [vmem:[#allocation6_spill] sm:$0xff] %v11617_v37 }
 0x391   : > { %8832 = vmatmul.mubr.f32.gmra.mrb[12].mxu1 %v11602_v45  ;;  %v11620_v45 = vld [vmem:[#allocation2 + $0x191] sm:$0xff] }
 0x392   : > { %8834 = vmatprep.mubr.f32.mxu1 %v11605_v23  ;;  %12355 = vst [vmem:[#allocation7_spill] sm:$0xff] %v11620_v45  ;;  %v11623_v23 = vld [vmem:[#allocation2 + $0x1a9] sm:$0xff] }
 0x393   : > { %12356 = vst [vmem:[#allocation8_spill] sm:$0xff] %v11623_v23 }
 0x395   : > { %8835 = vmatmul.mubr.f32.gmra.mrb[14].mxu1 %v11608_v31  ;;  %v11626_v31 = vld [vmem:[#allocation2 + $0x1b1] sm:$0xff] }
 0x396   : > { %8837 = vmatprep.mubr.f32.mxu1 %v11611_v28  ;;  %12357 = vst [vmem:[#allocation9_spill] sm:$0xff] %v11626_v31  ;;  %v11629_v28 = vld [vmem:[#allocation2 + $0x1c9] sm:$0xff] }
 0x397   : > { %12358 = vst [vmem:[#allocation10_spill] sm:$0xff] %v11629_v28 }
 0x399   : > { %8838 = vmatmul.mubr.f32.gmra.mrb[16].mxu1 %v11614_v42  ;;  %v11632_v42 = vld [vmem:[#allocation2 + $0x1d1] sm:$0xff] }
 0x39a   : > { %8840 = vmatprep.mubr.f32.mxu1 %v11617_v37  ;;  %12359 = vst [vmem:[#allocation37_spill] sm:$0xff] %v11632_v42  ;;  %v11635_v37 = vld [vmem:[#allocation2 + $0x1e9] sm:$0xff] }
 0x39b   : > { %12360 = vst [vmem:[#allocation38_spill] sm:$0xff] %v11635_v37 }
 0x39d   : > { %8841 = vmatmul.mubr.f32.gmra.mrb[18].mxu1 %v11620_v45  ;;  %v11638_v45 = vld [vmem:[#allocation2 + $0x1f1] sm:$0xff] }
 0x39e   : > { %8843 = vmatprep.mubr.f32.mxu1 %v11623_v23  ;;  %v7350_v23 = vld [vmem:[%s12167_s4 + $0x210] sm:$0xff] }
 0x3a1   : > { %8844 = vmatmul.mubr.f32.gmra.mrb[20].mxu1 %v11626_v31  ;;  %v7351_v31 = vld [vmem:[%s12167_s4 + $0x218] sm:$0xff] }
 0x3a2   : > { %8846 = vmatprep.mubr.f32.mxu1 %v11629_v28  ;;  %v9464_v28 = vpack.c.bf16 %v7351_v31, %v7350_v23  ;;  %v7355_v23 = vld [vmem:[%s12167_s4 + $0x238] sm:$0xff] }
 0x3a5   : > { %8847 = vmatmul.mubr.f32.gmra.mrb[22].mxu1 %v11632_v42  ;;  %v7352_v42 = vld [vmem:[%s12167_s4 + $0x220] sm:$0xff] }
 0x3a6   : > { %8849 = vmatprep.mubr.f32.mxu1 %v11635_v37  ;;  %v7353_v37 = vld [vmem:[%s12167_s4 + $0x228] sm:$0xff] }
 0x3a7   : > { %v9468_v27 = vpack.c.bf16 %v7353_v37, %v7352_v42  ;;  %v7357_v42 = vld [vmem:[%s12167_s4 + $0x248] sm:$0xff]  ;;  %v7359_v37 = vld [vmem:[%s12167_s4 + $0x258] sm:$0xff] }
 0x3a9   : > { %8850 = vmatmul.mubr.f32.gmra.mrb[24].mxu1 %v11638_v45 }
 0x3aa   : > { %8884 = vmatprep.mubr.f32.mxu1 %v11372_v53  ;;  %v7354_v53 = vld [vmem:[%s12167_s4 + $0x230] sm:$0xff] }
 0x3ad   : > { %8885 = vmatmul.mubr.f32.vlgmr.msra.gmra.mrb[26].mxu1 %v11376_v55  ;;  %v9472_v55 = vpack.c.bf16 %v7355_v23, %v7354_v53 }
 0x3ae   : > { %9463 = vmatpush3.bf16.msra.mxu1 %v9460_v32  ;;  %8887 = vmatprep.mubr.f32.mxu1 %v11385_v58  ;;  %v7356_v58 = vld [vmem:[%s12167_s4 + $0x240] sm:$0xff]  ;;  %v7361_v32 = vld [vmem:[%s12167_s4 + $0x268] sm:$0xff] }
 0x3af   : > { %9465 = vmatprep.subr.bf16.mxu1 %v9464_v28 }
 0x3b1   : > { %8888 = vmatmul.mubr.f32.gmra.mrb[28].mxu1 %v11388_v59  ;;  %v9476_v59 = vpack.c.bf16 %v7357_v42, %v7356_v58  ;;  %v7373_v58 = vld [vmem:[%s12167_s4 + $0x2c8] sm:$0xff] }
 0x3b2   : > { %8890 = vmatprep.mubr.f32.mxu1 %v11397_v63  ;;  %9467 = vmatpush3.bf16.msra.mxu1 %v9464_v28  ;;  %v7358_v63 = vld [vmem:[%s12167_s4 + $0x250] sm:$0xff]  ;;  %v7365_v28 = vld [vmem:[%s12167_s4 + $0x288] sm:$0xff] }
 0x3b3   : > { %9469 = vmatprep.subr.bf16.mxu1 %v9468_v27  ;;  %v11769_v42 = vld [vmem:[#allocation2 + $0x88] sm:$0xff] }
 0x3b5   : > { %8891 = vmatmul.mubr.f32.gmra.mrb[30].mxu1 %v11400_v29  ;;  %v9480_v29 = vpack.c.bf16 %v7359_v37, %v7358_v63  ;;  %v11772_v63 = vld [vmem:[#allocation2 + $0x90] sm:$0xff] }
 0x3b6   : > { %8893 = vmatprep.mubr.f32.mxu1 %v11409_v1  ;;  %9471 = vmatpush3.bf16.msra.mxu1 %v9468_v27  ;;  %v7360_v1 = vld [vmem:[%s12167_s4 + $0x260] sm:$0xff]  ;;  %v7363_v27 = vld [vmem:[%s12167_s4 + $0x278] sm:$0xff]  ;;  %v7374_v37 = vld [vmem:[%s12167_s4 + $0x2d0] sm:$0xff] }
 0x3b7   : > { %9473 = vmatprep.subr.bf16.mxu1 %v9472_v55 }
 0x3b9   : > { %8894 = vmatmul.mubr.f32.gmra.mrb[0].mxu1 %v11412_v36  ;;  %v9484_v36 = vpack.c.bf16 %v7361_v32, %v7360_v1  ;;  %v11781_v1 = vld [vmem:[#allocation2 + $0xa8] sm:$0xff] }
 0x3ba   : > { %8896 = vmatprep.mubr.f32.mxu1 %v11421_v38  ;;  %9475 = vmatpush3.bf16.msra.mxu1 %v9472_v55  ;;  %v7362_v38 = vld [vmem:[%s12167_s4 + $0x270] sm:$0xff]  ;;  %v7372_v55 = vld [vmem:[%s12167_s4 + $0x2c0] sm:$0xff] }
 0x3bb   : > { %9477 = vmatprep.subr.bf16.mxu1 %v9476_v59 }
 0x3bd   : > { %8897 = vmatmul.mubr.f32.gmra.mrb[2].mxu1 %v11424_v6  ;;  %v9488_v6 = vpack.c.bf16 %v7363_v27, %v7362_v38  ;;  %v7376_v38 = vld [vmem:[%s12167_s4 + $0x2e0] sm:$0xff]  ;;  %v7377_v27 = vld [vmem:[%s12167_s4 + $0x2e8] sm:$0xff] }
 0x3be   : > { %8899 = vmatprep.mubr.f32.mxu1 %v11433_v41  ;;  %9479 = vmatpush3.bf16.msra.mxu1 %v9476_v59  ;;  %v7364_v41 = vld [vmem:[%s12167_s4 + $0x280] sm:$0xff]  ;;  %v9508_v59 = vpack.c.bf16 %v7373_v58, %v7372_v55  ;;  %v11830_v55 = vld [vmem:[#allocation2 + $0x150] sm:$0xff]  ;;  %v12363_v58 = vld [vmem:[#allocation18_spill] sm:$0xff] }
 0x3bf   : > { %9481 = vmatprep.subr.bf16.mxu1 %v9480_v29 }
 0x3c1   : > { %8900 = vmatmul.mubr.f32.gmra.mrb[4].mxu1 %v11440_v47  ;;  %v9492_v47 = vpack.c.bf16 %v7365_v28, %v7364_v41  ;;  %v9516_v41 = vpack.c.bf16 %v7377_v27, %v7376_v38  ;;  %v11796_v28 = vld [vmem:[#allocation2 + $0xd0] sm:$0xff]  ;;  %v12368_v27 = vld [vmem:[#allocation35_spill] sm:$0xff] }
 0x3c2   : > { %8902 = vmatprep.mubr.f32.mxu1 %v11449_v49  ;;  %9483 = vmatpush3.bf16.msra.mxu1 %v9480_v29  ;;  %v7375_v29 = vld [vmem:[%s12167_s4 + $0x2d8] sm:$0xff]  ;;  %v12367_v38 = vld [vmem:[#allocation33_spill] sm:$0xff] }
 0x3c3   : > { %9485 = vmatprep.subr.bf16.mxu1 %v9484_v36  ;;  %v9512_v32 = vpack.c.bf16 %v7375_v29, %v7374_v37  ;;  %v12364_v37 = vld [vmem:[#allocation28_spill] sm:$0xff] }
 0x3c4   : > { %v11696_v31 = vpop.f32.mrb[34].mxu0 }
 0x3c5   : > { %v11704_v53 = vpop.f32.mrb[35].mxu0  ;;  %8903 = vmatmul.mubr.f32.gmra.mrb[6].mxu1 %v11452_v9  ;;  %v11727_v9 = vld [vmem:[#allocation2 + $0x207] sm:$0xff] }
 0x3c6   : > { %8905 = vmatprep.mubr.f32.mxu1 %v11455_v51  ;;  %9487 = vmatpush3.bf16.msra.mxu1 %v9484_v36  ;;  %v11730_v51 = vld [vmem:[#allocation2 + $0x20f] sm:$0xff] }
 0x3c7   : > { %9489 = vmatprep.subr.bf16.mxu1 %v9488_v6  ;;  %v11784_v36 = vld [vmem:[#allocation2 + $0xb0] sm:$0xff] }
 0x3c8   : > { %v11708_v49 = vpop.f32.mrb[36].mxu0 }
 0x3c9   : > { %v11710_v23 = vpop.f32.mrb[37].mxu0  ;;  %8906 = vmatmul.mubr.f32.gmra.mrb[8].mxu1 %v11458_v52  ;;  %v7366_v52 = vld [vmem:[%s12167_s4 + $0x290] sm:$0xff] }
 0x3ca   : > { %8908 = vmatprep.mubr.f32.mxu1 %v11461_v11  ;;  %9491 = vmatpush3.bf16.msra.mxu1 %v9488_v6  ;;  %v7367_v11 = vld [vmem:[%s12167_s4 + $0x298] sm:$0xff]  ;;  %v11793_v6 = vld [vmem:[#allocation2 + $0xc8] sm:$0xff] }
 0x3cb   : > { %9493 = vmatprep.subr.bf16.mxu1 %v9492_v47 }
 0x3cd   : > { %8909 = vmatmul.mubr.f32.gmra.mrb[10].mxu1 %v11464_v12  ;;  %v5074_v12 = vld [vmem:[#allocation2 + $0x28] sm:$0xff] }
 0x3ce   : > { %8911 = vmatprep.mubr.f32.mxu1 %v11467_v14  ;;  %v9496_v14 = vpack.c.bf16 %v7367_v11, %v7366_v52  ;;  %v7379_v52 = vld [vmem:[%s12167_s4 + $0x2f8] sm:$0xff]  ;;  %v11805_v11 = vld [vmem:[#allocation2 + $0xe8] sm:$0xff] }
 0x3d1   : > { %8912 = vmatmul.mubr.f32.gmra.mrb[12].mxu1 %v11470_v15  ;;  %v5075_v15 = vld [vmem:[#allocation2 + $0x30] sm:$0xff] }
 0x3d2   : > { %8914 = vmatprep.mubr.f32.mxu1 %v11473_v17  ;;  %v7368_v17 = vld [vmem:[%s12167_s4 + $0x2a0] sm:$0xff] }
 0x3d5   : > { %8915 = vmatmul.mubr.f32.gmra.mrb[14].mxu1 %v11476_v19  ;;  %v7369_v19 = vld [vmem:[%s12167_s4 + $0x2a8] sm:$0xff] }
 0x3d6   : > { %8917 = vmatprep.mubr.f32.mxu1 %v11479_v21  ;;  %v11745_v21 = vld [vmem:[#allocation2 + $0x48] sm:$0xff] }
 0x3d9   : > { %8918 = vmatmul.mubr.f32.gmra.mrb[16].mxu1 %v11482_v39  ;;  %v9500_v39 = vpack.c.bf16 %v7369_v19, %v7368_v17  ;;  %v7381_v17 = vld [vmem:[%s12167_s4 + $0x308] sm:$0xff] }
 0x3da   : > { %8920 = vmatprep.mubr.f32.mxu1 %v11485_v24  ;;  %v11748_v24 = vld [vmem:[#allocation2 + $0x50] sm:$0xff]  ;;  %v11817_v19 = vld [vmem:[#allocation2 + $0x108] sm:$0xff] }
 0x3dd   : > { %8921 = vmatmul.mubr.f32.gmra.mrb[18].mxu1 %v11488_v40  ;;  %v7370_v40 = vld [vmem:[%s12167_s4 + $0x2b0] sm:$0xff] }
 0x3de   : > { %8923 = vmatprep.mubr.f32.mxu1 %v11491_v25  ;;  %v7371_v25 = vld [vmem:[%s12167_s4 + $0x2b8] sm:$0xff] }
 0x3e1   : > { %8924 = vmatmul.mubr.f32.gmra.mrb[20].mxu1 %v11494_v26  ;;  %v11757_v26 = vld [vmem:[#allocation2 + $0x68] sm:$0xff] }
 0x3e2   : > { %8926 = vmatprep.mubr.f32.mxu1 %v11497_v54  ;;  %v9504_v54 = vpack.c.bf16 %v7371_v25, %v7370_v40  ;;  %v11820_v40 = vld [vmem:[#allocation2 + $0x110] sm:$0xff]  ;;  %v11823_v25 = vld [vmem:[#allocation2 + $0x128] sm:$0xff] }
 0x3e5   : > { %8927 = vmatmul.mubr.f32.gmra.mrb[22].mxu1 %v11500_v57  ;;  %v11760_v57 = vld [vmem:[#allocation2 + $0x70] sm:$0xff] }
 0x3e6   : > { %8929 = vmatprep.mubr.f32.mxu1 %v11727_v9 }
 0x3e9   : > { %8930 = vmatmul.mubr.f32.gmra.mrb[24].mxu1 %v11730_v51 }
 0x3ea   : > { %8964 = vmatprep.mubr.f32.mxu1 %v5074_v12 }
 0x3ed   : > { %8965 = vmatmul.mubr.f32.vlgmr.msra.gmra.mrb[26].mxu1 %v5075_v15  ;;  %v7380_v15 = vld [vmem:[%s12167_s4 + $0x300] sm:$0xff] }
 0x3ee   : > { %9495 = vmatpush3.bf16.msra.mxu1 %v9492_v47  ;;  %8967 = vmatprep.mubr.f32.mxu1 %v11745_v21  ;;  %v7378_v47 = vld [vmem:[%s12167_s4 + $0x2f0] sm:$0xff] }
 0x3ef   : > { %9497 = vmatprep.subr.bf16.mxu1 %v9496_v14  ;;  %v9520_v12 = vpack.c.bf16 %v7379_v52, %v7378_v47  ;;  %v12370_v47 = vld [vmem:[#allocation4_spill] sm:$0xff]  ;;  %v12372_v52 = vld [vmem:[#allocation6_spill] sm:$0xff] }
 0x3f1   : > { %8968 = vmatmul.mubr.f32.gmra.mrb[28].mxu1 %v11748_v24 }
 0x3f2   : > { %8970 = vmatprep.mubr.f32.mxu1 %v11757_v26  ;;  %9499 = vmatpush3.bf16.msra.mxu1 %v9496_v14  ;;  %v11808_v14 = vld [vmem:[#allocation2 + $0xf0] sm:$0xff] }
 0x3f3   : > { %9501 = vmatprep.subr.bf16.mxu1 %v9500_v39 }
 0x3f5   : > { %8971 = vmatmul.mubr.f32.gmra.mrb[30].mxu1 %v11760_v57 }
 0x3f6   : > { %8973 = vmatprep.mubr.f32.mxu1 %v11769_v42  ;;  %9503 = vmatpush3.bf16.msra.mxu1 %v9500_v39  ;;  %v9524_v39 = vpack.c.bf16 %v7381_v17, %v7380_v15  ;;  %v12374_v15 = vld [vmem:[#allocation8_spill] sm:$0xff]  ;;  %v12375_v17 = vld [vmem:[#allocation9_spill] sm:$0xff] }
 0x3f7   : > { %9505 = vmatprep.subr.bf16.mxu1 %v9504_v54 }
 0x3f9   : > { %8974 = vmatmul.mubr.f32.gmra.mrb[0].mxu1 %v11772_v63 }
 0x3fa   : > { %8976 = vmatprep.mubr.f32.mxu1 %v11781_v1  ;;  %9507 = vmatpush3.bf16.msra.mxu1 %v9504_v54  ;;  %v11826_v54 = vld [vmem:[#allocation2 + $0x130] sm:$0xff] }
 0x3fb   : > { %9509 = vmatprep.subr.bf16.mxu1 %v9508_v59 }
 0x3fd   : > { %8977 = vmatmul.mubr.f32.gmra.mrb[2].mxu1 %v11784_v36 }
 0x3fe   : > { %8979 = vmatprep.mubr.f32.mxu1 %v11793_v6  ;;  %9511 = vmatpush3.bf16.msra.mxu1 %v9508_v59  ;;  %v7397_v59 = vld [vmem:[%s12167_s4 + $0x388] sm:$0xff] }
 0x3ff   : > { %9513 = vmatprep.subr.bf16.mxu1 %v9512_v32 }
 0x401   : > { %8980 = vmatmul.mubr.f32.gmra.mrb[4].mxu1 %v11796_v28 }
 0x402   : > { %8982 = vmatprep.mubr.f32.mxu1 %v11805_v11  ;;  %9515 = vmatpush3.bf16.msra.mxu1 %v9512_v32  ;;  %v12365_v32 = vld [vmem:[#allocation30_spill] sm:$0xff] }
 0x403   : > { %9517 = vmatprep.subr.bf16.mxu1 %v9516_v41 }
 0x405   : > { %8983 = vmatmul.mubr.f32.gmra.mrb[6].mxu1 %v11808_v14 }
 0x406   : > { %8985 = vmatprep.mubr.f32.mxu1 %v11817_v19  ;;  %9519 = vmatpush3.bf16.msra.mxu1 %v9516_v41  ;;  %v12369_v41 = vld [vmem:[#allocation3_spill] sm:$0xff] }
 0x407   : > { %9521 = vmatprep.subr.bf16.mxu1 %v9520_v12 }
 0x409   : > { %8986 = vmatmul.mubr.f32.gmra.mrb[8].mxu1 %v11820_v40 }
 0x40a   : > { %8988 = vmatprep.mubr.f32.mxu1 %v11823_v25  ;;  %9523 = vmatpush3.bf16.msra.mxu1 %v9520_v12  ;;  %v12373_v12 = vld [vmem:[#allocation7_spill] sm:$0xff] }
 0x40b   : > { %9525 = vmatprep.subr.bf16.mxu1 %v9524_v39 }
 0x40d   : > { %8989 = vmatmul.mubr.f32.gmra.mrb[10].mxu1 %v11826_v54 }
 0x40e   : > { %8991 = vmatprep.mubr.f32.mxu1 %v11280_v62  ;;  %v12361_v62 = vmax.f32 %v11350_v20, 0.0  ;;  %v7389_v20 = vld [vmem:[%s12167_s4 + $0x348] sm:$0xff] }
 0x411   : > { %8992 = vmatmul.mubr.f32.gmra.mrb[12].mxu1 %v11830_v55 }
 0x412   : > { %8994 = vmatprep.mubr.f32.mxu1 %v11292_v3  ;;  %v7383_v3 = vld [vmem:[%s12167_s4 + $0x318] sm:$0xff] }
 0x415   : > { %8995 = vmatmul.mubr.f32.gmra.mrb[14].mxu1 %v11289_v0  ;;  %v7382_v0 = vld [vmem:[%s12167_s4 + $0x310] sm:$0xff] }
 0x416   : > { %8997 = vmatprep.mubr.f32.mxu1 %v11305_v33  ;;  %v9528_v33 = vpack.c.bf16 %v7383_v3, %v7382_v0  ;;  %v12378_v0 = vld [vmem:[#allocation38_spill] sm:$0xff]  ;;  %v11925_v3 = vld [vmem:[#allocation2 + $0x209] sm:$0xff] }
 0x419   : > { %8998 = vmatmul.mubr.f32.gmra.mrb[16].mxu1 %v11301_v34  ;;  %v12362_v34 = vmax.f32 %v11346_v18, 0.0  ;;  %v7388_v18 = vld [vmem:[%s12167_s4 + $0x340] sm:$0xff] }
 0x41a   : > { %9000 = vmatprep.mubr.f32.mxu1 %v11317_v46  ;;  %v7385_v46 = vld [vmem:[%s12167_s4 + $0x328] sm:$0xff] }
 0x41d   : > { %9001 = vmatmul.mubr.f32.gmra.mrb[18].mxu1 %v11313_v43  ;;  %v7384_v43 = vld [vmem:[%s12167_s4 + $0x320] sm:$0xff] }
 0x41e   : > { %9003 = vmatprep.mubr.f32.mxu1 %v11329_v10  ;;  %v7386_v10 = vld [vmem:[%s12167_s4 + $0x330] sm:$0xff] }
 0x421   : > { %9004 = vmatmul.mubr.f32.gmra.mrb[20].mxu1 %v11325_v8  ;;  %v9532_v8 = vpack.c.bf16 %v7385_v46, %v7384_v43  ;;  %v7399_v43 = vld [vmem:[%s12167_s4 + $0x398] sm:$0xff]  ;;  %v5687_v46 = vld [vmem:[#allocation2 + $0x47] sm:$0xff] }
 0x422   : > { %9006 = vmatprep.mubr.f32.mxu1 %v11341_v16 }
 0x425   : > { %9007 = vmatmul.mubr.f32.gmra.mrb[22].mxu1 %v11337_v13  ;;  %v7387_v13 = vld [vmem:[%s12167_s4 + $0x338] sm:$0xff] }
 0x426   : > { %9009 = vmatprep.mubr.f32.mxu1 %v12361_v62  ;;  %v9536_v16 = vpack.c.bf16 %v7387_v13, %v7386_v10  ;;  %v12377_v62 = vld [vmem:[#allocation37_spill] sm:$0xff]  ;;  %v7400_v10 = vld [vmem:[%s12167_s4 + $0x3a0] sm:$0xff]  ;;  %v7401_v13 = vld [vmem:[%s12167_s4 + $0x3a8] sm:$0xff] }
 0x429   : > { %9010 = vmatmul.mubr.f32.gmra.mrb[24].mxu1 %v12362_v34  ;;  %v11928_v34 = vld [vmem:[#allocation2 + $0x211] sm:$0xff] }
 0x42a   : > { %9044 = vmatprep.mubr.f32.mxu1 %v11515_v2  ;;  %v9540_v2 = vpack.c.bf16 %v7389_v20, %v7388_v18  ;;  %v9564_v18 = vpack.c.bf16 %v7401_v13, %v7400_v10  ;;  %v5690_v20 = vld [vmem:[#allocation2 + $0x6f] sm:$0xff]  ;;  %v5707_v10 = vld [vmem:[#allocation2 + $0x187] sm:$0xff] }
 0x42b   : > { %v5708_v13 = vld [vmem:[#allocation2 + $0x18f] sm:$0xff] }
 0x42d   : > { %9045 = vmatmul.mubr.f32.vlgmr.msra.gmra.mrb[26].mxu1 %v11518_v35  ;;  %v7390_v35 = vld [vmem:[%s12167_s4 + $0x350] sm:$0xff] }
 0x42e   : > { %9527 = vmatpush3.bf16.msra.mxu1 %v9524_v39  ;;  %9047 = vmatprep.mubr.f32.mxu1 %v11527_v4  ;;  %v7391_v4 = vld [vmem:[%s12167_s4 + $0x358] sm:$0xff] }
 0x42f   : > { %9529 = vmatprep.subr.bf16.mxu1 %v9528_v33  ;;  %v12376_v39 = vld [vmem:[#allocation10_spill] sm:$0xff] }
 0x431   : > { %9048 = vmatmul.mubr.f32.gmra.mrb[28].mxu1 %v11530_v48  ;;  %v9544_v48 = vpack.c.bf16 %v7391_v4, %v7390_v35  ;;  %v7403_v35 = vld [vmem:[%s12167_s4 + $0x3b8] sm:$0xff]  ;;  %v5691_v4 = vld [vmem:[#allocation2 + $0x87] sm:$0xff] }
 0x432   : > { %9050 = vmatprep.mubr.f32.mxu1 %v11539_v56  ;;  %9531 = vmatpush3.bf16.msra.mxu1 %v9528_v33  ;;  %v7392_v56 = vld [vmem:[%s12167_s4 + $0x360] sm:$0xff]  ;;  %v7398_v33 = vld [vmem:[%s12167_s4 + $0x390] sm:$0xff] }
 0x433   : > { %9533 = vmatprep.subr.bf16.mxu1 %v9532_v8 }
 0x435   : > { %9051 = vmatmul.mubr.f32.gmra.mrb[30].mxu1 %v11542_v60  ;;  %v7393_v60 = vld [vmem:[%s12167_s4 + $0x368] sm:$0xff] }
 0x436   : > { %9053 = vmatprep.mubr.f32.mxu1 %v11551_v30  ;;  %9535 = vmatpush3.bf16.msra.mxu1 %v9532_v8  ;;  %v9548_v30 = vpack.c.bf16 %v7393_v60, %v7392_v56  ;;  %v9560_v8 = vpack.c.bf16 %v7399_v43, %v7398_v33  ;;  %v5692_v56 = vld [vmem:[#allocation2 + $0x8f] sm:$0xff]  ;;  %v7404_v60 = vld [vmem:[%s12167_s4 + $0x3c0] sm:$0xff] }
 0x437   : > { %9537 = vmatprep.subr.bf16.mxu1 %v9536_v16  ;;  %v5702_v33 = vld [vmem:[#allocation2 + $0x12f] sm:$0xff]  ;;  %v5703_v43 = vld [vmem:[#allocation2 + $0x147] sm:$0xff] }
 0x439   : > { %9054 = vmatmul.mubr.f32.gmra.mrb[0].mxu1 %v11554_v5  ;;  %v7394_v5 = vld [vmem:[%s12167_s4 + $0x370] sm:$0xff] }
 0x43a   : > { %9056 = vmatprep.mubr.f32.mxu1 %v11563_v7  ;;  %9539 = vmatpush3.bf16.msra.mxu1 %v9536_v16  ;;  %v7395_v7 = vld [vmem:[%s12167_s4 + $0x378] sm:$0xff]  ;;  %v5689_v16 = vld [vmem:[#allocation2 + $0x67] sm:$0xff] }
 0x43b   : > { %9541 = vmatprep.subr.bf16.mxu1 %v9540_v2 }
 0x43d   : > { %9057 = vmatmul.mubr.f32.gmra.mrb[2].mxu1 %v11566_v50  ;;  %v9552_v50 = vpack.c.bf16 %v7395_v7, %v7394_v5  ;;  %v5693_v5 = vld [vmem:[#allocation2 + $0xa7] sm:$0xff] }
 0x43e   : > { %9059 = vmatprep.mubr.f32.mxu1 %v11575_v22  ;;  %9543 = vmatpush3.bf16.msra.mxu1 %v9540_v2  ;;  %v7396_v22 = vld [vmem:[%s12167_s4 + $0x380] sm:$0xff]  ;;  %v7402_v2 = vld [vmem:[%s12167_s4 + $0x3b0] sm:$0xff] }
 0x43f   : > { %9545 = vmatprep.subr.bf16.mxu1 %v9544_v48  ;;  %v9556_v29 = vpack.c.bf16 %v7397_v59, %v7396_v22  ;;  %v7407_v22 = vld [vmem:[%s12167_s4 + $0x3d8] sm:$0xff]  ;;  %v5695_v59 = vld [vmem:[#allocation2 + $0xc7] sm:$0xff] }
 0x441   : > { %9060 = vmatmul.mubr.f32.gmra.mrb[4].mxu1 %v12363_v58  ;;  %v5694_v58 = vld [vmem:[#allocation2 + $0xaf] sm:$0xff] }
 0x442   : > { %9062 = vmatprep.mubr.f32.mxu1 %v11587_v44  ;;  %9547 = vmatpush3.bf16.msra.mxu1 %v9544_v48  ;;  %v12366_v44 = vld [vmem:[#allocation31_spill] sm:$0xff]  ;;  %v9568_v48 = vpack.c.bf16 %v7403_v35, %v7402_v2  ;;  %v5712_v2 = vld [vmem:[#allocation2 + $0x1cf] sm:$0xff] }
 0x443   : > { %9549 = vmatprep.subr.bf16.mxu1 %v9548_v30  ;;  %v5713_v35 = vld [vmem:[#allocation2 + $0x1e7] sm:$0xff] }
 0x445   : > { %9063 = vmatmul.mubr.f32.gmra.mrb[6].mxu1 %v11590_v61  ;;  %v12371_v61 = vld [vmem:[#allocation5_spill] sm:$0xff] }
 0x446   : > { %9065 = vmatprep.mubr.f32.mxu1 %v12364_v37  ;;  %9551 = vmatpush3.bf16.msra.mxu1 %v9548_v30  ;;  %v7405_v30 = vld [vmem:[%s12167_s4 + $0x3c8] sm:$0xff] }
 0x447   : > { %9553 = vmatprep.subr.bf16.mxu1 %v9552_v50  ;;  %v9572_v7 = vpack.c.bf16 %v7405_v30, %v7404_v60  ;;  %v7414_v60 = vld [vmem:[%s12167_s4 + $0x410] sm:$0xff]  ;;  %v7415_v30 = vld [vmem:[%s12167_s4 + $0x418] sm:$0xff] }
 0x449   : > { %9066 = vmatmul.mubr.f32.gmra.mrb[8].mxu1 %v12365_v32  ;;  %v7408_v32 = vld [vmem:[%s12167_s4 + $0x3e0] sm:$0xff] }
 0x44a   : > { %9068 = vmatprep.mubr.f32.mxu1 %v12366_v44  ;;  %9555 = vmatpush3.bf16.msra.mxu1 %v9552_v50  ;;  %v7406_v50 = vld [vmem:[%s12167_s4 + $0x3d0] sm:$0xff]  ;;  %v7409_v44 = vld [vmem:[%s12167_s4 + $0x3e8] sm:$0xff] }
 0x44b   : > { %9557 = vmatprep.subr.bf16.mxu1 %v9556_v29  ;;  %v9576_v37 = vpack.c.bf16 %v7407_v22, %v7406_v50  ;;  %v7421_v50 = vld [vmem:[%s12167_s4 + $0x448] sm:$0xff]  ;;  %v7423_v22 = vld [vmem:[%s12167_s4 + $0x458] sm:$0xff] }
 0x44d   : > { %9069 = vmatmul.mubr.f32.gmra.mrb[10].mxu1 %v12367_v38  ;;  %v5697_v38 = vld [vmem:[#allocation2 + $0xe7] sm:$0xff] }
 0x44e   : > { %9071 = vmatprep.mubr.f32.mxu1 %v12368_v27  ;;  %v9580_v27 = vpack.c.bf16 %v7409_v44, %v7408_v32  ;;  %v6014_v32 = vld [vmem:[#allocation2 + $0x190] sm:$0xff]  ;;  %v6017_v44 = vld [vmem:[#allocation2 + $0x1c8] sm:$0xff] }
 0x451   : > { %9072 = vmatmul.mubr.f32.gmra.mrb[12].mxu1 %v12369_v41  ;;  %v5698_v41 = vld [vmem:[#allocation2 + $0xef] sm:$0xff] }
 0x452   : > { %9074 = vmatprep.mubr.f32.mxu1 %v12370_v47  ;;  %v7410_v47 = vld [vmem:[%s12167_s4 + $0x3f0] sm:$0xff] }
 0x455   : > { %9075 = vmatmul.mubr.f32.gmra.mrb[14].mxu1 %v12371_v61  ;;  %v7411_v61 = vld [vmem:[%s12167_s4 + $0x3f8] sm:$0xff] }
 0x456   : > { %9077 = vmatprep.mubr.f32.mxu1 %v12372_v52  ;;  %v5699_v52 = vld [vmem:[#allocation2 + $0x107] sm:$0xff] }
 0x459   : > { %9078 = vmatmul.mubr.f32.gmra.mrb[16].mxu1 %v12373_v12  ;;  %v9584_v12 = vpack.c.bf16 %v7411_v61, %v7410_v47  ;;  %v10158_v47 = vld [vmem:[#allocation2] sm:$0xff]  ;;  %v6299_v61 = vld [vmem:[#allocation2 + $0x49] sm:$0xff] }
 0x45a   : > { %9080 = vmatprep.mubr.f32.mxu1 %v12374_v15  ;;  %v5700_v15 = vld [vmem:[#allocation2 + $0x10f] sm:$0xff] }
 0x45d   : > { %9081 = vmatmul.mubr.f32.gmra.mrb[18].mxu1 %v12375_v17  ;;  %v7412_v17 = vld [vmem:[%s12167_s4 + $0x400] sm:$0xff] }
 0x45e   : > { %9083 = vmatprep.mubr.f32.mxu1 %v12376_v39  ;;  %v7413_v39 = vld [vmem:[%s12167_s4 + $0x408] sm:$0xff] }
 0x461   : > { %9084 = vmatmul.mubr.f32.gmra.mrb[20].mxu1 %v12377_v62  ;;  %v5701_v62 = vld [vmem:[#allocation2 + $0x127] sm:$0xff] }
 0x462   : > { %9086 = vmatprep.mubr.f32.mxu1 %v12378_v0  ;;  %v9588_v0 = vpack.c.bf16 %v7413_v39, %v7412_v17  ;;  %v6303_v17 = vld [vmem:[#allocation2 + $0x89] sm:$0xff]  ;;  %v6304_v39 = vld [vmem:[#allocation2 + $0x91] sm:$0xff] }
 0x465   : > { %9087 = vmatmul.mubr.f32.gmra.mrb[22].mxu1 %v11638_v45  ;;  %v5688_v45 = vld [vmem:[#allocation2 + $0x4f] sm:$0xff] }
 0x466   : > { %9089 = vmatprep.mubr.f32.mxu1 %v11925_v3 }
 0x469   : > { %9090 = vmatmul.mubr.f32.gmra.mrb[24].mxu1 %v11928_v34 }
 0x46a   : > { %9124 = vmatprep.mubr.f32.mxu1 %v5687_v46  ;;  %v5704_v46 = vld [vmem:[#allocation2 + $0x14f] sm:$0xff] }
 0x46d   : > { %9125 = vmatmul.mubr.f32.vlgmr.msra.gmra.mrb[26].mxu1 %v5688_v45  ;;  %v5706_v45 = vld [vmem:[#allocation2 + $0x16f] sm:$0xff] }
 0x46e   : > { %9559 = vmatpush3.bf16.msra.mxu1 %v9556_v29  ;;  %9127 = vmatprep.mubr.f32.mxu1 %v5689_v16  ;;  %v5696_v29 = vld [vmem:[#allocation2 + $0xcf] sm:$0xff]  ;;  %v5709_v16 = vld [vmem:[#allocation2 + $0x1a7] sm:$0xff] }
 0x46f   : > { %9561 = vmatprep.subr.bf16.mxu1 %v9560_v8 }
 0x471   : > { %9128 = vmatmul.mubr.f32.gmra.mrb[28].mxu1 %v5690_v20  ;;  %v5711_v20 = vld [vmem:[#allocation2 + $0x1c7] sm:$0xff] }
 0x472   : > { %9130 = vmatprep.mubr.f32.mxu1 %v5691_v4  ;;  %9563 = vmatpush3.bf16.msra.mxu1 %v9560_v8  ;;  %v5705_v8 = vld [vmem:[#allocation2 + $0x167] sm:$0xff]  ;;  %v5714_v4 = vld [vmem:[#allocation2 + $0x1ef] sm:$0xff] }
 0x473   : > { %9565 = vmatprep.subr.bf16.mxu1 %v9564_v18 }
 0x475   : > { %9131 = vmatmul.mubr.f32.gmra.mrb[30].mxu1 %v5692_v56  ;;  %v5718_v56 = vld [vmem:[#allocation2 + $0x22f] sm:$0xff] }
 0x476   : > { %9133 = vmatprep.mubr.f32.mxu1 %v5693_v5  ;;  %9567 = vmatpush3.bf16.msra.mxu1 %v9564_v18  ;;  %v5710_v18 = vld [vmem:[#allocation2 + $0x1af] sm:$0xff]  ;;  %v9592_v5 = vpack.c.bf16 %v7415_v30, %v7414_v60 }
 0x477   : > { %9569 = vmatprep.subr.bf16.mxu1 %v9568_v48  ;;  %v6322_v60 = vld [vmem:[#allocation2 + $0x1b1] sm:$0xff]  ;;  %v6323_v30 = vld [vmem:[#allocation2 + $0x1c9] sm:$0xff] }
 0x479   : > { %9134 = vmatmul.mubr.f32.gmra.mrb[0].mxu1 %v5694_v58  ;;  %v7419_v58 = vld [vmem:[%s12167_s4 + $0x438] sm:$0xff] }
 0x47a   : > { %9136 = vmatprep.mubr.f32.mxu1 %v5695_v59  ;;  %9571 = vmatpush3.bf16.msra.mxu1 %v9568_v48  ;;  %v5717_v48 = vld [vmem:[#allocation2 + $0x227] sm:$0xff] }
 0x47b   : > { %9573 = vmatprep.subr.bf16.mxu1 %v9572_v7  ;;  %v7425_v59 = vld [vmem:[%s12167_s4 + $0x468] sm:$0xff] }
 0x47d   : > { %9137 = vmatmul.mubr.f32.gmra.mrb[2].mxu1 %v5696_v29  ;;  %v6011_v29 = vld [vmem:[#allocation2 + $0x168] sm:$0xff] }
 0x47e   : > { %9139 = vmatprep.mubr.f32.mxu1 %v5697_v38  ;;  %9575 = vmatpush3.bf16.msra.mxu1 %v9572_v7  ;;  %v6019_v38 = vld [vmem:[#allocation2 + $0x1e8] sm:$0xff] }
 0x47f   : > { %9577 = vmatprep.subr.bf16.mxu1 %v9576_v37 }
 0x481   : > { %9140 = vmatmul.mubr.f32.gmra.mrb[4].mxu1 %v5698_v41  ;;  %v6022_v41 = vld [vmem:[#allocation2 + $0x210] sm:$0xff] }
 0x482   : > { %9142 = vmatprep.mubr.f32.mxu1 %v5699_v52  ;;  %9579 = vmatpush3.bf16.msra.mxu1 %v9576_v37  ;;  %v7427_v37 = vld [vmem:[%s12167_s4 + $0x478] sm:$0xff] }
 0x483   : > { %9581 = vmatprep.subr.bf16.mxu1 %v9580_v27  ;;  %v6300_v52 = vld [vmem:[#allocation2 + $0x51] sm:$0xff] }
 0x485   : > { %9143 = vmatmul.mubr.f32.gmra.mrb[6].mxu1 %v5700_v15  ;;  %v6302_v15 = vld [vmem:[#allocation2 + $0x71] sm:$0xff] }
 0x486   : > { %9145 = vmatprep.mubr.f32.mxu1 %v5701_v62  ;;  %9583 = vmatpush3.bf16.msra.mxu1 %v9580_v27  ;;  %v6020_v27 = vld [vmem:[#allocation2 + $0x1f0] sm:$0xff] }
 0x487   : > { %9585 = vmatprep.subr.bf16.mxu1 %v9584_v12  ;;  %v6305_v62 = vld [vmem:[#allocation2 + $0xa9] sm:$0xff] }
 0x489   : > { %9146 = vmatmul.mubr.f32.gmra.mrb[8].mxu1 %v5702_v33  ;;  %v6307_v33 = vld [vmem:[#allocation2 + $0xc9] sm:$0xff] }
 0x48a   : > { %9148 = vmatprep.mubr.f32.mxu1 %v5703_v43  ;;  %9587 = vmatpush3.bf16.msra.mxu1 %v9584_v12  ;;  %v6301_v12 = vld [vmem:[#allocation2 + $0x69] sm:$0xff]  ;;  %v6308_v43 = vld [vmem:[#allocation2 + $0xd1] sm:$0xff] }
 0x48b   : > { %9589 = vmatprep.subr.bf16.mxu1 %v9588_v0 }
 0x48d   : > { %9149 = vmatmul.mubr.f32.gmra.mrb[10].mxu1 %v5704_v46  ;;  %v6309_v46 = vld [vmem:[#allocation2 + $0xe9] sm:$0xff] }
 0x48e   : > { %9151 = vmatprep.mubr.f32.mxu1 %v5705_v8  ;;  %v6310_v8 = vld [vmem:[#allocation2 + $0xf1] sm:$0xff] }
 0x491   : > { %9152 = vmatmul.mubr.f32.gmra.mrb[12].mxu1 %v5706_v45  ;;  %v6311_v45 = vld [vmem:[#allocation2 + $0x109] sm:$0xff] }
 0x492   : > { %9154 = vmatprep.mubr.f32.mxu1 %v5707_v10  ;;  %v6312_v10 = vld [vmem:[#allocation2 + $0x111] sm:$0xff] }
 0x495   : > { %9155 = vmatmul.mubr.f32.gmra.mrb[14].mxu1 %v5708_v13  ;;  %v6313_v13 = vld [vmem:[#allocation2 + $0x129] sm:$0xff] }
 0x496   : > { %9157 = vmatprep.mubr.f32.mxu1 %v5709_v16  ;;  %v6314_v16 = vld [vmem:[#allocation2 + $0x131] sm:$0xff] }
 0x499   : > { %9158 = vmatmul.mubr.f32.gmra.mrb[16].mxu1 %v5710_v18  ;;  %v6315_v18 = vld [vmem:[#allocation2 + $0x149] sm:$0xff] }
 0x49a   : > { %9160 = vmatprep.mubr.f32.mxu1 %v5711_v20  ;;  %v6316_v20 = vld [vmem:[#allocation2 + $0x151] sm:$0xff] }
 0x49d   : > { %9161 = vmatmul.mubr.f32.gmra.mrb[18].mxu1 %v5712_v2  ;;  %v6317_v2 = vld [vmem:[#allocation2 + $0x169] sm:$0xff] }
 0x49e   : > { %9163 = vmatprep.mubr.f32.mxu1 %v5713_v35  ;;  %v6318_v35 = vld [vmem:[#allocation2 + $0x171] sm:$0xff] }
 0x4a1   : > { %9164 = vmatmul.mubr.f32.gmra.mrb[20].mxu1 %v5714_v4  ;;  %v6319_v4 = vld [vmem:[#allocation2 + $0x189] sm:$0xff] }
 0x4a2   : > { %9166 = vmatprep.mubr.f32.mxu1 %v11727_v9  ;;  %v7416_v9 = vld [vmem:[%s12167_s4 + $0x420] sm:$0xff] }
 0x4a5   : > { %9167 = vmatmul.mubr.f32.gmra.mrb[22].mxu1 %v11730_v51  ;;  %v7417_v51 = vld [vmem:[%s12167_s4 + $0x428] sm:$0xff] }
 0x4a6   : > { %9169 = vmatprep.mubr.f32.mxu1 %v5717_v48  ;;  %v9596_v7 = vpack.c.bf16 %v7417_v51, %v7416_v9  ;;  %v6320_v48 = vld [vmem:[#allocation2 + $0x191] sm:$0xff]  ;;  %v6325_v9 = vld [vmem:[#allocation2 + $0x1e9] sm:$0xff] }
 0x4a7   : > { %v6326_v51 = vld [vmem:[#allocation2 + $0x1f1] sm:$0xff] }
 0x4a9   : > { %9170 = vmatmul.mubr.f32.gmra.mrb[24].mxu1 %v5718_v56  ;;  %v6321_v56 = vld [vmem:[#allocation2 + $0x1a9] sm:$0xff] }
 0x4aa   : > { %9204 = vmatprep.mubr.f32.mxu1 %v11745_v21  ;;  %v7418_v21 = vld [vmem:[%s12167_s4 + $0x430] sm:$0xff] }
 0x4ad   : > { %9205 = vmatmul.mubr.f32.vlgmr.msra.gmra.mrb[26].mxu1 %v11748_v24  ;;  %v9600_v24 = vpack.c.bf16 %v7419_v58, %v7418_v21  ;;  %v6330_v21 = vld [vmem:[#allocation2 + $0x231] sm:$0xff] }
 0x4ae   : > { %9591 = vmatpush3.bf16.msra.mxu1 %v9588_v0  ;;  %9207 = vmatprep.mubr.f32.mxu1 %v11757_v26  ;;  %v7420_v26 = vld [vmem:[%s12167_s4 + $0x440] sm:$0xff]  ;;  %v6306_v0 = vld [vmem:[#allocation2 + $0xb1] sm:$0xff] }
 0x4af   : > { %9593 = vmatprep.subr.bf16.mxu1 %v9592_v5 }
 0x4b1   : > { %9208 = vmatmul.mubr.f32.gmra.mrb[28].mxu1 %v11760_v57  ;;  %v9604_v57 = vpack.c.bf16 %v7421_v50, %v7420_v26  ;;  %v12379_v26 = vld [vmem:[#allocation11_spill] sm:$0xff] }
 0x4b2   : > { %9210 = vmatprep.mubr.f32.mxu1 %v11769_v42  ;;  %9595 = vmatpush3.bf16.msra.mxu1 %v9592_v5  ;;  %v7422_v42 = vld [vmem:[%s12167_s4 + $0x450] sm:$0xff] }
 0x4b3   : > { %9597 = vmatprep.subr.bf16.mxu1 %v9596_v7  ;;  %v6324_v5 = vld [vmem:[#allocation2 + $0x1d1] sm:$0xff] }
 0x4b5   : > { %9211 = vmatmul.mubr.f32.gmra.mrb[30].mxu1 %v11772_v63  ;;  %v9608_v63 = vpack.c.bf16 %v7423_v22, %v7422_v42  ;;  %v12051_v42 = vld [vmem:[%s12169_s6] ss:$0 sm:$0xff] }
 0x4b6   : > { %9213 = vmatprep.mubr.f32.mxu1 %v11781_v1  ;;  %9599 = vmatpush3.bf16.msra.mxu1 %v9596_v7  ;;  %v7424_v1 = vld [vmem:[%s12167_s4 + $0x460] sm:$0xff]  ;;  %v6329_v7 = vld [vmem:[#allocation2 + $0x229] sm:$0xff] }
 0x4b7   : > { %9601 = vmatprep.subr.bf16.mxu1 %v9600_v24 }
 0x4b9   : > { %9214 = vmatmul.mubr.f32.gmra.mrb[0].mxu1 %v11784_v36  ;;  %v9612_v36 = vpack.c.bf16 %v7425_v59, %v7424_v1 }
 0x4ba   : > { %9216 = vmatprep.mubr.f32.mxu1 %v11793_v6  ;;  %9603 = vmatpush3.bf16.msra.mxu1 %v9600_v24  ;;  %v7426_v6 = vld [vmem:[%s12167_s4 + $0x470] sm:$0xff]  ;;  %v12045_v24 = vld [vmem:[%s12168_s5] ss:$0 sm:$0xff] }
 0x4bb   : > { %9605 = vmatprep.subr.bf16.mxu1 %v9604_v57 }
 0x4bd   : > { %9217 = vmatmul.mubr.f32.gmra.mrb[2].mxu1 %v11796_v28  ;;  %v9616_v28 = vpack.c.bf16 %v7427_v37, %v7426_v6 }
 0x4be   : > { %9219 = vmatprep.mubr.f32.mxu1 %v11805_v11  ;;  %9607 = vmatpush3.bf16.msra.mxu1 %v9604_v57  ;;  %v6009_v11 = vld [vmem:[#allocation2 + $0x148] sm:$0xff] }
 0x4bf   : > { %9609 = vmatprep.subr.bf16.mxu1 %v9608_v63 }
 0x4c1   : > { %9220 = vmatmul.mubr.f32.gmra.mrb[4].mxu1 %v11808_v14  ;;  %v6012_v14 = vld [vmem:[#allocation2 + $0x170] sm:$0xff] }
 0x4c2   : > { %9222 = vmatprep.mubr.f32.mxu1 %v11817_v19  ;;  %9611 = vmatpush3.bf16.msra.mxu1 %v9608_v63  ;;  %v6013_v19 = vld [vmem:[#allocation2 + $0x188] sm:$0xff] }
 0x4c3   : > { %9613 = vmatprep.subr.bf16.mxu1 %v9612_v36 }
 0x4c5   : > { %9223 = vmatmul.mubr.f32.gmra.mrb[6].mxu1 %v11820_v40  ;;  %v6015_v40 = vld [vmem:[#allocation2 + $0x1a8] sm:$0xff] }
 0x4c6   : > { %9225 = vmatprep.mubr.f32.mxu1 %v11823_v25  ;;  %9615 = vmatpush3.bf16.msra.mxu1 %v9612_v36  ;;  %v6016_v25 = vld [vmem:[#allocation2 + $0x1b0] sm:$0xff] }
 0x4c7   : > { %9617 = vmatprep.subr.bf16.mxu1 %v9616_v28 }
 0x4c9   : > { %9226 = vmatmul.mubr.f32.gmra.mrb[8].mxu1 %v11826_v54  ;;  %v6018_v54 = vld [vmem:[#allocation2 + $0x1d0] sm:$0xff] }
 0x4ca   : > { %9228 = vmatprep.mubr.f32.mxu1 %v6009_v11  ;;  %9619 = vmatpush3.bf16.msra.mxu1 %v9616_v28 }
 0x4cd   : > { %9229 = vmatmul.mubr.f32.gmra.mrb[10].mxu1 %v11830_v55  ;;  %v6021_v55 = vld [vmem:[#allocation2 + $0x208] sm:$0xff] }
 0x4ce   : > { %9231 = vmatprep.mubr.f32.mxu1 %v6011_v29 }
 0x4d1   : > { %9232 = vmatmul.mubr.f32.gmra.mrb[12].mxu1 %v6012_v14 }
 0x4d2   : > { %9234 = vmatprep.mubr.f32.mxu1 %v6013_v19 }
 0x4d5   : > { %9235 = vmatmul.mubr.f32.gmra.mrb[14].mxu1 %v6014_v32 }
 0x4d6   : > { %9237 = vmatprep.mubr.f32.mxu1 %v6015_v40 }
 0x4d9   : > { %9238 = vmatmul.mubr.f32.gmra.mrb[16].mxu1 %v6016_v25 }
 0x4da   : > { %9240 = vmatprep.mubr.f32.mxu1 %v6017_v44 }
 0x4dd   : > { %9241 = vmatmul.mubr.f32.gmra.mrb[18].mxu1 %v6018_v54 }
 0x4de   : > { %9243 = vmatprep.mubr.f32.mxu1 %v6019_v38 }
 0x4e1   : > { %9244 = vmatmul.mubr.f32.gmra.mrb[20].mxu1 %v6020_v27 }
 0x4e2   : > { %9246 = vmatprep.mubr.f32.mxu1 %v6021_v55 }
 0x4e5   : > { %9247 = vmatmul.mubr.f32.gmra.mrb[22].mxu1 %v6022_v41 }
 0x4e6   : > { %9249 = vmatprep.mubr.f32.mxu1 %v10158_v47 }
 0x4e9   : > { %9250 = vmatmul.mubr.f32.gmra.mrb[24].mxu1 %v10158_v47 }
 0x4ea   : > { %9284 = vmatprep.mubr.f32.mxu1 %v6299_v61 }
 0x4ed   : > { %9285 = vmatmul.mubr.f32.vlgmr.msra.gmra.mrb[26].mxu1 %v6300_v52 }
 0x4ee   : > { %9287 = vmatprep.mubr.f32.mxu1 %v6301_v12 }
 0x4f1   : > { %9288 = vmatmul.mubr.f32.gmra.mrb[28].mxu1 %v6302_v15 }
 0x4f2   : > { %9290 = vmatprep.mubr.f32.mxu1 %v6303_v17 }
 0x4f5   : > { %9291 = vmatmul.mubr.f32.gmra.mrb[30].mxu1 %v6304_v39 }
 0x4f6   : > { %9293 = vmatprep.mubr.f32.mxu1 %v6305_v62 }
 0x4f9   : > { %9294 = vmatmul.mubr.f32.gmra.mrb[0].mxu1 %v6306_v0 }
 0x4fa   : > { %9296 = vmatprep.mubr.f32.mxu1 %v6307_v33 }
 0x4fd   : > { %9297 = vmatmul.mubr.f32.gmra.mrb[2].mxu1 %v6308_v43 }
 0x4fe   : > { %9299 = vmatprep.mubr.f32.mxu1 %v6309_v46 }
 0x501   : > { %9300 = vmatmul.mubr.f32.gmra.mrb[4].mxu1 %v6310_v8 }
 0x502   : > { %9302 = vmatprep.mubr.f32.mxu1 %v6311_v45 }
 0x505   : > { %9303 = vmatmul.mubr.f32.gmra.mrb[6].mxu1 %v6312_v10 }
 0x506   : > { %9305 = vmatprep.mubr.f32.mxu1 %v6313_v13 }
 0x509   : > { %9306 = vmatmul.mubr.f32.gmra.mrb[8].mxu1 %v6314_v16 }
 0x50a   : > { %9308 = vmatprep.mubr.f32.mxu1 %v6315_v18 }
 0x50d   : > { %9309 = vmatmul.mubr.f32.gmra.mrb[10].mxu1 %v6316_v20 }
 0x50e   : > { %9311 = vmatprep.mubr.f32.mxu1 %v6317_v2 }
 0x511   : > { %9312 = vmatmul.mubr.f32.gmra.mrb[12].mxu1 %v6318_v35 }
 0x512   : > { %9314 = vmatprep.mubr.f32.mxu1 %v6319_v4 }
 0x515   : > { %9315 = vmatmul.mubr.f32.gmra.mrb[14].mxu1 %v6320_v48 }
 0x516   : > { %9317 = vmatprep.mubr.f32.mxu1 %v6321_v56 }
 0x519   : > { %9318 = vmatmul.mubr.f32.gmra.mrb[16].mxu1 %v6322_v60 }
 0x51a   : > { %9320 = vmatprep.mubr.f32.mxu1 %v6323_v30 }
 0x51d   : > { %9321 = vmatmul.mubr.f32.gmra.mrb[18].mxu1 %v6324_v5 }
 0x51e   : > { %9323 = vmatprep.mubr.f32.mxu1 %v6325_v9 }
 0x521   : > { %9324 = vmatmul.mubr.f32.gmra.mrb[20].mxu1 %v6326_v51 }
 0x522   : > { %9326 = vmatprep.mubr.f32.mxu1 %v11925_v3  ;;  %v12380_v3 = vld [vmem:[#allocation12_spill] sm:$0xff] }
 0x525   : > { %9327 = vmatmul.mubr.f32.gmra.mrb[22].mxu1 %v11928_v34 }
 0x526   : > { %9329 = vmatprep.mubr.f32.mxu1 %v6329_v7 }
 0x529   : > { %9330 = vmatmul.mubr.f32.gmra.mrb[24].mxu1 %v6330_v21 }
 0x5c0   : > { %v9286_v58 = vpop.f32.mrb[26].mxu1 }
 0x5c1   : > { %v9636_v50 = vadd.f32 %v9286_v58, %v12379_v26  ;;  %v6414_v57 = vpop.f32.mrb[27].mxu1 }
 0x5c2   : > { %v9637_v22 = vadd.f32 %v6414_v57, %v12380_v3 }
 0x5c3   : > { %v6613_v34 = vmul.f32 %v9636_v50, %v12045_v24 }
 0x5c4   : > { %v6612_v63 = vmul.f32 %v9637_v22, %v12045_v24  ;;  %v9289_v1 = vpop.f32.mrb[28].mxu1 }
 0x5c5   : > { %v6652_v59 = vadd.f32 %v12051_v42, %v6613_v34  ;;  %v9638_v36 = vadd.f32 %v9289_v1, %v11696_v31  ;;  %v6424_v6 = vpop.f32.mrb[29].mxu1 }
 0x5c6   : > { %v6651_v37 = vadd.f32 %v12051_v42, %v6612_v63  ;;  %v9639_v28 = vadd.f32 %v6424_v6, %v11704_v53 }
 0x5c7   : > { %v6684_v11 = vmax.f32 %v6652_v59, 0.0  ;;  %v6615_v29 = vmul.f32 %v9638_v36, %v12045_v24 }
 0x5c8   : > { %v6683_v14 = vmax.f32 %v6651_v37, 0.0  ;;  %v6614_v19 = vmul.f32 %v9639_v28, %v12045_v24  ;;  %v9292_v31 = vpop.f32.mrb[30].mxu1 }
 0x5c9   : > { %6716 = vst [vmem:[%s12062_s11 + $0x8] sm:$0xff] %v6684_v11  ;;  %v6654_v32 = vadd.f32 %v12051_v42, %v6615_v29  ;;  %v9640_v40 = vadd.f32 %v9292_v31, %v11708_v49  ;;  %v6434_v25 = vpop.f32.mrb[31].mxu1 }
 0x5ca   : > { %6715 = vst [vmem:[%s12062_s11] sm:$0xff] %v6683_v14  ;;  %v6653_v44 = vadd.f32 %v12051_v42, %v6614_v19  ;;  %v9641_v53 = vadd.f32 %v6434_v25, %v11710_v23 }
 0x5cb   : > { %v6686_v54 = vmax.f32 %v6654_v32, 0.0  ;;  %v6617_v38 = vmul.f32 %v9640_v40, %v12045_v24 }
 0x5cc   : > { %v6685_v27 = vmax.f32 %v6653_v44, 0.0  ;;  %v6616_v55 = vmul.f32 %v9641_v53, %v12045_v24  ;;  %v9295_v41 = vpop.f32.mrb[0].mxu1 }
 0x5cd   : > { %6718 = vst [vmem:[%s12062_s11 + $0x18] sm:$0xff] %v6686_v54  ;;  %v6656_v47 = vadd.f32 %v12051_v42, %v6617_v38  ;;  %v6619_v49 = vmul.f32 %v9295_v41, %v12045_v24  ;;  %v6444_v61 = vpop.f32.mrb[1].mxu1 }
 0x5ce   : > { %6717 = vst [vmem:[%s12062_s11 + $0x10] sm:$0xff] %v6685_v27  ;;  %v6655_v52 = vadd.f32 %v12051_v42, %v6616_v55  ;;  %v6618_v23 = vmul.f32 %v12045_v24, %v6444_v61 }
 0x5cf   : > { %v6688_v12 = vmax.f32 %v6656_v47, 0.0  ;;  %v6658_v15 = vadd.f32 %v12051_v42, %v6619_v49 }
 0x5d0   : > { %v6687_v17 = vmax.f32 %v6655_v52, 0.0  ;;  %v6657_v39 = vadd.f32 %v12051_v42, %v6618_v23  ;;  %v9298_v62 = vpop.f32.mrb[2].mxu1 }
 0x5d1   : > { %6720 = vst [vmem:[%s12062_s11 + $0x28] sm:$0xff] %v6688_v12  ;;  %v6690_v0 = vmax.f32 %v6658_v15, 0.0  ;;  %v6621_v33 = vmul.f32 %v9298_v62, %v12045_v24  ;;  %v6454_v43 = vpop.f32.mrb[3].mxu1 }
 0x5d2   : > { %6719 = vst [vmem:[%s12062_s11 + $0x20] sm:$0xff] %v6687_v17  ;;  %v6689_v46 = vmax.f32 %v6657_v39, 0.0  ;;  %v6620_v8 = vmul.f32 %v12045_v24, %v6454_v43 }
 0x5d3   : > { %6722 = vst [vmem:[%s12062_s11 + $0x38] sm:$0xff] %v6690_v0  ;;  %v6660_v45 = vadd.f32 %v12051_v42, %v6621_v33 }
 0x5d4   : > { %6721 = vst [vmem:[%s12062_s11 + $0x30] sm:$0xff] %v6689_v46  ;;  %v6659_v10 = vadd.f32 %v12051_v42, %v6620_v8  ;;  %v9301_v13 = vpop.f32.mrb[4].mxu1 }
 0x5d5   : > { %v6692_v16 = vmax.f32 %v6660_v45, 0.0  ;;  %v6623_v18 = vmul.f32 %v9301_v13, %v12045_v24  ;;  %v6464_v20 = vpop.f32.mrb[5].mxu1 }
 0x5d6   : > { %v6691_v2 = vmax.f32 %v6659_v10, 0.0  ;;  %v6622_v35 = vmul.f32 %v12045_v24, %v6464_v20 }
 0x5d7   : > { %6724 = vst [vmem:[%s12062_s11 + $0x48] sm:$0xff] %v6692_v16  ;;  %v6662_v4 = vadd.f32 %v12051_v42, %v6623_v18 }
 0x5d8   : > { %6723 = vst [vmem:[%s12062_s11 + $0x40] sm:$0xff] %v6691_v2  ;;  %v6661_v48 = vadd.f32 %v12051_v42, %v6622_v35  ;;  %v9304_v56 = vpop.f32.mrb[6].mxu1 }
 0x5d9   : > { %v6694_v60 = vmax.f32 %v6662_v4, 0.0  ;;  %v6625_v30 = vmul.f32 %v9304_v56, %v12045_v24  ;;  %v6474_v5 = vpop.f32.mrb[7].mxu1 }
 0x5da   : > { %v6693_v9 = vmax.f32 %v6661_v48, 0.0  ;;  %v6624_v51 = vmul.f32 %v12045_v24, %v6474_v5 }
 0x5db   : > { %6726 = vst [vmem:[%s12062_s11 + $0x58] sm:$0xff] %v6694_v60  ;;  %v6664_v7 = vadd.f32 %v12051_v42, %v6625_v30 }
 0x5dc   : > { %6725 = vst [vmem:[%s12062_s11 + $0x50] sm:$0xff] %v6693_v9  ;;  %v6663_v21 = vadd.f32 %v12051_v42, %v6624_v51  ;;  %v9307_v58 = vpop.f32.mrb[8].mxu1 }
 0x5dd   : > { %v6696_v26 = vmax.f32 %v6664_v7, 0.0  ;;  %v6627_v50 = vmul.f32 %v9307_v58, %v12045_v24  ;;  %v6484_v57 = vpop.f32.mrb[9].mxu1 }
 0x5de   : > { %v6695_v3 = vmax.f32 %v6663_v21, 0.0  ;;  %v6626_v22 = vmul.f32 %v12045_v24, %v6484_v57 }
 0x5df   : > { %6728 = vst [vmem:[%s12062_s11 + $0x68] sm:$0xff] %v6696_v26  ;;  %v6666_v34 = vadd.f32 %v12051_v42, %v6627_v50 }
 0x5e0   : > { %6727 = vst [vmem:[%s12062_s11 + $0x60] sm:$0xff] %v6695_v3  ;;  %v6665_v63 = vadd.f32 %v12051_v42, %v6626_v22  ;;  %v9310_v1 = vpop.f32.mrb[10].mxu1 }
 0x5e1   : > { %v6698_v59 = vmax.f32 %v6666_v34, 0.0  ;;  %v6629_v36 = vmul.f32 %v9310_v1, %v12045_v24  ;;  %v6494_v6 = vpop.f32.mrb[11].mxu1 }
 0x5e2   : > { %v6697_v37 = vmax.f32 %v6665_v63, 0.0  ;;  %v6628_v28 = vmul.f32 %v12045_v24, %v6494_v6 }
 0x5e3   : > { %6730 = vst [vmem:[%s12062_s11 + $0x78] sm:$0xff] %v6698_v59  ;;  %v6668_v11 = vadd.f32 %v12051_v42, %v6629_v36 }
 0x5e4   : > { %6729 = vst [vmem:[%s12062_s11 + $0x70] sm:$0xff] %v6697_v37  ;;  %v6667_v29 = vadd.f32 %v12051_v42, %v6628_v28  ;;  %v9313_v14 = vpop.f32.mrb[12].mxu1 }
 0x5e5   : > { %v6700_v19 = vmax.f32 %v6668_v11, 0.0  ;;  %v6631_v31 = vmul.f32 %v9313_v14, %v12045_v24  ;;  %v6504_v32 = vpop.f32.mrb[13].mxu1 }
 0x5e6   : > { %v6699_v40 = vmax.f32 %v6667_v29, 0.0  ;;  %v6630_v25 = vmul.f32 %v12045_v24, %v6504_v32 }
 0x5e7   : > { %6732 = vst [vmem:[%s12062_s11 + $0x88] sm:$0xff] %v6700_v19  ;;  %v6670_v44 = vadd.f32 %v12051_v42, %v6631_v31 }
 0x5e8   : > { %6731 = vst [vmem:[%s12062_s11 + $0x80] sm:$0xff] %v6699_v40  ;;  %v6669_v53 = vadd.f32 %v12051_v42, %v6630_v25  ;;  %v9316_v54 = vpop.f32.mrb[14].mxu1 }
 0x5e9   : > { %v6702_v38 = vmax.f32 %v6670_v44, 0.0  ;;  %v6633_v27 = vmul.f32 %v9316_v54, %v12045_v24  ;;  %v6514_v55 = vpop.f32.mrb[15].mxu1 }
 0x5ea   : > { %v6701_v41 = vmax.f32 %v6669_v53, 0.0  ;;  %v6632_v47 = vmul.f32 %v12045_v24, %v6514_v55 }
 0x5eb   : > { %6734 = vst [vmem:[%s12062_s11 + $0x98] sm:$0xff] %v6702_v38  ;;  %v6672_v49 = vadd.f32 %v12051_v42, %v6633_v27 }
 0x5ec   : > { %6733 = vst [vmem:[%s12062_s11 + $0x90] sm:$0xff] %v6701_v41  ;;  %v6671_v61 = vadd.f32 %v12051_v42, %v6632_v47  ;;  %v9319_v52 = vpop.f32.mrb[16].mxu1 }
 0x5ed   : > { %v6704_v23 = vmax.f32 %v6672_v49, 0.0  ;;  %v6635_v12 = vmul.f32 %v9319_v52, %v12045_v24  ;;  %v6524_v15 = vpop.f32.mrb[17].mxu1 }
 0x5ee   : > { %v6703_v17 = vmax.f32 %v6671_v61, 0.0  ;;  %v6634_v39 = vmul.f32 %v12045_v24, %v6524_v15 }
 0x5ef   : > { %6736 = vst [vmem:[%s12062_s11 + $0xa8] sm:$0xff] %v6704_v23  ;;  %v6674_v62 = vadd.f32 %v12051_v42, %v6635_v12 }
 0x5f0   : > { %6735 = vst [vmem:[%s12062_s11 + $0xa0] sm:$0xff] %v6703_v17  ;;  %v6673_v0 = vadd.f32 %v12051_v42, %v6634_v39  ;;  %v9322_v33 = vpop.f32.mrb[18].mxu1 }
 0x5f1   : > { %v6706_v43 = vmax.f32 %v6674_v62, 0.0  ;;  %v6637_v46 = vmul.f32 %v9322_v33, %v12045_v24  ;;  %v6534_v8 = vpop.f32.mrb[19].mxu1 }
 0x5f2   : > { %v6705_v45 = vmax.f32 %v6673_v0, 0.0  ;;  %v6636_v10 = vmul.f32 %v12045_v24, %v6534_v8 }
 0x5f3   : > { %6738 = vst [vmem:[%s12062_s11 + $0xb8] sm:$0xff] %v6706_v43  ;;  %v6676_v13 = vadd.f32 %v12051_v42, %v6637_v46 }
 0x5f4   : > { %6737 = vst [vmem:[%s12062_s11 + $0xb0] sm:$0xff] %v6705_v45  ;;  %v6675_v16 = vadd.f32 %v12051_v42, %v6636_v10  ;;  %v9325_v18 = vpop.f32.mrb[20].mxu1 }
 0x5f5   : > { %v6708_v20 = vmax.f32 %v6676_v13, 0.0  ;;  %v6639_v2 = vmul.f32 %v9325_v18, %v12045_v24  ;;  %v6544_v35 = vpop.f32.mrb[21].mxu1 }
 0x5f6   : > { %v6707_v4 = vmax.f32 %v6675_v16, 0.0  ;;  %v6638_v48 = vmul.f32 %v12045_v24, %v6544_v35 }
 0x5f7   : > { %6740 = vst [vmem:[%s12062_s11 + $0xc8] sm:$0xff] %v6708_v20  ;;  %v6678_v56 = vadd.f32 %v12051_v42, %v6639_v2 }
 0x5f8   : > { %6739 = vst [vmem:[%s12062_s11 + $0xc0] sm:$0xff] %v6707_v4  ;;  %v6677_v60 = vadd.f32 %v12051_v42, %v6638_v48  ;;  %v9328_v30 = vpop.f32.mrb[22].mxu1 }
 0x5f9   : > { %v6710_v5 = vmax.f32 %v6678_v56, 0.0  ;;  %v6641_v9 = vmul.f32 %v9328_v30, %v12045_v24  ;;  %v6554_v51 = vpop.f32.mrb[23].mxu1 }
 0x5fa   : > { %v6709_v7 = vmax.f32 %v6677_v60, 0.0  ;;  %v6640_v21 = vmul.f32 %v12045_v24, %v6554_v51 }
 0x5fb   : > { %6742 = vst [vmem:[%s12062_s11 + $0xd8] sm:$0xff] %v6710_v5  ;;  %v6680_v58 = vadd.f32 %v12051_v42, %v6641_v9 }
 0x5fc   : > { %6741 = vst [vmem:[%s12062_s11 + $0xd0] sm:$0xff] %v6709_v7  ;;  %v6679_v26 = vadd.f32 %v12051_v42, %v6640_v21  ;;  %v9331_v50 = vpop.f32.mrb[24].mxu1 }
 0x5fd   : > { %v6712_v57 = vmax.f32 %v6680_v58, 0.0  ;;  %v6643_v3 = vmul.f32 %v9331_v50, %v12045_v24  ;;  %v6564_v22 = vpop.f32.mrb[25].mxu1 }
 0x5fe   : > { %v6711_v34 = vmax.f32 %v6679_v26, 0.0  ;;  %v6642_v63 = vmul.f32 %v12045_v24, %v6564_v22 }
 0x5ff   : > { %6744 = vst [vmem:[%s12062_s11 + $0xe8] sm:$0xff] %v6712_v57  ;;  %v6682_v1 = vadd.f32 %v12051_v42, %v6643_v3 }
 0x600   : > { %6743 = vst [vmem:[%s12062_s11 + $0xe0] sm:$0xff] %v6711_v34  ;;  %v6681_v59 = vadd.f32 %v12051_v42, %v6642_v63 }
 0x601   : > { %v6714_v36 = vmax.f32 %v6682_v1, 0.0 }
 0x602   : > { %v6713_v6 = vmax.f32 %v6681_v59, 0.0 }
 0x603   : > { %6746 = vst [vmem:[%s12062_s11 + $0xf8] sm:$0xff] %v6714_v36 }
 0x604   : > { %6745 = vst [vmem:[%s12062_s11 + $0xf0] sm:$0xff] %v6713_v6 }
 0x605 PF: > { %s17_s24 = sadd.s32 1, %s10165_s24  }
 0x606   : > { %p14_p4 = scmp.ge.s32.totalorder %s17_s24, 4  }
 0x608   :  { %16 = sbr.rel (!%p14_p4) target bundleno = 1 (0x1), region = 98 }

</bundles_post_ra>
